<compile_context>
chip_gen: v6e
topology: v6e:2x2x1
jax: 0.10.0
libtpu: 0.0.40
codegen_flags: <defaults>
</compile_context>

<pallas_src>
import math
import numpy as np
import jax
import jax.numpy as jnp
from jax import lax
from jax.experimental import pallas as pl
from jax.experimental.pallas import tpu as pltpu

LANE = 128
SUBLANE = 8


def _round_up(x, m):
    return (x + m - 1) // m * m


# ----------------------------- Pallas kernel ------------------------------- #

def make_fused_lstm_kernel(num_layers, T):
    """Fused multi-layer LSTM + FC + sigmoid kernel body (single grid point)."""

    def kernel(*refs):
        # inputs
        x_ref = refs[0]                                    # (T, Bp, Inp)
        mask_ref = refs[1]                                 # (T, Bp, Hp)  1.0 while t < len
        w_ih = refs[2:2 + num_layers]                      # (Inp_l, 4*Hp) each
        w_hh = refs[2 + num_layers:2 + 2 * num_layers]     # (Hp, 4*Hp) each
        bias = refs[2 + 2 * num_layers:2 + 3 * num_layers] # (1, 4*Hp) each
        fc_w = refs[2 + 3 * num_layers]                    # (Hp, Op)
        fc_b = refs[3 + 3 * num_layers]                    # (1, Op)
        # outputs
        out_ref = refs[4 + 3 * num_layers]                 # (Bp, Op)
        # scratch
        xg_ref = refs[5 + 3 * num_layers]                  # (T, Bp, 4*Hp) pre-gates
        seq_ref = refs[6 + 3 * num_layers]                 # (T, Bp, Hp)   layer output seq

        Bp = x_ref.shape[1]
        Hp = w_hh[0].shape[0]

        h_last = jnp.zeros((Bp, Hp), jnp.float32)
        for layer in range(num_layers):
            # ---- input projection for all T steps at once (off the serial path) ----
            inp = x_ref[...] if layer == 0 else seq_ref[...]
            in_dim = inp.shape[-1]
            pre = jnp.dot(inp.reshape(T * Bp, in_dim), w_ih[layer][...],
                          preferred_element_type=jnp.float32) + bias[layer][...]
            xg_ref[...] = pre.reshape(T, Bp, 4 * Hp)

            whh = w_hh[layer][...]                         # loop-invariant, hoisted
            last_layer = (layer == num_layers - 1)

            # ---- serial recurrence: only h @ W_hh on the critical path ----
            def step(t, carry, whh=whh, last_layer=last_layer):
                h, c = carry
                g = xg_ref[t] + jnp.dot(h, whh, preferred_element_type=jnp.float32)
                # PyTorch gate order i, f, g, o; each slice is a whole 128-lane tile.
                i_g = jax.nn.sigmoid(g[:, 0 * Hp:1 * Hp])
                f_g = jax.nn.sigmoid(g[:, 1 * Hp:2 * Hp])
                g_g = jnp.tanh(g[:, 2 * Hp:3 * Hp])
                o_g = jax.nn.sigmoid(g[:, 3 * Hp:4 * Hp])
                c_new = f_g * c + i_g * g_g
                h_new = o_g * jnp.tanh(c_new)
                m = mask_ref[t]                            # (Bp, Hp)
                c = c + m * (c_new - c)                    # freeze past lengths[b]
                h = h + m * (h_new - h)
                if not last_layer:
                    seq_ref[t] = h                         # next layer's input
                return h, c

            h0 = jnp.zeros((Bp, Hp), jnp.float32)
            c0 = jnp.zeros((Bp, Hp), jnp.float32)
            h_last, _ = lax.fori_loop(0, T, step, (h0, c0), unroll=True)

        # ---- FC + sigmoid on the final (frozen == step lengths[b]-1) hidden state ----
        out_ref[...] = jax.nn.sigmoid(
            jnp.dot(h_last, fc_w[...], preferred_element_type=jnp.float32) + fc_b[...])

    return kernel


# ------------------------------ Wrapper ------------------------------------- #

def lstm_model_forward(params, x, lengths):
    """x: (B, T, input_size) batch-first, lengths: (B,) int.  Returns (B,) probs."""
    B, T, in_size = x.shape
    num_layers = len(params["lstm"])
    H = params["lstm"][0][1].shape[1]          # w_hh: (4H, H)
    O = params["fc_w"].shape[0]

    Bp = _round_up(B, SUBLANE)
    Hp = _round_up(H, LANE)
    Inp = _round_up(in_size, LANE)
    Op = _round_up(O, LANE)

    # ---- host-side packing: pad to lane/sublane-friendly shapes ----
    x_tm = jnp.transpose(x.astype(jnp.float32), (1, 0, 2))              # (T, B, In)
    x_tm = jnp.pad(x_tm, ((0, 0), (0, Bp - B), (0, Inp - in_size)))

    lengths_p = jnp.pad(lengths.astype(jnp.int32), (0, Bp - B))         # padded rows: len 0
    mask = (jnp.arange(T, dtype=jnp.int32)[:, None] < lengths_p[None, :]).astype(jnp.float32)
    mask = jnp.broadcast_to(mask[:, :, None], (T, Bp, Hp))              # lane-dense mask

    # Gate-blocked, transposed, zero-padded weights: gate g occupies cols [g*Hp, g*Hp+H).
    w_ih_list, w_hh_list, b_list = [], [], []
    for layer, (w_ih, w_hh, b_ih, b_hh) in enumerate(params["lstm"]):
        in_l = w_ih.shape[1]
        in_lp = Inp if layer == 0 else Hp
        wi = jnp.zeros((in_lp, 4 * Hp), jnp.float32)
        wh = jnp.zeros((Hp, 4 * Hp), jnp.float32)
        bb = jnp.zeros((1, 4 * Hp), jnp.float32)
        for g in range(4):
            wi = wi.at[:in_l, g * Hp:g * Hp + H].set(w_ih[g * H:(g + 1) * H, :].T)
            wh = wh.at[:H, g * Hp:g * Hp + H].set(w_hh[g * H:(g + 1) * H, :].T)
            bb = bb.at[0, g * Hp:g * Hp + H].set(b_ih[g * H:(g + 1) * H] + b_hh[g * H:(g + 1) * H])
        w_ih_list.append(wi)
        w_hh_list.append(wh)
        b_list.append(bb)

    fc_w = jnp.zeros((Hp, Op), jnp.float32).at[:H, :O].set(params["fc_w"].T)
    fc_b = jnp.zeros((1, Op), jnp.float32).at[0, :O].set(params["fc_b"])

    kernel = make_fused_lstm_kernel(num_layers, T)

    def full(shape):
        return pl.BlockSpec(shape, lambda i, _s=shape: (0,) * len(_s))

    in_specs = ([full((T, Bp, Inp)), full((T, Bp, Hp))]
                + [full(w.shape) for w in w_ih_list]
                + [full(w.shape) for w in w_hh_list]
                + [full(b.shape) for b in b_list]
                + [full(fc_w.shape), full(fc_b.shape)])

    out = pl.pallas_call(
        kernel,
        out_shape=jax.ShapeDtypeStruct((Bp, Op), jnp.float32),
        grid_spec=pltpu.PrefetchScalarGridSpec(
            num_scalar_prefetch=0,
            grid=(1,),
            in_specs=in_specs,
            out_specs=full((Bp, Op)),
            scratch_shapes=[pltpu.VMEM((T, Bp, 4 * Hp), jnp.float32),   # pre-gates
                            pltpu.VMEM((T, Bp, Hp), jnp.float32)],      # layer output seq
        ),
        compiler_params=pltpu.CompilerParams(dimension_semantics=("arbitrary",)),
    )(x_tm, mask, *w_ih_list, *w_hh_list, *b_list, fc_w, fc_b)

    return jnp.squeeze(out[:B, :O])                                     # matches out.squeeze()


# ------------------------- Deterministic parameters ------------------------- #

def init_params(key, input_size, hidden_size, num_layers, output_size):
    k_lstm = 1.0 / math.sqrt(hidden_size)
    params = {"lstm": []}
    for layer in range(num_layers):
        in_sz = input_size if layer == 0 else hidden_size
        key, k1, k2, k3, k4 = jax.random.split(key, 5)
        w_ih = jax.random.uniform(k1, (4 * hidden_size, in_sz), jnp.float32, -k_lstm, k_lstm)
        w_hh = jax.random.uniform(k2, (4 * hidden_size, hidden_size), jnp.float32, -k_lstm, k_lstm)
        b_ih = jax.random.uniform(k3, (4 * hidden_size,), jnp.float32, -k_lstm, k_lstm)
        b_hh = jax.random.uniform(k4, (4 * hidden_size,), jnp.float32, -k_lstm, k_lstm)
        params["lstm"].append((w_ih, w_hh, b_ih, b_hh))
    key, k1, k2 = jax.random.split(key, 3)
    k_fc = 1.0 / math.sqrt(hidden_size)
    params["fc_w"] = jax.random.uniform(k1, (output_size, hidden_size), jnp.float32, -k_fc, k_fc)
    params["fc_b"] = jax.random.uniform(k2, (output_size,), jnp.float32, -k_fc, k_fc)
    return params


# ------------------------------ Reference ----------------------------------- #

def _sigmoid(x):
    return 1.0 / (1.0 + np.exp(-x))


def ref_forward(params, x, lengths):
    x = np.asarray(x, np.float32)
    lengths = np.asarray(lengths)
    B, T, _ = x.shape
    seq = x
    for (w_ih, w_hh, b_ih, b_hh) in params["lstm"]:
        w_ih = np.asarray(w_ih); w_hh = np.asarray(w_hh)
        b = np.asarray(b_ih) + np.asarray(b_hh)
        H = w_hh.shape[1]
        h = np.zeros((B, H), np.float32); c = np.zeros((B, H), np.float32)
        out = np.zeros((B, T, H), np.float32)
        for t in range(T):
            g = seq[:, t, :] @ w_ih.T + h @ w_hh.T + b
            i = _sigmoid(g[:, :H]); f = _sigmoid(g[:, H:2 * H])
            gg = np.tanh(g[:, 2 * H:3 * H]); o = _sigmoid(g[:, 3 * H:])
            c_new = f * c + i * gg
            h_new = o * np.tanh(c_new)
            m = (t < lengths)[:, None]
            c = np.where(m, c_new, c); h = np.where(m, h_new, h)
            out[:, t, :] = h
        seq = out
    h_last = seq[np.arange(B), lengths - 1, :]
    y = h_last @ np.asarray(params["fc_w"]).T + np.asarray(params["fc_b"])
    return np.squeeze(_sigmoid(y))


# --------------------------------- Main ------------------------------------- #

if __name__ == "__main__":
    input_size, hidden_size, num_layers, output_size = 16, 32, 2, 1
    B, T = 4, 8

    key = jax.random.PRNGKey(0)
    kp, kx = jax.random.split(key)
    params = init_params(kp, input_size, hidden_size, num_layers, output_size)

    x = jax.random.normal(kx, (B, T, input_size), jnp.float32)
    lengths = jnp.array([8, 5, 3, 8], dtype=jnp.int32)   # variable-length sequences

    fwd = jax.jit(lstm_model_forward)                    # weight packing traced/cached once
    out = jax.block_until_ready(fwd(params, x, lengths))

    ref = ref_forward(params, x, lengths)
    np.testing.assert_allclose(np.asarray(out), ref, rtol=1e-4, atol=1e-5)

    print("KERNEL_OK")
</pallas_src>

<mosaic_0001>
module attributes {stable_mosaic.version = 11 : i64} {
  func.func @kernel(%arg0: i32, %arg1: memref<8x8x128xf32, #tpu.memory_space<vmem>>, %arg2: memref<8x8x128xf32, #tpu.memory_space<vmem>>, %arg3: memref<128x512xf32, #tpu.memory_space<vmem>>, %arg4: memref<128x512xf32, #tpu.memory_space<vmem>>, %arg5: memref<128x512xf32, #tpu.memory_space<vmem>>, %arg6: memref<128x512xf32, #tpu.memory_space<vmem>>, %arg7: memref<1x512xf32, #tpu.memory_space<vmem>>, %arg8: memref<1x512xf32, #tpu.memory_space<vmem>>, %arg9: memref<128x128xf32, #tpu.memory_space<vmem>>, %arg10: memref<1x128xf32, #tpu.memory_space<vmem>>, %arg11: memref<8x128xf32, #tpu.memory_space<vmem>>, %arg12: memref<8x8x512xf32, #tpu.memory_space<vmem>>, %arg13: memref<8x8x128xf32, #tpu.memory_space<vmem>>) attributes {dimension_semantics = [#tpu.dimension_semantics<arbitrary>], iteration_bounds = array<i64: 1>, scalar_prefetch = 0 : i64, scratch_operands = 2 : i64, tpu.core_type = #tpu.core_type<tc>, window_params = [{pipeline_mode = #tpu.pipeline_mode<synchronous>, transform_indices = @transform_0, window_bounds = array<i64: 8, 8, 128>}, {pipeline_mode = #tpu.pipeline_mode<synchronous>, transform_indices = @transform_1, window_bounds = array<i64: 8, 8, 128>}, {pipeline_mode = #tpu.pipeline_mode<synchronous>, transform_indices = @transform_2, window_bounds = array<i64: 128, 512>}, {pipeline_mode = #tpu.pipeline_mode<synchronous>, transform_indices = @transform_3, window_bounds = array<i64: 128, 512>}, {pipeline_mode = #tpu.pipeline_mode<synchronous>, transform_indices = @transform_4, window_bounds = array<i64: 128, 512>}, {pipeline_mode = #tpu.pipeline_mode<synchronous>, transform_indices = @transform_5, window_bounds = array<i64: 128, 512>}, {pipeline_mode = #tpu.pipeline_mode<synchronous>, transform_indices = @transform_6, window_bounds = array<i64: 1, 512>}, {pipeline_mode = #tpu.pipeline_mode<synchronous>, transform_indices = @transform_7, window_bounds = array<i64: 1, 512>}, {pipeline_mode = #tpu.pipeline_mode<synchronous>, transform_indices = @transform_8, window_bounds = array<i64: 128, 128>}, {pipeline_mode = #tpu.pipeline_mode<synchronous>, transform_indices = @transform_9, window_bounds = array<i64: 1, 128>}, {pipeline_mode = #tpu.pipeline_mode<synchronous>, transform_indices = @transform_10, window_bounds = array<i64: 8, 128>}]} {
    %c0 = arith.constant 0 : index
    %c0_0 = arith.constant 0 : index
    %c0_1 = arith.constant 0 : index
    %0 = vector.load %arg1[%c0, %c0_0, %c0_1] : memref<8x8x128xf32, #tpu.memory_space<vmem>>, vector<8x8x128xf32>
    %1 = vector.shape_cast %0 : vector<8x8x128xf32> to vector<64x128xf32>
    %c0_2 = arith.constant 0 : index
    %c0_3 = arith.constant 0 : index
    %2 = vector.load %arg3[%c0_2, %c0_3] : memref<128x512xf32, #tpu.memory_space<vmem>>, vector<128x512xf32>
    %cst = arith.constant dense<0.000000e+00> : vector<64x512xf32>
    %3 = tpu.matmul %1, %2, %cst {dimension_numbers = #tpu.dot_dimension_numbers<[1], [0], [0], [1], [0, 0, 1, 1], [], []>} : vector<64x128xf32>, vector<128x512xf32>, vector<64x512xf32> -> vector<64x512xf32>
    %c0_4 = arith.constant 0 : index
    %c0_5 = arith.constant 0 : index
    %4 = vector.load %arg7[%c0_4, %c0_5] : memref<1x512xf32, #tpu.memory_space<vmem>>, vector<1x512xf32>
    %5 = vector.broadcast %4 : vector<1x512xf32> to vector<64x512xf32>
    %6 = arith.addf %3, %5 : vector<64x512xf32>
    %7 = vector.shape_cast %6 : vector<64x512xf32> to vector<8x8x512xf32>
    %c0_6 = arith.constant 0 : index
    %c0_7 = arith.constant 0 : index
    %c0_8 = arith.constant 0 : index
    %8 = vector.load %arg12[%c0_6, %c0_7, %c0_8] : memref<8x8x512xf32, #tpu.memory_space<vmem>>, vector<8x8x512xf32>
    tpu.vector_store %arg12[%c0_6, %c0_7, %c0_8], %7 {strides = array<i32>} : memref<8x8x512xf32, #tpu.memory_space<vmem>>, vector<8x8x512xf32>,
    %c0_9 = arith.constant 0 : index
    %c0_10 = arith.constant 0 : index
    %9 = vector.load %arg5[%c0_9, %c0_10] : memref<128x512xf32, #tpu.memory_space<vmem>>, vector<128x512xf32>
    %cst_11 = arith.constant 0.000000e+00 : f32
    %10 = vector.broadcast %cst_11 : f32 to vector<8x128xf32>
    %cst_12 = arith.constant 0.000000e+00 : f32
    %11 = vector.broadcast %cst_12 : f32 to vector<8x128xf32>
    %c0_i32 = arith.constant 0 : i32
    %12 = arith.index_cast %c0_i32 : i32 to index
    %c0_13 = arith.constant 0 : index
    %c0_14 = arith.constant 0 : index
    %13 = vector.load %arg12[%12, %c0_13, %c0_14] : memref<8x8x512xf32, #tpu.memory_space<vmem>>, vector<1x8x512xf32>
    %14 = vector.shape_cast %13 : vector<1x8x512xf32> to vector<8x512xf32>
    %cst_15 = arith.constant dense<0.000000e+00> : vector<8x512xf32>
    %15 = tpu.matmul %10, %9, %cst_15 {dimension_numbers = #tpu.dot_dimension_numbers<[1], [0], [0], [1], [0, 0, 1, 1], [], []>} : vector<8x128xf32>, vector<128x512xf32>, vector<8x512xf32> -> vector<8x512xf32>
    %16 = arith.addf %14, %15 : vector<8x512xf32>
    %17 = vector.extract_strided_slice %16 {offsets = [0, 0], sizes = [8, 128], strides = [1, 1]} : vector<8x512xf32> to vector<8x128xf32>
    %18 = arith.negf %17 : vector<8x128xf32>
    %19 = math.exp %18 : vector<8x128xf32>
    %cst_16 = arith.constant 1.000000e+00 : f32
    %20 = vector.broadcast %cst_16 : f32 to vector<8x128xf32>
    %21 = arith.addf %20, %19 : vector<8x128xf32>
    %22 = arith.divf %20, %21 : vector<8x128xf32>
    %23 = vector.extract_strided_slice %16 {offsets = [0, 128], sizes = [8, 128], strides = [1, 1]} : vector<8x512xf32> to vector<8x128xf32>
    %24 = arith.negf %23 : vector<8x128xf32>
    %25 = math.exp %24 : vector<8x128xf32>
    %cst_17 = arith.constant 1.000000e+00 : f32
    %26 = vector.broadcast %cst_17 : f32 to vector<8x128xf32>
    %27 = arith.addf %26, %25 : vector<8x128xf32>
    %28 = arith.divf %26, %27 : vector<8x128xf32>
    %29 = vector.extract_strided_slice %16 {offsets = [0, 256], sizes = [8, 128], strides = [1, 1]} : vector<8x512xf32> to vector<8x128xf32>
    %30 = math.tanh %29 : vector<8x128xf32>
    %31 = vector.extract_strided_slice %16 {offsets = [0, 384], sizes = [8, 128], strides = [1, 1]} : vector<8x512xf32> to vector<8x128xf32>
    %32 = arith.negf %31 : vector<8x128xf32>
    %33 = math.exp %32 : vector<8x128xf32>
    %cst_18 = arith.constant 1.000000e+00 : f32
    %34 = vector.broadcast %cst_18 : f32 to vector<8x128xf32>
    %35 = arith.addf %34, %33 : vector<8x128xf32>
    %36 = arith.divf %34, %35 : vector<8x128xf32>
    %37 = arith.mulf %28, %11 : vector<8x128xf32>
    %38 = arith.mulf %22, %30 : vector<8x128xf32>
    %39 = arith.addf %37, %38 : vector<8x128xf32>
    %40 = math.tanh %39 : vector<8x128xf32>
    %41 = arith.mulf %36, %40 : vector<8x128xf32>
    %42 = arith.index_cast %c0_i32 : i32 to index
    %c0_19 = arith.constant 0 : index
    %c0_20 = arith.constant 0 : index
    %43 = vector.load %arg2[%42, %c0_19, %c0_20] : memref<8x8x128xf32, #tpu.memory_space<vmem>>, vector<1x8x128xf32>
    %44 = vector.shape_cast %43 : vector<1x8x128xf32> to vector<8x128xf32>
    %45 = arith.subf %39, %11 : vector<8x128xf32>
    %46 = arith.mulf %44, %45 : vector<8x128xf32>
    %47 = arith.addf %11, %46 : vector<8x128xf32>
    %48 = arith.subf %41, %10 : vector<8x128xf32>
    %49 = arith.mulf %44, %48 : vector<8x128xf32>
    %50 = arith.addf %10, %49 : vector<8x128xf32>
    %51 = arith.index_cast %c0_i32 : i32 to index
    %c0_21 = arith.constant 0 : index
    %c0_22 = arith.constant 0 : index
    %52 = vector.load %arg13[%51, %c0_21, %c0_22] : memref<8x8x128xf32, #tpu.memory_space<vmem>>, vector<1x8x128xf32>
    %53 = vector.shape_cast %52 : vector<1x8x128xf32> to vector<8x128xf32>
    %54 = vector.shape_cast %50 : vector<8x128xf32> to vector<1x8x128xf32>
    tpu.vector_store %arg13[%51, %c0_21, %c0_22], %54 {strides = array<i32>} : memref<8x8x128xf32, #tpu.memory_space<vmem>>, vector<1x8x128xf32>,
    %c1_i32 = arith.constant 1 : i32
    %55 = arith.index_cast %c1_i32 : i32 to index
    %c0_23 = arith.constant 0 : index
    %c0_24 = arith.constant 0 : index
    %56 = vector.load %arg12[%55, %c0_23, %c0_24] : memref<8x8x512xf32, #tpu.memory_space<vmem>>, vector<1x8x512xf32>
    %57 = vector.shape_cast %56 : vector<1x8x512xf32> to vector<8x512xf32>
    %cst_25 = arith.constant dense<0.000000e+00> : vector<8x512xf32>
    %58 = tpu.matmul %50, %9, %cst_25 {dimension_numbers = #tpu.dot_dimension_numbers<[1], [0], [0], [1], [0, 0, 1, 1], [], []>} : vector<8x128xf32>, vector<128x512xf32>, vector<8x512xf32> -> vector<8x512xf32>
    %59 = arith.addf %57, %58 : vector<8x512xf32>
    %60 = vector.extract_strided_slice %59 {offsets = [0, 0], sizes = [8, 128], strides = [1, 1]} : vector<8x512xf32> to vector<8x128xf32>
    %61 = arith.negf %60 : vector<8x128xf32>
    %62 = math.exp %61 : vector<8x128xf32>
    %cst_26 = arith.constant 1.000000e+00 : f32
    %63 = vector.broadcast %cst_26 : f32 to vector<8x128xf32>
    %64 = arith.addf %63, %62 : vector<8x128xf32>
    %65 = arith.divf %63, %64 : vector<8x128xf32>
    %66 = vector.extract_strided_slice %59 {offsets = [0, 128], sizes = [8, 128], strides = [1, 1]} : vector<8x512xf32> to vector<8x128xf32>
    %67 = arith.negf %66 : vector<8x128xf32>
    %68 = math.exp %67 : vector<8x128xf32>
    %cst_27 = arith.constant 1.000000e+00 : f32
    %69 = vector.broadcast %cst_27 : f32 to vector<8x128xf32>
    %70 = arith.addf %69, %68 : vector<8x128xf32>
    %71 = arith.divf %69, %70 : vector<8x128xf32>
    %72 = vector.extract_strided_slice %59 {offsets = [0, 256], sizes = [8, 128], strides = [1, 1]} : vector<8x512xf32> to vector<8x128xf32>
    %73 = math.tanh %72 : vector<8x128xf32>
    %74 = vector.extract_strided_slice %59 {offsets = [0, 384], sizes = [8, 128], strides = [1, 1]} : vector<8x512xf32> to vector<8x128xf32>
    %75 = arith.negf %74 : vector<8x128xf32>
    %76 = math.exp %75 : vector<8x128xf32>
    %cst_28 = arith.constant 1.000000e+00 : f32
    %77 = vector.broadcast %cst_28 : f32 to vector<8x128xf32>
    %78 = arith.addf %77, %76 : vector<8x128xf32>
    %79 = arith.divf %77, %78 : vector<8x128xf32>
    %80 = arith.mulf %71, %47 : vector<8x128xf32>
    %81 = arith.mulf %65, %73 : vector<8x128xf32>
    %82 = arith.addf %80, %81 : vector<8x128xf32>
    %83 = math.tanh %82 : vector<8x128xf32>
    %84 = arith.mulf %79, %83 : vector<8x128xf32>
    %85 = arith.index_cast %c1_i32 : i32 to index
    %c0_29 = arith.constant 0 : index
    %c0_30 = arith.constant 0 : index
    %86 = vector.load %arg2[%85, %c0_29, %c0_30] : memref<8x8x128xf32, #tpu.memory_space<vmem>>, vector<1x8x128xf32>
    %87 = vector.shape_cast %86 : vector<1x8x128xf32> to vector<8x128xf32>
    %88 = arith.subf %82, %47 : vector<8x128xf32>
    %89 = arith.mulf %87, %88 : vector<8x128xf32>
    %90 = arith.addf %47, %89 : vector<8x128xf32>
    %91 = arith.subf %84, %50 : vector<8x128xf32>
    %92 = arith.mulf %87, %91 : vector<8x128xf32>
    %93 = arith.addf %50, %92 : vector<8x128xf32>
    %94 = arith.index_cast %c1_i32 : i32 to index
    %c0_31 = arith.constant 0 : index
    %c0_32 = arith.constant 0 : index
    %95 = vector.load %arg13[%94, %c0_31, %c0_32] : memref<8x8x128xf32, #tpu.memory_space<vmem>>, vector<1x8x128xf32>
    %96 = vector.shape_cast %95 : vector<1x8x128xf32> to vector<8x128xf32>
    %97 = vector.shape_cast %93 : vector<8x128xf32> to vector<1x8x128xf32>
    tpu.vector_store %arg13[%94, %c0_31, %c0_32], %97 {strides = array<i32>} : memref<8x8x128xf32, #tpu.memory_space<vmem>>, vector<1x8x128xf32>,
    %c2_i32 = arith.constant 2 : i32
    %98 = arith.index_cast %c2_i32 : i32 to index
    %c0_33 = arith.constant 0 : index
    %c0_34 = arith.constant 0 : index
    %99 = vector.load %arg12[%98, %c0_33, %c0_34] : memref<8x8x512xf32, #tpu.memory_space<vmem>>, vector<1x8x512xf32>
    %100 = vector.shape_cast %99 : vector<1x8x512xf32> to vector<8x512xf32>
    %cst_35 = arith.constant dense<0.000000e+00> : vector<8x512xf32>
    %101 = tpu.matmul %93, %9, %cst_35 {dimension_numbers = #tpu.dot_dimension_numbers<[1], [0], [0], [1], [0, 0, 1, 1], [], []>} : vector<8x128xf32>, vector<128x512xf32>, vector<8x512xf32> -> vector<8x512xf32>
    %102 = arith.addf %100, %101 : vector<8x512xf32>
    %103 = vector.extract_strided_slice %102 {offsets = [0, 0], sizes = [8, 128], strides = [1, 1]} : vector<8x512xf32> to vector<8x128xf32>
    %104 = arith.negf %103 : vector<8x128xf32>
    %105 = math.exp %104 : vector<8x128xf32>
    %cst_36 = arith.constant 1.000000e+00 : f32
    %106 = vector.broadcast %cst_36 : f32 to vector<8x128xf32>
    %107 = arith.addf %106, %105 : vector<8x128xf32>
    %108 = arith.divf %106, %107 : vector<8x128xf32>
    %109 = vector.extract_strided_slice %102 {offsets = [0, 128], sizes = [8, 128], strides = [1, 1]} : vector<8x512xf32> to vector<8x128xf32>
    %110 = arith.negf %109 : vector<8x128xf32>
    %111 = math.exp %110 : vector<8x128xf32>
    %cst_37 = arith.constant 1.000000e+00 : f32
    %112 = vector.broadcast %cst_37 : f32 to vector<8x128xf32>
    %113 = arith.addf %112, %111 : vector<8x128xf32>
    %114 = arith.divf %112, %113 : vector<8x128xf32>
    %115 = vector.extract_strided_slice %102 {offsets = [0, 256], sizes = [8, 128], strides = [1, 1]} : vector<8x512xf32> to vector<8x128xf32>
    %116 = math.tanh %115 : vector<8x128xf32>
    %117 = vector.extract_strided_slice %102 {offsets = [0, 384], sizes = [8, 128], strides = [1, 1]} : vector<8x512xf32> to vector<8x128xf32>
    %118 = arith.negf %117 : vector<8x128xf32>
    %119 = math.exp %118 : vector<8x128xf32>
    %cst_38 = arith.constant 1.000000e+00 : f32
    %120 = vector.broadcast %cst_38 : f32 to vector<8x128xf32>
    %121 = arith.addf %120, %119 : vector<8x128xf32>
    %122 = arith.divf %120, %121 : vector<8x128xf32>
    %123 = arith.mulf %114, %90 : vector<8x128xf32>
    %124 = arith.mulf %108, %116 : vector<8x128xf32>
    %125 = arith.addf %123, %124 : vector<8x128xf32>
    %126 = math.tanh %125 : vector<8x128xf32>
    %127 = arith.mulf %122, %126 : vector<8x128xf32>
    %128 = arith.index_cast %c2_i32 : i32 to index
    %c0_39 = arith.constant 0 : index
    %c0_40 = arith.constant 0 : index
    %129 = vector.load %arg2[%128, %c0_39, %c0_40] : memref<8x8x128xf32, #tpu.memory_space<vmem>>, vector<1x8x128xf32>
    %130 = vector.shape_cast %129 : vector<1x8x128xf32> to vector<8x128xf32>
    %131 = arith.subf %125, %90 : vector<8x128xf32>
    %132 = arith.mulf %130, %131 : vector<8x128xf32>
    %133 = arith.addf %90, %132 : vector<8x128xf32>
    %134 = arith.subf %127, %93 : vector<8x128xf32>
    %135 = arith.mulf %130, %134 : vector<8x128xf32>
    %136 = arith.addf %93, %135 : vector<8x128xf32>
    %137 = arith.index_cast %c2_i32 : i32 to index
    %c0_41 = arith.constant 0 : index
    %c0_42 = arith.constant 0 : index
    %138 = vector.load %arg13[%137, %c0_41, %c0_42] : memref<8x8x128xf32, #tpu.memory_space<vmem>>, vector<1x8x128xf32>
    %139 = vector.shape_cast %138 : vector<1x8x128xf32> to vector<8x128xf32>
    %140 = vector.shape_cast %136 : vector<8x128xf32> to vector<1x8x128xf32>
    tpu.vector_store %arg13[%137, %c0_41, %c0_42], %140 {strides = array<i32>} : memref<8x8x128xf32, #tpu.memory_space<vmem>>, vector<1x8x128xf32>,
    %c3_i32 = arith.constant 3 : i32
    %141 = arith.index_cast %c3_i32 : i32 to index
    %c0_43 = arith.constant 0 : index
    %c0_44 = arith.constant 0 : index
    %142 = vector.load %arg12[%141, %c0_43, %c0_44] : memref<8x8x512xf32, #tpu.memory_space<vmem>>, vector<1x8x512xf32>
    %143 = vector.shape_cast %142 : vector<1x8x512xf32> to vector<8x512xf32>
    %cst_45 = arith.constant dense<0.000000e+00> : vector<8x512xf32>
    %144 = tpu.matmul %136, %9, %cst_45 {dimension_numbers = #tpu.dot_dimension_numbers<[1], [0], [0], [1], [0, 0, 1, 1], [], []>} : vector<8x128xf32>, vector<128x512xf32>, vector<8x512xf32> -> vector<8x512xf32>
    %145 = arith.addf %143, %144 : vector<8x512xf32>
    %146 = vector.extract_strided_slice %145 {offsets = [0, 0], sizes = [8, 128], strides = [1, 1]} : vector<8x512xf32> to vector<8x128xf32>
    %147 = arith.negf %146 : vector<8x128xf32>
    %148 = math.exp %147 : vector<8x128xf32>
    %cst_46 = arith.constant 1.000000e+00 : f32
    %149 = vector.broadcast %cst_46 : f32 to vector<8x128xf32>
    %150 = arith.addf %149, %148 : vector<8x128xf32>
    %151 = arith.divf %149, %150 : vector<8x128xf32>
    %152 = vector.extract_strided_slice %145 {offsets = [0, 128], sizes = [8, 128], strides = [1, 1]} : vector<8x512xf32> to vector<8x128xf32>
    %153 = arith.negf %152 : vector<8x128xf32>
    %154 = math.exp %153 : vector<8x128xf32>
    %cst_47 = arith.constant 1.000000e+00 : f32
    %155 = vector.broadcast %cst_47 : f32 to vector<8x128xf32>
    %156 = arith.addf %155, %154 : vector<8x128xf32>
    %157 = arith.divf %155, %156 : vector<8x128xf32>
    %158 = vector.extract_strided_slice %145 {offsets = [0, 256], sizes = [8, 128], strides = [1, 1]} : vector<8x512xf32> to vector<8x128xf32>
    %159 = math.tanh %158 : vector<8x128xf32>
    %160 = vector.extract_strided_slice %145 {offsets = [0, 384], sizes = [8, 128], strides = [1, 1]} : vector<8x512xf32> to vector<8x128xf32>
    %161 = arith.negf %160 : vector<8x128xf32>
    %162 = math.exp %161 : vector<8x128xf32>
    %cst_48 = arith.constant 1.000000e+00 : f32
    %163 = vector.broadcast %cst_48 : f32 to vector<8x128xf32>
    %164 = arith.addf %163, %162 : vector<8x128xf32>
    %165 = arith.divf %163, %164 : vector<8x128xf32>
    %166 = arith.mulf %157, %133 : vector<8x128xf32>
    %167 = arith.mulf %151, %159 : vector<8x128xf32>
    %168 = arith.addf %166, %167 : vector<8x128xf32>
    %169 = math.tanh %168 : vector<8x128xf32>
    %170 = arith.mulf %165, %169 : vector<8x128xf32>
    %171 = arith.index_cast %c3_i32 : i32 to index
    %c0_49 = arith.constant 0 : index
    %c0_50 = arith.constant 0 : index
    %172 = vector.load %arg2[%171, %c0_49, %c0_50] : memref<8x8x128xf32, #tpu.memory_space<vmem>>, vector<1x8x128xf32>
    %173 = vector.shape_cast %172 : vector<1x8x128xf32> to vector<8x128xf32>
    %174 = arith.subf %168, %133 : vector<8x128xf32>
    %175 = arith.mulf %173, %174 : vector<8x128xf32>
    %176 = arith.addf %133, %175 : vector<8x128xf32>
    %177 = arith.subf %170, %136 : vector<8x128xf32>
    %178 = arith.mulf %173, %177 : vector<8x128xf32>
    %179 = arith.addf %136, %178 : vector<8x128xf32>
    %180 = arith.index_cast %c3_i32 : i32 to index
    %c0_51 = arith.constant 0 : index
    %c0_52 = arith.constant 0 : index
    %181 = vector.load %arg13[%180, %c0_51, %c0_52] : memref<8x8x128xf32, #tpu.memory_space<vmem>>, vector<1x8x128xf32>
    %182 = vector.shape_cast %181 : vector<1x8x128xf32> to vector<8x128xf32>
    %183 = vector.shape_cast %179 : vector<8x128xf32> to vector<1x8x128xf32>
    tpu.vector_store %arg13[%180, %c0_51, %c0_52], %183 {strides = array<i32>} : memref<8x8x128xf32, #tpu.memory_space<vmem>>, vector<1x8x128xf32>,
    %c4_i32 = arith.constant 4 : i32
    %184 = arith.index_cast %c4_i32 : i32 to index
    %c0_53 = arith.constant 0 : index
    %c0_54 = arith.constant 0 : index
    %185 = vector.load %arg12[%184, %c0_53, %c0_54] : memref<8x8x512xf32, #tpu.memory_space<vmem>>, vector<1x8x512xf32>
    %186 = vector.shape_cast %185 : vector<1x8x512xf32> to vector<8x512xf32>
    %cst_55 = arith.constant dense<0.000000e+00> : vector<8x512xf32>
    %187 = tpu.matmul %179, %9, %cst_55 {dimension_numbers = #tpu.dot_dimension_numbers<[1], [0], [0], [1], [0, 0, 1, 1], [], []>} : vector<8x128xf32>, vector<128x512xf32>, vector<8x512xf32> -> vector<8x512xf32>
    %188 = arith.addf %186, %187 : vector<8x512xf32>
    %189 = vector.extract_strided_slice %188 {offsets = [0, 0], sizes = [8, 128], strides = [1, 1]} : vector<8x512xf32> to vector<8x128xf32>
    %190 = arith.negf %189 : vector<8x128xf32>
    %191 = math.exp %190 : vector<8x128xf32>
    %cst_56 = arith.constant 1.000000e+00 : f32
    %192 = vector.broadcast %cst_56 : f32 to vector<8x128xf32>
    %193 = arith.addf %192, %191 : vector<8x128xf32>
    %194 = arith.divf %192, %193 : vector<8x128xf32>
    %195 = vector.extract_strided_slice %188 {offsets = [0, 128], sizes = [8, 128], strides = [1, 1]} : vector<8x512xf32> to vector<8x128xf32>
    %196 = arith.negf %195 : vector<8x128xf32>
    %197 = math.exp %196 : vector<8x128xf32>
    %cst_57 = arith.constant 1.000000e+00 : f32
    %198 = vector.broadcast %cst_57 : f32 to vector<8x128xf32>
    %199 = arith.addf %198, %197 : vector<8x128xf32>
    %200 = arith.divf %198, %199 : vector<8x128xf32>
    %201 = vector.extract_strided_slice %188 {offsets = [0, 256], sizes = [8, 128], strides = [1, 1]} : vector<8x512xf32> to vector<8x128xf32>
    %202 = math.tanh %201 : vector<8x128xf32>
    %203 = vector.extract_strided_slice %188 {offsets = [0, 384], sizes = [8, 128], strides = [1, 1]} : vector<8x512xf32> to vector<8x128xf32>
    %204 = arith.negf %203 : vector<8x128xf32>
    %205 = math.exp %204 : vector<8x128xf32>
    %cst_58 = arith.constant 1.000000e+00 : f32
    %206 = vector.broadcast %cst_58 : f32 to vector<8x128xf32>
    %207 = arith.addf %206, %205 : vector<8x128xf32>
    %208 = arith.divf %206, %207 : vector<8x128xf32>
    %209 = arith.mulf %200, %176 : vector<8x128xf32>
    %210 = arith.mulf %194, %202 : vector<8x128xf32>
    %211 = arith.addf %209, %210 : vector<8x128xf32>
    %212 = math.tanh %211 : vector<8x128xf32>
    %213 = arith.mulf %208, %212 : vector<8x128xf32>
    %214 = arith.index_cast %c4_i32 : i32 to index
    %c0_59 = arith.constant 0 : index
    %c0_60 = arith.constant 0 : index
    %215 = vector.load %arg2[%214, %c0_59, %c0_60] : memref<8x8x128xf32, #tpu.memory_space<vmem>>, vector<1x8x128xf32>
    %216 = vector.shape_cast %215 : vector<1x8x128xf32> to vector<8x128xf32>
    %217 = arith.subf %211, %176 : vector<8x128xf32>
    %218 = arith.mulf %216, %217 : vector<8x128xf32>
    %219 = arith.addf %176, %218 : vector<8x128xf32>
    %220 = arith.subf %213, %179 : vector<8x128xf32>
    %221 = arith.mulf %216, %220 : vector<8x128xf32>
    %222 = arith.addf %179, %221 : vector<8x128xf32>
    %223 = arith.index_cast %c4_i32 : i32 to index
    %c0_61 = arith.constant 0 : index
    %c0_62 = arith.constant 0 : index
    %224 = vector.load %arg13[%223, %c0_61, %c0_62] : memref<8x8x128xf32, #tpu.memory_space<vmem>>, vector<1x8x128xf32>
    %225 = vector.shape_cast %224 : vector<1x8x128xf32> to vector<8x128xf32>
    %226 = vector.shape_cast %222 : vector<8x128xf32> to vector<1x8x128xf32>
    tpu.vector_store %arg13[%223, %c0_61, %c0_62], %226 {strides = array<i32>} : memref<8x8x128xf32, #tpu.memory_space<vmem>>, vector<1x8x128xf32>,
    %c5_i32 = arith.constant 5 : i32
    %227 = arith.index_cast %c5_i32 : i32 to index
    %c0_63 = arith.constant 0 : index
    %c0_64 = arith.constant 0 : index
    %228 = vector.load %arg12[%227, %c0_63, %c0_64] : memref<8x8x512xf32, #tpu.memory_space<vmem>>, vector<1x8x512xf32>
    %229 = vector.shape_cast %228 : vector<1x8x512xf32> to vector<8x512xf32>
    %cst_65 = arith.constant dense<0.000000e+00> : vector<8x512xf32>
    %230 = tpu.matmul %222, %9, %cst_65 {dimension_numbers = #tpu.dot_dimension_numbers<[1], [0], [0], [1], [0, 0, 1, 1], [], []>} : vector<8x128xf32>, vector<128x512xf32>, vector<8x512xf32> -> vector<8x512xf32>
    %231 = arith.addf %229, %230 : vector<8x512xf32>
    %232 = vector.extract_strided_slice %231 {offsets = [0, 0], sizes = [8, 128], strides = [1, 1]} : vector<8x512xf32> to vector<8x128xf32>
    %233 = arith.negf %232 : vector<8x128xf32>
    %234 = math.exp %233 : vector<8x128xf32>
    %cst_66 = arith.constant 1.000000e+00 : f32
    %235 = vector.broadcast %cst_66 : f32 to vector<8x128xf32>
    %236 = arith.addf %235, %234 : vector<8x128xf32>
    %237 = arith.divf %235, %236 : vector<8x128xf32>
    %238 = vector.extract_strided_slice %231 {offsets = [0, 128], sizes = [8, 128], strides = [1, 1]} : vector<8x512xf32> to vector<8x128xf32>
    %239 = arith.negf %238 : vector<8x128xf32>
    %240 = math.exp %239 : vector<8x128xf32>
    %cst_67 = arith.constant 1.000000e+00 : f32
    %241 = vector.broadcast %cst_67 : f32 to vector<8x128xf32>
    %242 = arith.addf %241, %240 : vector<8x128xf32>
    %243 = arith.divf %241, %242 : vector<8x128xf32>
    %244 = vector.extract_strided_slice %231 {offsets = [0, 256], sizes = [8, 128], strides = [1, 1]} : vector<8x512xf32> to vector<8x128xf32>
    %245 = math.tanh %244 : vector<8x128xf32>
    %246 = vector.extract_strided_slice %231 {offsets = [0, 384], sizes = [8, 128], strides = [1, 1]} : vector<8x512xf32> to vector<8x128xf32>
    %247 = arith.negf %246 : vector<8x128xf32>
    %248 = math.exp %247 : vector<8x128xf32>
    %cst_68 = arith.constant 1.000000e+00 : f32
    %249 = vector.broadcast %cst_68 : f32 to vector<8x128xf32>
    %250 = arith.addf %249, %248 : vector<8x128xf32>
    %251 = arith.divf %249, %250 : vector<8x128xf32>
    %252 = arith.mulf %243, %219 : vector<8x128xf32>
    %253 = arith.mulf %237, %245 : vector<8x128xf32>
    %254 = arith.addf %252, %253 : vector<8x128xf32>
    %255 = math.tanh %254 : vector<8x128xf32>
    %256 = arith.mulf %251, %255 : vector<8x128xf32>
    %257 = arith.index_cast %c5_i32 : i32 to index
    %c0_69 = arith.constant 0 : index
    %c0_70 = arith.constant 0 : index
    %258 = vector.load %arg2[%257, %c0_69, %c0_70] : memref<8x8x128xf32, #tpu.memory_space<vmem>>, vector<1x8x128xf32>
    %259 = vector.shape_cast %258 : vector<1x8x128xf32> to vector<8x128xf32>
    %260 = arith.subf %254, %219 : vector<8x128xf32>
    %261 = arith.mulf %259, %260 : vector<8x128xf32>
    %262 = arith.addf %219, %261 : vector<8x128xf32>
    %263 = arith.subf %256, %222 : vector<8x128xf32>
    %264 = arith.mulf %259, %263 : vector<8x128xf32>
    %265 = arith.addf %222, %264 : vector<8x128xf32>
    %266 = arith.index_cast %c5_i32 : i32 to index
    %c0_71 = arith.constant 0 : index
    %c0_72 = arith.constant 0 : index
    %267 = vector.load %arg13[%266, %c0_71, %c0_72] : memref<8x8x128xf32, #tpu.memory_space<vmem>>, vector<1x8x128xf32>
    %268 = vector.shape_cast %267 : vector<1x8x128xf32> to vector<8x128xf32>
    %269 = vector.shape_cast %265 : vector<8x128xf32> to vector<1x8x128xf32>
    tpu.vector_store %arg13[%266, %c0_71, %c0_72], %269 {strides = array<i32>} : memref<8x8x128xf32, #tpu.memory_space<vmem>>, vector<1x8x128xf32>,
    %c6_i32 = arith.constant 6 : i32
    %270 = arith.index_cast %c6_i32 : i32 to index
    %c0_73 = arith.constant 0 : index
    %c0_74 = arith.constant 0 : index
    %271 = vector.load %arg12[%270, %c0_73, %c0_74] : memref<8x8x512xf32, #tpu.memory_space<vmem>>, vector<1x8x512xf32>
    %272 = vector.shape_cast %271 : vector<1x8x512xf32> to vector<8x512xf32>
    %cst_75 = arith.constant dense<0.000000e+00> : vector<8x512xf32>
    %273 = tpu.matmul %265, %9, %cst_75 {dimension_numbers = #tpu.dot_dimension_numbers<[1], [0], [0], [1], [0, 0, 1, 1], [], []>} : vector<8x128xf32>, vector<128x512xf32>, vector<8x512xf32> -> vector<8x512xf32>
    %274 = arith.addf %272, %273 : vector<8x512xf32>
    %275 = vector.extract_strided_slice %274 {offsets = [0, 0], sizes = [8, 128], strides = [1, 1]} : vector<8x512xf32> to vector<8x128xf32>
    %276 = arith.negf %275 : vector<8x128xf32>
    %277 = math.exp %276 : vector<8x128xf32>
    %cst_76 = arith.constant 1.000000e+00 : f32
    %278 = vector.broadcast %cst_76 : f32 to vector<8x128xf32>
    %279 = arith.addf %278, %277 : vector<8x128xf32>
    %280 = arith.divf %278, %279 : vector<8x128xf32>
    %281 = vector.extract_strided_slice %274 {offsets = [0, 128], sizes = [8, 128], strides = [1, 1]} : vector<8x512xf32> to vector<8x128xf32>
    %282 = arith.negf %281 : vector<8x128xf32>
    %283 = math.exp %282 : vector<8x128xf32>
    %cst_77 = arith.constant 1.000000e+00 : f32
    %284 = vector.broadcast %cst_77 : f32 to vector<8x128xf32>
    %285 = arith.addf %284, %283 : vector<8x128xf32>
    %286 = arith.divf %284, %285 : vector<8x128xf32>
    %287 = vector.extract_strided_slice %274 {offsets = [0, 256], sizes = [8, 128], strides = [1, 1]} : vector<8x512xf32> to vector<8x128xf32>
    %288 = math.tanh %287 : vector<8x128xf32>
    %289 = vector.extract_strided_slice %274 {offsets = [0, 384], sizes = [8, 128], strides = [1, 1]} : vector<8x512xf32> to vector<8x128xf32>
    %290 = arith.negf %289 : vector<8x128xf32>
    %291 = math.exp %290 : vector<8x128xf32>
    %cst_78 = arith.constant 1.000000e+00 : f32
    %292 = vector.broadcast %cst_78 : f32 to vector<8x128xf32>
    %293 = arith.addf %292, %291 : vector<8x128xf32>
    %294 = arith.divf %292, %293 : vector<8x128xf32>
    %295 = arith.mulf %286, %262 : vector<8x128xf32>
    %296 = arith.mulf %280, %288 : vector<8x128xf32>
    %297 = arith.addf %295, %296 : vector<8x128xf32>
    %298 = math.tanh %297 : vector<8x128xf32>
    %299 = arith.mulf %294, %298 : vector<8x128xf32>
    %300 = arith.index_cast %c6_i32 : i32 to index
    %c0_79 = arith.constant 0 : index
    %c0_80 = arith.constant 0 : index
    %301 = vector.load %arg2[%300, %c0_79, %c0_80] : memref<8x8x128xf32, #tpu.memory_space<vmem>>, vector<1x8x128xf32>
    %302 = vector.shape_cast %301 : vector<1x8x128xf32> to vector<8x128xf32>
    %303 = arith.subf %297, %262 : vector<8x128xf32>
    %304 = arith.mulf %302, %303 : vector<8x128xf32>
    %305 = arith.addf %262, %304 : vector<8x128xf32>
    %306 = arith.subf %299, %265 : vector<8x128xf32>
    %307 = arith.mulf %302, %306 : vector<8x128xf32>
    %308 = arith.addf %265, %307 : vector<8x128xf32>
    %309 = arith.index_cast %c6_i32 : i32 to index
    %c0_81 = arith.constant 0 : index
    %c0_82 = arith.constant 0 : index
    %310 = vector.load %arg13[%309, %c0_81, %c0_82] : memref<8x8x128xf32, #tpu.memory_space<vmem>>, vector<1x8x128xf32>
    %311 = vector.shape_cast %310 : vector<1x8x128xf32> to vector<8x128xf32>
    %312 = vector.shape_cast %308 : vector<8x128xf32> to vector<1x8x128xf32>
    tpu.vector_store %arg13[%309, %c0_81, %c0_82], %312 {strides = array<i32>} : memref<8x8x128xf32, #tpu.memory_space<vmem>>, vector<1x8x128xf32>,
    %c7_i32 = arith.constant 7 : i32
    %313 = arith.index_cast %c7_i32 : i32 to index
    %c0_83 = arith.constant 0 : index
    %c0_84 = arith.constant 0 : index
    %314 = vector.load %arg12[%313, %c0_83, %c0_84] : memref<8x8x512xf32, #tpu.memory_space<vmem>>, vector<1x8x512xf32>
    %315 = vector.shape_cast %314 : vector<1x8x512xf32> to vector<8x512xf32>
    %cst_85 = arith.constant dense<0.000000e+00> : vector<8x512xf32>
    %316 = tpu.matmul %308, %9, %cst_85 {dimension_numbers = #tpu.dot_dimension_numbers<[1], [0], [0], [1], [0, 0, 1, 1], [], []>} : vector<8x128xf32>, vector<128x512xf32>, vector<8x512xf32> -> vector<8x512xf32>
    %317 = arith.addf %315, %316 : vector<8x512xf32>
    %318 = vector.extract_strided_slice %317 {offsets = [0, 0], sizes = [8, 128], strides = [1, 1]} : vector<8x512xf32> to vector<8x128xf32>
    %319 = arith.negf %318 : vector<8x128xf32>
    %320 = math.exp %319 : vector<8x128xf32>
    %cst_86 = arith.constant 1.000000e+00 : f32
    %321 = vector.broadcast %cst_86 : f32 to vector<8x128xf32>
    %322 = arith.addf %321, %320 : vector<8x128xf32>
    %323 = arith.divf %321, %322 : vector<8x128xf32>
    %324 = vector.extract_strided_slice %317 {offsets = [0, 128], sizes = [8, 128], strides = [1, 1]} : vector<8x512xf32> to vector<8x128xf32>
    %325 = arith.negf %324 : vector<8x128xf32>
    %326 = math.exp %325 : vector<8x128xf32>
    %cst_87 = arith.constant 1.000000e+00 : f32
    %327 = vector.broadcast %cst_87 : f32 to vector<8x128xf32>
    %328 = arith.addf %327, %326 : vector<8x128xf32>
    %329 = arith.divf %327, %328 : vector<8x128xf32>
    %330 = vector.extract_strided_slice %317 {offsets = [0, 256], sizes = [8, 128], strides = [1, 1]} : vector<8x512xf32> to vector<8x128xf32>
    %331 = math.tanh %330 : vector<8x128xf32>
    %332 = vector.extract_strided_slice %317 {offsets = [0, 384], sizes = [8, 128], strides = [1, 1]} : vector<8x512xf32> to vector<8x128xf32>
    %333 = arith.negf %332 : vector<8x128xf32>
    %334 = math.exp %333 : vector<8x128xf32>
    %cst_88 = arith.constant 1.000000e+00 : f32
    %335 = vector.broadcast %cst_88 : f32 to vector<8x128xf32>
    %336 = arith.addf %335, %334 : vector<8x128xf32>
    %337 = arith.divf %335, %336 : vector<8x128xf32>
    %338 = arith.mulf %329, %305 : vector<8x128xf32>
    %339 = arith.mulf %323, %331 : vector<8x128xf32>
    %340 = arith.addf %338, %339 : vector<8x128xf32>
    %341 = math.tanh %340 : vector<8x128xf32>
    %342 = arith.mulf %337, %341 : vector<8x128xf32>
    %343 = arith.index_cast %c7_i32 : i32 to index
    %c0_89 = arith.constant 0 : index
    %c0_90 = arith.constant 0 : index
    %344 = vector.load %arg2[%343, %c0_89, %c0_90] : memref<8x8x128xf32, #tpu.memory_space<vmem>>, vector<1x8x128xf32>
    %345 = vector.shape_cast %344 : vector<1x8x128xf32> to vector<8x128xf32>
    %346 = arith.subf %340, %305 : vector<8x128xf32>
    %347 = arith.mulf %345, %346 : vector<8x128xf32>
    %348 = arith.addf %305, %347 : vector<8x128xf32>
    %349 = arith.subf %342, %308 : vector<8x128xf32>
    %350 = arith.mulf %345, %349 : vector<8x128xf32>
    %351 = arith.addf %308, %350 : vector<8x128xf32>
    %352 = arith.index_cast %c7_i32 : i32 to index
    %c0_91 = arith.constant 0 : index
    %c0_92 = arith.constant 0 : index
    %353 = vector.load %arg13[%352, %c0_91, %c0_92] : memref<8x8x128xf32, #tpu.memory_space<vmem>>, vector<1x8x128xf32>
    %354 = vector.shape_cast %353 : vector<1x8x128xf32> to vector<8x128xf32>
    %355 = vector.shape_cast %351 : vector<8x128xf32> to vector<1x8x128xf32>
    tpu.vector_store %arg13[%352, %c0_91, %c0_92], %355 {strides = array<i32>} : memref<8x8x128xf32, #tpu.memory_space<vmem>>, vector<1x8x128xf32>,
    %c8_i32 = arith.constant 8 : i32
    %c0_93 = arith.constant 0 : index
    %c0_94 = arith.constant 0 : index
    %c0_95 = arith.constant 0 : index
    %356 = vector.load %arg13[%c0_93, %c0_94, %c0_95] : memref<8x8x128xf32, #tpu.memory_space<vmem>>, vector<8x8x128xf32>
    %357 = vector.shape_cast %356 : vector<8x8x128xf32> to vector<64x128xf32>
    %c0_96 = arith.constant 0 : index
    %c0_97 = arith.constant 0 : index
    %358 = vector.load %arg4[%c0_96, %c0_97] : memref<128x512xf32, #tpu.memory_space<vmem>>, vector<128x512xf32>
    %cst_98 = arith.constant dense<0.000000e+00> : vector<64x512xf32>
    %359 = tpu.matmul %357, %358, %cst_98 {dimension_numbers = #tpu.dot_dimension_numbers<[1], [0], [0], [1], [0, 0, 1, 1], [], []>} : vector<64x128xf32>, vector<128x512xf32>, vector<64x512xf32> -> vector<64x512xf32>
    %c0_99 = arith.constant 0 : index
    %c0_100 = arith.constant 0 : index
    %360 = vector.load %arg8[%c0_99, %c0_100] : memref<1x512xf32, #tpu.memory_space<vmem>>, vector<1x512xf32>
    %361 = vector.broadcast %360 : vector<1x512xf32> to vector<64x512xf32>
    %362 = arith.addf %359, %361 : vector<64x512xf32>
    %363 = vector.shape_cast %362 : vector<64x512xf32> to vector<8x8x512xf32>
    %c0_101 = arith.constant 0 : index
    %c0_102 = arith.constant 0 : index
    %c0_103 = arith.constant 0 : index
    %364 = vector.load %arg12[%c0_101, %c0_102, %c0_103] : memref<8x8x512xf32, #tpu.memory_space<vmem>>, vector<8x8x512xf32>
    tpu.vector_store %arg12[%c0_101, %c0_102, %c0_103], %363 {strides = array<i32>} : memref<8x8x512xf32, #tpu.memory_space<vmem>>, vector<8x8x512xf32>,
    %c0_104 = arith.constant 0 : index
    %c0_105 = arith.constant 0 : index
    %365 = vector.load %arg6[%c0_104, %c0_105] : memref<128x512xf32, #tpu.memory_space<vmem>>, vector<128x512xf32>
    %cst_106 = arith.constant 0.000000e+00 : f32
    %366 = vector.broadcast %cst_106 : f32 to vector<8x128xf32>
    %cst_107 = arith.constant 0.000000e+00 : f32
    %367 = vector.broadcast %cst_107 : f32 to vector<8x128xf32>
    %c0_i32_108 = arith.constant 0 : i32
    %368 = arith.index_cast %c0_i32_108 : i32 to index
    %c0_109 = arith.constant 0 : index
    %c0_110 = arith.constant 0 : index
    %369 = vector.load %arg12[%368, %c0_109, %c0_110] : memref<8x8x512xf32, #tpu.memory_space<vmem>>, vector<1x8x512xf32>
    %370 = vector.shape_cast %369 : vector<1x8x512xf32> to vector<8x512xf32>
    %cst_111 = arith.constant dense<0.000000e+00> : vector<8x512xf32>
    %371 = tpu.matmul %366, %365, %cst_111 {dimension_numbers = #tpu.dot_dimension_numbers<[1], [0], [0], [1], [0, 0, 1, 1], [], []>} : vector<8x128xf32>, vector<128x512xf32>, vector<8x512xf32> -> vector<8x512xf32>
    %372 = arith.addf %370, %371 : vector<8x512xf32>
    %373 = vector.extract_strided_slice %372 {offsets = [0, 0], sizes = [8, 128], strides = [1, 1]} : vector<8x512xf32> to vector<8x128xf32>
    %374 = arith.negf %373 : vector<8x128xf32>
    %375 = math.exp %374 : vector<8x128xf32>
    %cst_112 = arith.constant 1.000000e+00 : f32
    %376 = vector.broadcast %cst_112 : f32 to vector<8x128xf32>
    %377 = arith.addf %376, %375 : vector<8x128xf32>
    %378 = arith.divf %376, %377 : vector<8x128xf32>
    %379 = vector.extract_strided_slice %372 {offsets = [0, 128], sizes = [8, 128], strides = [1, 1]} : vector<8x512xf32> to vector<8x128xf32>
    %380 = arith.negf %379 : vector<8x128xf32>
    %381 = math.exp %380 : vector<8x128xf32>
    %cst_113 = arith.constant 1.000000e+00 : f32
    %382 = vector.broadcast %cst_113 : f32 to vector<8x128xf32>
    %383 = arith.addf %382, %381 : vector<8x128xf32>
    %384 = arith.divf %382, %383 : vector<8x128xf32>
    %385 = vector.extract_strided_slice %372 {offsets = [0, 256], sizes = [8, 128], strides = [1, 1]} : vector<8x512xf32> to vector<8x128xf32>
    %386 = math.tanh %385 : vector<8x128xf32>
    %387 = vector.extract_strided_slice %372 {offsets = [0, 384], sizes = [8, 128], strides = [1, 1]} : vector<8x512xf32> to vector<8x128xf32>
    %388 = arith.negf %387 : vector<8x128xf32>
    %389 = math.exp %388 : vector<8x128xf32>
    %cst_114 = arith.constant 1.000000e+00 : f32
    %390 = vector.broadcast %cst_114 : f32 to vector<8x128xf32>
    %391 = arith.addf %390, %389 : vector<8x128xf32>
    %392 = arith.divf %390, %391 : vector<8x128xf32>
    %393 = arith.mulf %384, %367 : vector<8x128xf32>
    %394 = arith.mulf %378, %386 : vector<8x128xf32>
    %395 = arith.addf %393, %394 : vector<8x128xf32>
    %396 = math.tanh %395 : vector<8x128xf32>
    %397 = arith.mulf %392, %396 : vector<8x128xf32>
    %398 = arith.index_cast %c0_i32_108 : i32 to index
    %c0_115 = arith.constant 0 : index
    %c0_116 = arith.constant 0 : index
    %399 = vector.load %arg2[%398, %c0_115, %c0_116] : memref<8x8x128xf32, #tpu.memory_space<vmem>>, vector<1x8x128xf32>
    %400 = vector.shape_cast %399 : vector<1x8x128xf32> to vector<8x128xf32>
    %401 = arith.subf %395, %367 : vector<8x128xf32>
    %402 = arith.mulf %400, %401 : vector<8x128xf32>
    %403 = arith.addf %367, %402 : vector<8x128xf32>
    %404 = arith.subf %397, %366 : vector<8x128xf32>
    %405 = arith.mulf %400, %404 : vector<8x128xf32>
    %406 = arith.addf %366, %405 : vector<8x128xf32>
    %c1_i32_117 = arith.constant 1 : i32
    %407 = arith.index_cast %c1_i32_117 : i32 to index
    %c0_118 = arith.constant 0 : index
    %c0_119 = arith.constant 0 : index
    %408 = vector.load %arg12[%407, %c0_118, %c0_119] : memref<8x8x512xf32, #tpu.memory_space<vmem>>, vector<1x8x512xf32>
    %409 = vector.shape_cast %408 : vector<1x8x512xf32> to vector<8x512xf32>
    %cst_120 = arith.constant dense<0.000000e+00> : vector<8x512xf32>
    %410 = tpu.matmul %406, %365, %cst_120 {dimension_numbers = #tpu.dot_dimension_numbers<[1], [0], [0], [1], [0, 0, 1, 1], [], []>} : vector<8x128xf32>, vector<128x512xf32>, vector<8x512xf32> -> vector<8x512xf32>
    %411 = arith.addf %409, %410 : vector<8x512xf32>
    %412 = vector.extract_strided_slice %411 {offsets = [0, 0], sizes = [8, 128], strides = [1, 1]} : vector<8x512xf32> to vector<8x128xf32>
    %413 = arith.negf %412 : vector<8x128xf32>
    %414 = math.exp %413 : vector<8x128xf32>
    %cst_121 = arith.constant 1.000000e+00 : f32
    %415 = vector.broadcast %cst_121 : f32 to vector<8x128xf32>
    %416 = arith.addf %415, %414 : vector<8x128xf32>
    %417 = arith.divf %415, %416 : vector<8x128xf32>
    %418 = vector.extract_strided_slice %411 {offsets = [0, 128], sizes = [8, 128], strides = [1, 1]} : vector<8x512xf32> to vector<8x128xf32>
    %419 = arith.negf %418 : vector<8x128xf32>
    %420 = math.exp %419 : vector<8x128xf32>
    %cst_122 = arith.constant 1.000000e+00 : f32
    %421 = vector.broadcast %cst_122 : f32 to vector<8x128xf32>
    %422 = arith.addf %421, %420 : vector<8x128xf32>
    %423 = arith.divf %421, %422 : vector<8x128xf32>
    %424 = vector.extract_strided_slice %411 {offsets = [0, 256], sizes = [8, 128], strides = [1, 1]} : vector<8x512xf32> to vector<8x128xf32>
    %425 = math.tanh %424 : vector<8x128xf32>
    %426 = vector.extract_strided_slice %411 {offsets = [0, 384], sizes = [8, 128], strides = [1, 1]} : vector<8x512xf32> to vector<8x128xf32>
    %427 = arith.negf %426 : vector<8x128xf32>
    %428 = math.exp %427 : vector<8x128xf32>
    %cst_123 = arith.constant 1.000000e+00 : f32
    %429 = vector.broadcast %cst_123 : f32 to vector<8x128xf32>
    %430 = arith.addf %429, %428 : vector<8x128xf32>
    %431 = arith.divf %429, %430 : vector<8x128xf32>
    %432 = arith.mulf %423, %403 : vector<8x128xf32>
    %433 = arith.mulf %417, %425 : vector<8x128xf32>
    %434 = arith.addf %432, %433 : vector<8x128xf32>
    %435 = math.tanh %434 : vector<8x128xf32>
    %436 = arith.mulf %431, %435 : vector<8x128xf32>
    %437 = arith.index_cast %c1_i32_117 : i32 to index
    %c0_124 = arith.constant 0 : index
    %c0_125 = arith.constant 0 : index
    %438 = vector.load %arg2[%437, %c0_124, %c0_125] : memref<8x8x128xf32, #tpu.memory_space<vmem>>, vector<1x8x128xf32>
    %439 = vector.shape_cast %438 : vector<1x8x128xf32> to vector<8x128xf32>
    %440 = arith.subf %434, %403 : vector<8x128xf32>
    %441 = arith.mulf %439, %440 : vector<8x128xf32>
    %442 = arith.addf %403, %441 : vector<8x128xf32>
    %443 = arith.subf %436, %406 : vector<8x128xf32>
    %444 = arith.mulf %439, %443 : vector<8x128xf32>
    %445 = arith.addf %406, %444 : vector<8x128xf32>
    %c2_i32_126 = arith.constant 2 : i32
    %446 = arith.index_cast %c2_i32_126 : i32 to index
    %c0_127 = arith.constant 0 : index
    %c0_128 = arith.constant 0 : index
    %447 = vector.load %arg12[%446, %c0_127, %c0_128] : memref<8x8x512xf32, #tpu.memory_space<vmem>>, vector<1x8x512xf32>
    %448 = vector.shape_cast %447 : vector<1x8x512xf32> to vector<8x512xf32>
    %cst_129 = arith.constant dense<0.000000e+00> : vector<8x512xf32>
    %449 = tpu.matmul %445, %365, %cst_129 {dimension_numbers = #tpu.dot_dimension_numbers<[1], [0], [0], [1], [0, 0, 1, 1], [], []>} : vector<8x128xf32>, vector<128x512xf32>, vector<8x512xf32> -> vector<8x512xf32>
    %450 = arith.addf %448, %449 : vector<8x512xf32>
    %451 = vector.extract_strided_slice %450 {offsets = [0, 0], sizes = [8, 128], strides = [1, 1]} : vector<8x512xf32> to vector<8x128xf32>
    %452 = arith.negf %451 : vector<8x128xf32>
    %453 = math.exp %452 : vector<8x128xf32>
    %cst_130 = arith.constant 1.000000e+00 : f32
    %454 = vector.broadcast %cst_130 : f32 to vector<8x128xf32>
    %455 = arith.addf %454, %453 : vector<8x128xf32>
    %456 = arith.divf %454, %455 : vector<8x128xf32>
    %457 = vector.extract_strided_slice %450 {offsets = [0, 128], sizes = [8, 128], strides = [1, 1]} : vector<8x512xf32> to vector<8x128xf32>
    %458 = arith.negf %457 : vector<8x128xf32>
    %459 = math.exp %458 : vector<8x128xf32>
    %cst_131 = arith.constant 1.000000e+00 : f32
    %460 = vector.broadcast %cst_131 : f32 to vector<8x128xf32>
    %461 = arith.addf %460, %459 : vector<8x128xf32>
    %462 = arith.divf %460, %461 : vector<8x128xf32>
    %463 = vector.extract_strided_slice %450 {offsets = [0, 256], sizes = [8, 128], strides = [1, 1]} : vector<8x512xf32> to vector<8x128xf32>
    %464 = math.tanh %463 : vector<8x128xf32>
    %465 = vector.extract_strided_slice %450 {offsets = [0, 384], sizes = [8, 128], strides = [1, 1]} : vector<8x512xf32> to vector<8x128xf32>
    %466 = arith.negf %465 : vector<8x128xf32>
    %467 = math.exp %466 : vector<8x128xf32>
    %cst_132 = arith.constant 1.000000e+00 : f32
    %468 = vector.broadcast %cst_132 : f32 to vector<8x128xf32>
    %469 = arith.addf %468, %467 : vector<8x128xf32>
    %470 = arith.divf %468, %469 : vector<8x128xf32>
    %471 = arith.mulf %462, %442 : vector<8x128xf32>
    %472 = arith.mulf %456, %464 : vector<8x128xf32>
    %473 = arith.addf %471, %472 : vector<8x128xf32>
    %474 = math.tanh %473 : vector<8x128xf32>
    %475 = arith.mulf %470, %474 : vector<8x128xf32>
    %476 = arith.index_cast %c2_i32_126 : i32 to index
    %c0_133 = arith.constant 0 : index
    %c0_134 = arith.constant 0 : index
    %477 = vector.load %arg2[%476, %c0_133, %c0_134] : memref<8x8x128xf32, #tpu.memory_space<vmem>>, vector<1x8x128xf32>
    %478 = vector.shape_cast %477 : vector<1x8x128xf32> to vector<8x128xf32>
    %479 = arith.subf %473, %442 : vector<8x128xf32>
    %480 = arith.mulf %478, %479 : vector<8x128xf32>
    %481 = arith.addf %442, %480 : vector<8x128xf32>
    %482 = arith.subf %475, %445 : vector<8x128xf32>
    %483 = arith.mulf %478, %482 : vector<8x128xf32>
    %484 = arith.addf %445, %483 : vector<8x128xf32>
    %c3_i32_135 = arith.constant 3 : i32
    %485 = arith.index_cast %c3_i32_135 : i32 to index
    %c0_136 = arith.constant 0 : index
    %c0_137 = arith.constant 0 : index
    %486 = vector.load %arg12[%485, %c0_136, %c0_137] : memref<8x8x512xf32, #tpu.memory_space<vmem>>, vector<1x8x512xf32>
    %487 = vector.shape_cast %486 : vector<1x8x512xf32> to vector<8x512xf32>
    %cst_138 = arith.constant dense<0.000000e+00> : vector<8x512xf32>
    %488 = tpu.matmul %484, %365, %cst_138 {dimension_numbers = #tpu.dot_dimension_numbers<[1], [0], [0], [1], [0, 0, 1, 1], [], []>} : vector<8x128xf32>, vector<128x512xf32>, vector<8x512xf32> -> vector<8x512xf32>
    %489 = arith.addf %487, %488 : vector<8x512xf32>
    %490 = vector.extract_strided_slice %489 {offsets = [0, 0], sizes = [8, 128], strides = [1, 1]} : vector<8x512xf32> to vector<8x128xf32>
    %491 = arith.negf %490 : vector<8x128xf32>
    %492 = math.exp %491 : vector<8x128xf32>
    %cst_139 = arith.constant 1.000000e+00 : f32
    %493 = vector.broadcast %cst_139 : f32 to vector<8x128xf32>
    %494 = arith.addf %493, %492 : vector<8x128xf32>
    %495 = arith.divf %493, %494 : vector<8x128xf32>
    %496 = vector.extract_strided_slice %489 {offsets = [0, 128], sizes = [8, 128], strides = [1, 1]} : vector<8x512xf32> to vector<8x128xf32>
    %497 = arith.negf %496 : vector<8x128xf32>
    %498 = math.exp %497 : vector<8x128xf32>
    %cst_140 = arith.constant 1.000000e+00 : f32
    %499 = vector.broadcast %cst_140 : f32 to vector<8x128xf32>
    %500 = arith.addf %499, %498 : vector<8x128xf32>
    %501 = arith.divf %499, %500 : vector<8x128xf32>
    %502 = vector.extract_strided_slice %489 {offsets = [0, 256], sizes = [8, 128], strides = [1, 1]} : vector<8x512xf32> to vector<8x128xf32>
    %503 = math.tanh %502 : vector<8x128xf32>
    %504 = vector.extract_strided_slice %489 {offsets = [0, 384], sizes = [8, 128], strides = [1, 1]} : vector<8x512xf32> to vector<8x128xf32>
    %505 = arith.negf %504 : vector<8x128xf32>
    %506 = math.exp %505 : vector<8x128xf32>
    %cst_141 = arith.constant 1.000000e+00 : f32
    %507 = vector.broadcast %cst_141 : f32 to vector<8x128xf32>
    %508 = arith.addf %507, %506 : vector<8x128xf32>
    %509 = arith.divf %507, %508 : vector<8x128xf32>
    %510 = arith.mulf %501, %481 : vector<8x128xf32>
    %511 = arith.mulf %495, %503 : vector<8x128xf32>
    %512 = arith.addf %510, %511 : vector<8x128xf32>
    %513 = math.tanh %512 : vector<8x128xf32>
    %514 = arith.mulf %509, %513 : vector<8x128xf32>
    %515 = arith.index_cast %c3_i32_135 : i32 to index
    %c0_142 = arith.constant 0 : index
    %c0_143 = arith.constant 0 : index
    %516 = vector.load %arg2[%515, %c0_142, %c0_143] : memref<8x8x128xf32, #tpu.memory_space<vmem>>, vector<1x8x128xf32>
    %517 = vector.shape_cast %516 : vector<1x8x128xf32> to vector<8x128xf32>
    %518 = arith.subf %512, %481 : vector<8x128xf32>
    %519 = arith.mulf %517, %518 : vector<8x128xf32>
    %520 = arith.addf %481, %519 : vector<8x128xf32>
    %521 = arith.subf %514, %484 : vector<8x128xf32>
    %522 = arith.mulf %517, %521 : vector<8x128xf32>
    %523 = arith.addf %484, %522 : vector<8x128xf32>
    %c4_i32_144 = arith.constant 4 : i32
    %524 = arith.index_cast %c4_i32_144 : i32 to index
    %c0_145 = arith.constant 0 : index
    %c0_146 = arith.constant 0 : index
    %525 = vector.load %arg12[%524, %c0_145, %c0_146] : memref<8x8x512xf32, #tpu.memory_space<vmem>>, vector<1x8x512xf32>
    %526 = vector.shape_cast %525 : vector<1x8x512xf32> to vector<8x512xf32>
    %cst_147 = arith.constant dense<0.000000e+00> : vector<8x512xf32>
    %527 = tpu.matmul %523, %365, %cst_147 {dimension_numbers = #tpu.dot_dimension_numbers<[1], [0], [0], [1], [0, 0, 1, 1], [], []>} : vector<8x128xf32>, vector<128x512xf32>, vector<8x512xf32> -> vector<8x512xf32>
    %528 = arith.addf %526, %527 : vector<8x512xf32>
    %529 = vector.extract_strided_slice %528 {offsets = [0, 0], sizes = [8, 128], strides = [1, 1]} : vector<8x512xf32> to vector<8x128xf32>
    %530 = arith.negf %529 : vector<8x128xf32>
    %531 = math.exp %530 : vector<8x128xf32>
    %cst_148 = arith.constant 1.000000e+00 : f32
    %532 = vector.broadcast %cst_148 : f32 to vector<8x128xf32>
    %533 = arith.addf %532, %531 : vector<8x128xf32>
    %534 = arith.divf %532, %533 : vector<8x128xf32>
    %535 = vector.extract_strided_slice %528 {offsets = [0, 128], sizes = [8, 128], strides = [1, 1]} : vector<8x512xf32> to vector<8x128xf32>
    %536 = arith.negf %535 : vector<8x128xf32>
    %537 = math.exp %536 : vector<8x128xf32>
    %cst_149 = arith.constant 1.000000e+00 : f32
    %538 = vector.broadcast %cst_149 : f32 to vector<8x128xf32>
    %539 = arith.addf %538, %537 : vector<8x128xf32>
    %540 = arith.divf %538, %539 : vector<8x128xf32>
    %541 = vector.extract_strided_slice %528 {offsets = [0, 256], sizes = [8, 128], strides = [1, 1]} : vector<8x512xf32> to vector<8x128xf32>
    %542 = math.tanh %541 : vector<8x128xf32>
    %543 = vector.extract_strided_slice %528 {offsets = [0, 384], sizes = [8, 128], strides = [1, 1]} : vector<8x512xf32> to vector<8x128xf32>
    %544 = arith.negf %543 : vector<8x128xf32>
    %545 = math.exp %544 : vector<8x128xf32>
    %cst_150 = arith.constant 1.000000e+00 : f32
    %546 = vector.broadcast %cst_150 : f32 to vector<8x128xf32>
    %547 = arith.addf %546, %545 : vector<8x128xf32>
    %548 = arith.divf %546, %547 : vector<8x128xf32>
    %549 = arith.mulf %540, %520 : vector<8x128xf32>
    %550 = arith.mulf %534, %542 : vector<8x128xf32>
    %551 = arith.addf %549, %550 : vector<8x128xf32>
    %552 = math.tanh %551 : vector<8x128xf32>
    %553 = arith.mulf %548, %552 : vector<8x128xf32>
    %554 = arith.index_cast %c4_i32_144 : i32 to index
    %c0_151 = arith.constant 0 : index
    %c0_152 = arith.constant 0 : index
    %555 = vector.load %arg2[%554, %c0_151, %c0_152] : memref<8x8x128xf32, #tpu.memory_space<vmem>>, vector<1x8x128xf32>
    %556 = vector.shape_cast %555 : vector<1x8x128xf32> to vector<8x128xf32>
    %557 = arith.subf %551, %520 : vector<8x128xf32>
    %558 = arith.mulf %556, %557 : vector<8x128xf32>
    %559 = arith.addf %520, %558 : vector<8x128xf32>
    %560 = arith.subf %553, %523 : vector<8x128xf32>
    %561 = arith.mulf %556, %560 : vector<8x128xf32>
    %562 = arith.addf %523, %561 : vector<8x128xf32>
    %c5_i32_153 = arith.constant 5 : i32
    %563 = arith.index_cast %c5_i32_153 : i32 to index
    %c0_154 = arith.constant 0 : index
    %c0_155 = arith.constant 0 : index
    %564 = vector.load %arg12[%563, %c0_154, %c0_155] : memref<8x8x512xf32, #tpu.memory_space<vmem>>, vector<1x8x512xf32>
    %565 = vector.shape_cast %564 : vector<1x8x512xf32> to vector<8x512xf32>
    %cst_156 = arith.constant dense<0.000000e+00> : vector<8x512xf32>
    %566 = tpu.matmul %562, %365, %cst_156 {dimension_numbers = #tpu.dot_dimension_numbers<[1], [0], [0], [1], [0, 0, 1, 1], [], []>} : vector<8x128xf32>, vector<128x512xf32>, vector<8x512xf32> -> vector<8x512xf32>
    %567 = arith.addf %565, %566 : vector<8x512xf32>
    %568 = vector.extract_strided_slice %567 {offsets = [0, 0], sizes = [8, 128], strides = [1, 1]} : vector<8x512xf32> to vector<8x128xf32>
    %569 = arith.negf %568 : vector<8x128xf32>
    %570 = math.exp %569 : vector<8x128xf32>
    %cst_157 = arith.constant 1.000000e+00 : f32
    %571 = vector.broadcast %cst_157 : f32 to vector<8x128xf32>
    %572 = arith.addf %571, %570 : vector<8x128xf32>
    %573 = arith.divf %571, %572 : vector<8x128xf32>
    %574 = vector.extract_strided_slice %567 {offsets = [0, 128], sizes = [8, 128], strides = [1, 1]} : vector<8x512xf32> to vector<8x128xf32>
    %575 = arith.negf %574 : vector<8x128xf32>
    %576 = math.exp %575 : vector<8x128xf32>
    %cst_158 = arith.constant 1.000000e+00 : f32
    %577 = vector.broadcast %cst_158 : f32 to vector<8x128xf32>
    %578 = arith.addf %577, %576 : vector<8x128xf32>
    %579 = arith.divf %577, %578 : vector<8x128xf32>
    %580 = vector.extract_strided_slice %567 {offsets = [0, 256], sizes = [8, 128], strides = [1, 1]} : vector<8x512xf32> to vector<8x128xf32>
    %581 = math.tanh %580 : vector<8x128xf32>
    %582 = vector.extract_strided_slice %567 {offsets = [0, 384], sizes = [8, 128], strides = [1, 1]} : vector<8x512xf32> to vector<8x128xf32>
    %583 = arith.negf %582 : vector<8x128xf32>
    %584 = math.exp %583 : vector<8x128xf32>
    %cst_159 = arith.constant 1.000000e+00 : f32
    %585 = vector.broadcast %cst_159 : f32 to vector<8x128xf32>
    %586 = arith.addf %585, %584 : vector<8x128xf32>
    %587 = arith.divf %585, %586 : vector<8x128xf32>
    %588 = arith.mulf %579, %559 : vector<8x128xf32>
    %589 = arith.mulf %573, %581 : vector<8x128xf32>
    %590 = arith.addf %588, %589 : vector<8x128xf32>
    %591 = math.tanh %590 : vector<8x128xf32>
    %592 = arith.mulf %587, %591 : vector<8x128xf32>
    %593 = arith.index_cast %c5_i32_153 : i32 to index
    %c0_160 = arith.constant 0 : index
    %c0_161 = arith.constant 0 : index
    %594 = vector.load %arg2[%593, %c0_160, %c0_161] : memref<8x8x128xf32, #tpu.memory_space<vmem>>, vector<1x8x128xf32>
    %595 = vector.shape_cast %594 : vector<1x8x128xf32> to vector<8x128xf32>
    %596 = arith.subf %590, %559 : vector<8x128xf32>
    %597 = arith.mulf %595, %596 : vector<8x128xf32>
    %598 = arith.addf %559, %597 : vector<8x128xf32>
    %599 = arith.subf %592, %562 : vector<8x128xf32>
    %600 = arith.mulf %595, %599 : vector<8x128xf32>
    %601 = arith.addf %562, %600 : vector<8x128xf32>
    %c6_i32_162 = arith.constant 6 : i32
    %602 = arith.index_cast %c6_i32_162 : i32 to index
    %c0_163 = arith.constant 0 : index
    %c0_164 = arith.constant 0 : index
    %603 = vector.load %arg12[%602, %c0_163, %c0_164] : memref<8x8x512xf32, #tpu.memory_space<vmem>>, vector<1x8x512xf32>
    %604 = vector.shape_cast %603 : vector<1x8x512xf32> to vector<8x512xf32>
    %cst_165 = arith.constant dense<0.000000e+00> : vector<8x512xf32>
    %605 = tpu.matmul %601, %365, %cst_165 {dimension_numbers = #tpu.dot_dimension_numbers<[1], [0], [0], [1], [0, 0, 1, 1], [], []>} : vector<8x128xf32>, vector<128x512xf32>, vector<8x512xf32> -> vector<8x512xf32>
    %606 = arith.addf %604, %605 : vector<8x512xf32>
    %607 = vector.extract_strided_slice %606 {offsets = [0, 0], sizes = [8, 128], strides = [1, 1]} : vector<8x512xf32> to vector<8x128xf32>
    %608 = arith.negf %607 : vector<8x128xf32>
    %609 = math.exp %608 : vector<8x128xf32>
    %cst_166 = arith.constant 1.000000e+00 : f32
    %610 = vector.broadcast %cst_166 : f32 to vector<8x128xf32>
    %611 = arith.addf %610, %609 : vector<8x128xf32>
    %612 = arith.divf %610, %611 : vector<8x128xf32>
    %613 = vector.extract_strided_slice %606 {offsets = [0, 128], sizes = [8, 128], strides = [1, 1]} : vector<8x512xf32> to vector<8x128xf32>
    %614 = arith.negf %613 : vector<8x128xf32>
    %615 = math.exp %614 : vector<8x128xf32>
    %cst_167 = arith.constant 1.000000e+00 : f32
    %616 = vector.broadcast %cst_167 : f32 to vector<8x128xf32>
    %617 = arith.addf %616, %615 : vector<8x128xf32>
    %618 = arith.divf %616, %617 : vector<8x128xf32>
    %619 = vector.extract_strided_slice %606 {offsets = [0, 256], sizes = [8, 128], strides = [1, 1]} : vector<8x512xf32> to vector<8x128xf32>
    %620 = math.tanh %619 : vector<8x128xf32>
    %621 = vector.extract_strided_slice %606 {offsets = [0, 384], sizes = [8, 128], strides = [1, 1]} : vector<8x512xf32> to vector<8x128xf32>
    %622 = arith.negf %621 : vector<8x128xf32>
    %623 = math.exp %622 : vector<8x128xf32>
    %cst_168 = arith.constant 1.000000e+00 : f32
    %624 = vector.broadcast %cst_168 : f32 to vector<8x128xf32>
    %625 = arith.addf %624, %623 : vector<8x128xf32>
    %626 = arith.divf %624, %625 : vector<8x128xf32>
    %627 = arith.mulf %618, %598 : vector<8x128xf32>
    %628 = arith.mulf %612, %620 : vector<8x128xf32>
    %629 = arith.addf %627, %628 : vector<8x128xf32>
    %630 = math.tanh %629 : vector<8x128xf32>
    %631 = arith.mulf %626, %630 : vector<8x128xf32>
    %632 = arith.index_cast %c6_i32_162 : i32 to index
    %c0_169 = arith.constant 0 : index
    %c0_170 = arith.constant 0 : index
    %633 = vector.load %arg2[%632, %c0_169, %c0_170] : memref<8x8x128xf32, #tpu.memory_space<vmem>>, vector<1x8x128xf32>
    %634 = vector.shape_cast %633 : vector<1x8x128xf32> to vector<8x128xf32>
    %635 = arith.subf %629, %598 : vector<8x128xf32>
    %636 = arith.mulf %634, %635 : vector<8x128xf32>
    %637 = arith.addf %598, %636 : vector<8x128xf32>
    %638 = arith.subf %631, %601 : vector<8x128xf32>
    %639 = arith.mulf %634, %638 : vector<8x128xf32>
    %640 = arith.addf %601, %639 : vector<8x128xf32>
    %c7_i32_171 = arith.constant 7 : i32
    %641 = arith.index_cast %c7_i32_171 : i32 to index
    %c0_172 = arith.constant 0 : index
    %c0_173 = arith.constant 0 : index
    %642 = vector.load %arg12[%641, %c0_172, %c0_173] : memref<8x8x512xf32, #tpu.memory_space<vmem>>, vector<1x8x512xf32>
    %643 = vector.shape_cast %642 : vector<1x8x512xf32> to vector<8x512xf32>
    %cst_174 = arith.constant dense<0.000000e+00> : vector<8x512xf32>
    %644 = tpu.matmul %640, %365, %cst_174 {dimension_numbers = #tpu.dot_dimension_numbers<[1], [0], [0], [1], [0, 0, 1, 1], [], []>} : vector<8x128xf32>, vector<128x512xf32>, vector<8x512xf32> -> vector<8x512xf32>
    %645 = arith.addf %643, %644 : vector<8x512xf32>
    %646 = vector.extract_strided_slice %645 {offsets = [0, 0], sizes = [8, 128], strides = [1, 1]} : vector<8x512xf32> to vector<8x128xf32>
    %647 = arith.negf %646 : vector<8x128xf32>
    %648 = math.exp %647 : vector<8x128xf32>
    %cst_175 = arith.constant 1.000000e+00 : f32
    %649 = vector.broadcast %cst_175 : f32 to vector<8x128xf32>
    %650 = arith.addf %649, %648 : vector<8x128xf32>
    %651 = arith.divf %649, %650 : vector<8x128xf32>
    %652 = vector.extract_strided_slice %645 {offsets = [0, 128], sizes = [8, 128], strides = [1, 1]} : vector<8x512xf32> to vector<8x128xf32>
    %653 = arith.negf %652 : vector<8x128xf32>
    %654 = math.exp %653 : vector<8x128xf32>
    %cst_176 = arith.constant 1.000000e+00 : f32
    %655 = vector.broadcast %cst_176 : f32 to vector<8x128xf32>
    %656 = arith.addf %655, %654 : vector<8x128xf32>
    %657 = arith.divf %655, %656 : vector<8x128xf32>
    %658 = vector.extract_strided_slice %645 {offsets = [0, 256], sizes = [8, 128], strides = [1, 1]} : vector<8x512xf32> to vector<8x128xf32>
    %659 = math.tanh %658 : vector<8x128xf32>
    %660 = vector.extract_strided_slice %645 {offsets = [0, 384], sizes = [8, 128], strides = [1, 1]} : vector<8x512xf32> to vector<8x128xf32>
    %661 = arith.negf %660 : vector<8x128xf32>
    %662 = math.exp %661 : vector<8x128xf32>
    %cst_177 = arith.constant 1.000000e+00 : f32
    %663 = vector.broadcast %cst_177 : f32 to vector<8x128xf32>
    %664 = arith.addf %663, %662 : vector<8x128xf32>
    %665 = arith.divf %663, %664 : vector<8x128xf32>
    %666 = arith.mulf %657, %637 : vector<8x128xf32>
    %667 = arith.mulf %651, %659 : vector<8x128xf32>
    %668 = arith.addf %666, %667 : vector<8x128xf32>
    %669 = math.tanh %668 : vector<8x128xf32>
    %670 = arith.mulf %665, %669 : vector<8x128xf32>
    %671 = arith.index_cast %c7_i32_171 : i32 to index
    %c0_178 = arith.constant 0 : index
    %c0_179 = arith.constant 0 : index
    %672 = vector.load %arg2[%671, %c0_178, %c0_179] : memref<8x8x128xf32, #tpu.memory_space<vmem>>, vector<1x8x128xf32>
    %673 = vector.shape_cast %672 : vector<1x8x128xf32> to vector<8x128xf32>
    %674 = arith.subf %668, %637 : vector<8x128xf32>
    %675 = arith.mulf %673, %674 : vector<8x128xf32>
    %676 = arith.addf %637, %675 : vector<8x128xf32>
    %677 = arith.subf %670, %640 : vector<8x128xf32>
    %678 = arith.mulf %673, %677 : vector<8x128xf32>
    %679 = arith.addf %640, %678 : vector<8x128xf32>
    %c8_i32_180 = arith.constant 8 : i32
    %c0_181 = arith.constant 0 : index
    %c0_182 = arith.constant 0 : index
    %680 = vector.load %arg9[%c0_181, %c0_182] : memref<128x128xf32, #tpu.memory_space<vmem>>, vector<128x128xf32>
    %cst_183 = arith.constant dense<0.000000e+00> : vector<8x128xf32>
    %681 = tpu.matmul %679, %680, %cst_183 {dimension_numbers = #tpu.dot_dimension_numbers<[1], [0], [0], [1], [0, 0, 1, 1], [], []>} : vector<8x128xf32>, vector<128x128xf32>, vector<8x128xf32> -> vector<8x128xf32>
    %c0_184 = arith.constant 0 : index
    %c0_185 = arith.constant 0 : index
    %682 = vector.load %arg10[%c0_184, %c0_185] : memref<1x128xf32, #tpu.memory_space<vmem>>, vector<1x128xf32>
    %683 = vector.broadcast %682 : vector<1x128xf32> to vector<8x128xf32>
    %684 = arith.addf %681, %683 : vector<8x128xf32>
    %685 = arith.negf %684 : vector<8x128xf32>
    %686 = math.exp %685 : vector<8x128xf32>
    %cst_186 = arith.constant 1.000000e+00 : f32
    %687 = vector.broadcast %cst_186 : f32 to vector<8x128xf32>
    %688 = arith.addf %687, %686 : vector<8x128xf32>
    %689 = arith.divf %687, %688 : vector<8x128xf32>
    %c0_187 = arith.constant 0 : index
    %c0_188 = arith.constant 0 : index
    %690 = vector.load %arg11[%c0_187, %c0_188] : memref<8x128xf32, #tpu.memory_space<vmem>>, vector<8x128xf32>
    tpu.vector_store %arg11[%c0_187, %c0_188], %689 {strides = array<i32>} : memref<8x128xf32, #tpu.memory_space<vmem>>, vector<8x128xf32>,
    return
  }
  func.func @transform_0(%arg0: i32) -> (i32, i32, i32) {
    %c0_i32 = arith.constant 0 : i32
    %c0_i32_0 = arith.constant 0 : i32
    %c0_i32_1 = arith.constant 0 : i32
    %c0_i32_2 = arith.constant 0 : i32
    return %c0_i32, %c0_i32_0, %c0_i32_1 : i32, i32, i32
  }
  func.func @transform_1(%arg0: i32) -> (i32, i32, i32) {
    %c0_i32 = arith.constant 0 : i32
    %c0_i32_0 = arith.constant 0 : i32
    %c0_i32_1 = arith.constant 0 : i32
    %c0_i32_2 = arith.constant 0 : i32
    return %c0_i32, %c0_i32_0, %c0_i32_1 : i32, i32, i32
  }
  func.func @transform_2(%arg0: i32) -> (i32, i32) {
    %c0_i32 = arith.constant 0 : i32
    %c0_i32_0 = arith.constant 0 : i32
    %c0_i32_1 = arith.constant 0 : i32
    return %c0_i32, %c0_i32_0 : i32, i32
  }
  func.func @transform_3(%arg0: i32) -> (i32, i32) {
    %c0_i32 = arith.constant 0 : i32
    %c0_i32_0 = arith.constant 0 : i32
    %c0_i32_1 = arith.constant 0 : i32
    return %c0_i32, %c0_i32_0 : i32, i32
  }
  func.func @transform_4(%arg0: i32) -> (i32, i32) {
    %c0_i32 = arith.constant 0 : i32
    %c0_i32_0 = arith.constant 0 : i32
    %c0_i32_1 = arith.constant 0 : i32
    return %c0_i32, %c0_i32_0 : i32, i32
  }
  func.func @transform_5(%arg0: i32) -> (i32, i32) {
    %c0_i32 = arith.constant 0 : i32
    %c0_i32_0 = arith.constant 0 : i32
    %c0_i32_1 = arith.constant 0 : i32
    return %c0_i32, %c0_i32_0 : i32, i32
  }
  func.func @transform_6(%arg0: i32) -> (i32, i32) {
    %c0_i32 = arith.constant 0 : i32
    %c0_i32_0 = arith.constant 0 : i32
    %c0_i32_1 = arith.constant 0 : i32
    return %c0_i32, %c0_i32_0 : i32, i32
  }
  func.func @transform_7(%arg0: i32) -> (i32, i32) {
    %c0_i32 = arith.constant 0 : i32
    %c0_i32_0 = arith.constant 0 : i32
    %c0_i32_1 = arith.constant 0 : i32
    return %c0_i32, %c0_i32_0 : i32, i32
  }
  func.func @transform_8(%arg0: i32) -> (i32, i32) {
    %c0_i32 = arith.constant 0 : i32
    %c0_i32_0 = arith.constant 0 : i32
    %c0_i32_1 = arith.constant 0 : i32
    return %c0_i32, %c0_i32_0 : i32, i32
  }
  func.func @transform_9(%arg0: i32) -> (i32, i32) {
    %c0_i32 = arith.constant 0 : i32
    %c0_i32_0 = arith.constant 0 : i32
    %c0_i32_1 = arith.constant 0 : i32
    return %c0_i32, %c0_i32_0 : i32, i32
  }
  func.func @transform_10(%arg0: i32) -> (i32, i32) {
    %c0_i32 = arith.constant 0 : i32
    %c0_i32_0 = arith.constant 0 : i32
    %c0_i32_1 = arith.constant 0 : i32
    return %c0_i32, %c0_i32_0 : i32, i32
  }
}

</mosaic_0001>

<bundles_post_ra>
// kernel: lstm_model_forward.1
= control target key start
LH: loop header
LB: loop body
LE: loop exit
PB: predicated region body
PF: predicated region fallthrough
CT: control target
= control target key end

     0   :  { %v7791_v3 = vmov 0.0   ;;  %vm4393_vm0 = vmmov 0   ;;  %s7780_s2 = inlined_call_operand.vmem [shape: f32[128,512], index: 2, kind: input, shape index: {}]   ;;  %s7781_s0 = inlined_call_operand.vmem [shape: f32[8,8,128], index: 0, kind: input, shape index: {}]   ;;  %s7782_s4 = inlined_call_operand.vmem [shape: f32[128,512], index: 4, kind: input, shape index: {}]   ;;  %s7783_s6 = inlined_call_operand.vmem [shape: f32[1,512], index: 6, kind: input, shape index: {}]   ;;  %s7784_s1 = inlined_call_operand.vmem [shape: f32[8,8,128], index: 1, kind: input, shape index: {}]   ;;  %s7785_s3 = inlined_call_operand.vmem [shape: f32[128,512], index: 3, kind: input, shape index: {}]   ;;  %s7786_s5 = inlined_call_operand.vmem [shape: f32[128,512], index: 5, kind: input, shape index: {}]   ;;  %s7787_s7 = inlined_call_operand.vmem [shape: f32[1,512], index: 7, kind: input, shape index: {}]   ;;  %s7788_s8 = inlined_call_operand.vmem [shape: f32[128,128], index: 8, kind: input, shape index: {}]   ;;  %s7789_s9 = inlined_call_operand.vmem [shape: f32[1,128], index: 9, kind: input, shape index: {}]   ;;  %s7790_s10 = inlined_call_operand.vmem [shape: f32[8,128], index: 10, kind: output, shape index: {}]  }
   0x1   :  { %v104_v0 = vld [vmem:[%s7780_s2 + $0x1e8] sm:$0xff]  ;;  %v106_v1 = vld [vmem:[%s7780_s2 + $0x1f8] sm:$0xff]  ;;  %v103_v2 = vld [vmem:[%s7780_s2 + $0x1e0] sm:$0xff]  ;;  %193 = vmatprep.mubr.f32.mxu0 %v7791_v3  ;;  %306 = vmatprep.mubr.f32.mxu1 %v7791_v3 }
   0x2   :  { %129 = vmatprep.subr.mxu0 %v104_v0  ;;  %242 = vmatprep.subr.mxu1 %v106_v1  ;;  %v105_v4 = vld [vmem:[%s7780_s2 + $0x1f0] sm:$0xff]  ;;  %v100_v5 = vld [vmem:[%s7780_s2 + $0x1c8] sm:$0xff]  ;;  %v102_v6 = vld [vmem:[%s7780_s2 + $0x1d8] sm:$0xff] }
   0x3   :  { %130 = vmatpush1.msra.mxu0 %v103_v2  ;;  %243 = vmatpush1.msra.mxu1 %v105_v4  ;;  %v99_v7 = vld [vmem:[%s7780_s2 + $0x1c0] sm:$0xff]  ;;  %v101_v8 = vld [vmem:[%s7780_s2 + $0x1d0] sm:$0xff]  ;;  %v96_v9 = vld [vmem:[%s7780_s2 + $0x1a8] sm:$0xff] }
   0x4   :  { %131 = vmatprep.subr.mxu0 %v100_v5  ;;  %244 = vmatprep.subr.mxu1 %v102_v6  ;;  %v98_v10 = vld [vmem:[%s7780_s2 + $0x1b8] sm:$0xff]  ;;  %v95_v11 = vld [vmem:[%s7780_s2 + $0x1a0] sm:$0xff]  ;;  %v97_v12 = vld [vmem:[%s7780_s2 + $0x1b0] sm:$0xff] }
   0x5   :  { %132 = vmatpush1.msra.mxu0 %v99_v7  ;;  %245 = vmatpush1.msra.mxu1 %v101_v8  ;;  %v92_v13 = vld [vmem:[%s7780_s2 + $0x188] sm:$0xff]  ;;  %v94_v14 = vld [vmem:[%s7780_s2 + $0x198] sm:$0xff]  ;;  %v91_v15 = vld [vmem:[%s7780_s2 + $0x180] sm:$0xff] }
   0x6   :  { %133 = vmatprep.subr.mxu0 %v96_v9  ;;  %246 = vmatprep.subr.mxu1 %v98_v10  ;;  %v93_v16 = vld [vmem:[%s7780_s2 + $0x190] sm:$0xff]  ;;  %v88_v17 = vld [vmem:[%s7780_s2 + $0x168] sm:$0xff]  ;;  %v90_v18 = vld [vmem:[%s7780_s2 + $0x178] sm:$0xff] }
   0x7   :  { %134 = vmatpush1.msra.mxu0 %v95_v11  ;;  %247 = vmatpush1.msra.mxu1 %v97_v12  ;;  %v87_v19 = vld [vmem:[%s7780_s2 + $0x160] sm:$0xff]  ;;  %v89_v20 = vld [vmem:[%s7780_s2 + $0x170] sm:$0xff]  ;;  %v84_v21 = vld [vmem:[%s7780_s2 + $0x148] sm:$0xff] }
   0x8   :  { %135 = vmatprep.subr.mxu0 %v92_v13  ;;  %248 = vmatprep.subr.mxu1 %v94_v14  ;;  %v86_v22 = vld [vmem:[%s7780_s2 + $0x158] sm:$0xff]  ;;  %v83_v23 = vld [vmem:[%s7780_s2 + $0x140] sm:$0xff]  ;;  %v85_v24 = vld [vmem:[%s7780_s2 + $0x150] sm:$0xff] }
   0x9   :  { %136 = vmatpush1.msra.mxu0 %v91_v15  ;;  %249 = vmatpush1.msra.mxu1 %v93_v16  ;;  %v80_v25 = vld [vmem:[%s7780_s2 + $0x128] sm:$0xff]  ;;  %v82_v26 = vld [vmem:[%s7780_s2 + $0x138] sm:$0xff]  ;;  %v79_v27 = vld [vmem:[%s7780_s2 + $0x120] sm:$0xff] }
   0xa   :  { %137 = vmatprep.subr.mxu0 %v88_v17  ;;  %250 = vmatprep.subr.mxu1 %v90_v18  ;;  %v81_v28 = vld [vmem:[%s7780_s2 + $0x130] sm:$0xff]  ;;  %v76_v29 = vld [vmem:[%s7780_s2 + $0x108] sm:$0xff]  ;;  %v78_v30 = vld [vmem:[%s7780_s2 + $0x118] sm:$0xff] }
   0xb   :  { %138 = vmatpush1.msra.mxu0 %v87_v19  ;;  %251 = vmatpush1.msra.mxu1 %v89_v20  ;;  %v75_v31 = vld [vmem:[%s7780_s2 + $0x100] sm:$0xff]  ;;  %v77_v32 = vld [vmem:[%s7780_s2 + $0x110] sm:$0xff]  ;;  %v72_v33 = vld [vmem:[%s7780_s2 + $0xe8] sm:$0xff] }
   0xc   :  { %139 = vmatprep.subr.mxu0 %v84_v21  ;;  %252 = vmatprep.subr.mxu1 %v86_v22  ;;  %v74_v34 = vld [vmem:[%s7780_s2 + $0xf8] sm:$0xff]  ;;  %v71_v35 = vld [vmem:[%s7780_s2 + $0xe0] sm:$0xff]  ;;  %v73_v36 = vld [vmem:[%s7780_s2 + $0xf0] sm:$0xff] }
   0xd   :  { %140 = vmatpush1.msra.mxu0 %v83_v23  ;;  %253 = vmatpush1.msra.mxu1 %v85_v24  ;;  %v68_v37 = vld [vmem:[%s7780_s2 + $0xc8] sm:$0xff]  ;;  %v70_v38 = vld [vmem:[%s7780_s2 + $0xd8] sm:$0xff]  ;;  %v67_v39 = vld [vmem:[%s7780_s2 + $0xc0] sm:$0xff] }
   0xe   :  { %141 = vmatprep.subr.mxu0 %v80_v25  ;;  %254 = vmatprep.subr.mxu1 %v82_v26  ;;  %v69_v40 = vld [vmem:[%s7780_s2 + $0xd0] sm:$0xff]  ;;  %v64_v41 = vld [vmem:[%s7780_s2 + $0xa8] sm:$0xff]  ;;  %v66_v42 = vld [vmem:[%s7780_s2 + $0xb8] sm:$0xff] }
   0xf   :  { %142 = vmatpush1.msra.mxu0 %v79_v27  ;;  %255 = vmatpush1.msra.mxu1 %v81_v28  ;;  %v63_v43 = vld [vmem:[%s7780_s2 + $0xa0] sm:$0xff]  ;;  %v65_v44 = vld [vmem:[%s7780_s2 + $0xb0] sm:$0xff]  ;;  %v60_v45 = vld [vmem:[%s7780_s2 + $0x88] sm:$0xff] }
  0x10   :  { %143 = vmatprep.subr.mxu0 %v76_v29  ;;  %256 = vmatprep.subr.mxu1 %v78_v30  ;;  %v62_v46 = vld [vmem:[%s7780_s2 + $0x98] sm:$0xff]  ;;  %v59_v47 = vld [vmem:[%s7780_s2 + $0x80] sm:$0xff]  ;;  %v61_v48 = vld [vmem:[%s7780_s2 + $0x90] sm:$0xff] }
  0x11   :  { %144 = vmatpush1.msra.mxu0 %v75_v31  ;;  %257 = vmatpush1.msra.mxu1 %v77_v32  ;;  %v56_v49 = vld [vmem:[%s7780_s2 + $0x68] sm:$0xff]  ;;  %v58_v50 = vld [vmem:[%s7780_s2 + $0x78] sm:$0xff]  ;;  %v55_v51 = vld [vmem:[%s7780_s2 + $0x60] sm:$0xff] }
  0x12   :  { %145 = vmatprep.subr.mxu0 %v72_v33  ;;  %258 = vmatprep.subr.mxu1 %v74_v34  ;;  %v57_v52 = vld [vmem:[%s7780_s2 + $0x70] sm:$0xff]  ;;  %v52_v53 = vld [vmem:[%s7780_s2 + $0x48] sm:$0xff]  ;;  %v54_v54 = vld [vmem:[%s7780_s2 + $0x58] sm:$0xff] }
  0x13   :  { %146 = vmatpush1.msra.mxu0 %v71_v35  ;;  %259 = vmatpush1.msra.mxu1 %v73_v36  ;;  %v51_v55 = vld [vmem:[%s7780_s2 + $0x40] sm:$0xff]  ;;  %v53_v56 = vld [vmem:[%s7780_s2 + $0x50] sm:$0xff]  ;;  %v48_v57 = vld [vmem:[%s7780_s2 + $0x28] sm:$0xff] }
  0x14   :  { %147 = vmatprep.subr.mxu0 %v68_v37  ;;  %260 = vmatprep.subr.mxu1 %v70_v38  ;;  %v50_v58 = vld [vmem:[%s7780_s2 + $0x38] sm:$0xff]  ;;  %v47_v59 = vld [vmem:[%s7780_s2 + $0x20] sm:$0xff]  ;;  %v49_v60 = vld [vmem:[%s7780_s2 + $0x30] sm:$0xff] }
  0x15   :  { %148 = vmatpush1.msra.mxu0 %v67_v39  ;;  %261 = vmatpush1.msra.mxu1 %v69_v40  ;;  %v44_v61 = vld [vmem:[%s7780_s2 + $0x8] sm:$0xff]  ;;  %v46_v62 = vld [vmem:[%s7780_s2 + $0x18] sm:$0xff]  ;;  %v43_v63 = vld [vmem:[%s7780_s2] sm:$0xff] }
  0x16   :  { %149 = vmatprep.subr.mxu0 %v64_v41  ;;  %262 = vmatprep.subr.mxu1 %v66_v42  ;;  %v45_v0 = vld [vmem:[%s7780_s2 + $0x10] sm:$0xff]  ;;  %v35_v1 = vld [vmem:[%s7781_s0] sm:$0xff]  ;;  %v4649_v2 = vld [vmem:[%s7782_s4 + $0x1e8] sm:$0xff] }
  0x17   :  { %150 = vmatpush1.msra.mxu0 %v63_v43  ;;  %263 = vmatpush1.msra.mxu1 %v65_v44  ;;  %8012 = vst [vmem:[#allocation4_spill] sm:$0xff] %v4649_v2  ;;  %v4654_v4 = vld [vmem:[%s7782_s4 + $0x1f8] sm:$0xff]  ;;  %v4659_v5 = vld [vmem:[%s7782_s4 + $0x1e0] sm:$0xff]  ;;  %v4664_v6 = vld [vmem:[%s7782_s4 + $0x1f0] sm:$0xff] }
  0x18   :  { %151 = vmatprep.subr.mxu0 %v60_v45  ;;  %264 = vmatprep.subr.mxu1 %v62_v46  ;;  %8013 = vst [vmem:[#allocation5_spill] sm:$0xff] %v4654_v4  ;;  %v4669_v7 = vld [vmem:[%s7782_s4 + $0x1c8] sm:$0xff]  ;;  %v4674_v8 = vld [vmem:[%s7782_s4 + $0x1d8] sm:$0xff]  ;;  %v4683_v9 = vld [vmem:[%s7782_s4 + $0x1c0] sm:$0xff] }
  0x19   :  { %152 = vmatpush1.msra.mxu0 %v59_v47  ;;  %265 = vmatpush1.msra.mxu1 %v61_v48  ;;  %v4688_v10 = vld [vmem:[%s7782_s4 + $0x1d0] sm:$0xff]  ;;  %v36_v11 = vld [vmem:[%s7781_s0 + $0x8] sm:$0xff]  ;;  %v4705_v13 = vld [vmem:[%s7782_s4 + $0x1b8] sm:$0xff] }
  0x1a   :  { %153 = vmatprep.subr.mxu0 %v56_v49  ;;  %266 = vmatprep.subr.mxu1 %v58_v50  ;;  %v4700_v12 = vld [vmem:[%s7782_s4 + $0x1a8] sm:$0xff]  ;;  %v4712_v14 = vld [vmem:[%s7782_s4 + $0x1a0] sm:$0xff]  ;;  %v4717_v15 = vld [vmem:[%s7782_s4 + $0x1b0] sm:$0xff] }
  0x1b   :  { %154 = vmatpush1.msra.mxu0 %v55_v51  ;;  %267 = vmatpush1.msra.mxu1 %v57_v52  ;;  %v4722_v16 = vld [vmem:[%s7782_s4 + $0x188] sm:$0xff]  ;;  %v4727_v17 = vld [vmem:[%s7782_s4 + $0x198] sm:$0xff]  ;;  %v4736_v18 = vld [vmem:[%s7782_s4 + $0x180] sm:$0xff] }
  0x1c   :  { %155 = vmatprep.subr.mxu0 %v52_v53  ;;  %268 = vmatprep.subr.mxu1 %v54_v54  ;;  %v4741_v19 = vld [vmem:[%s7782_s4 + $0x190] sm:$0xff]  ;;  %v4753_v21 = vld [vmem:[%s7782_s4 + $0x168] sm:$0xff]  ;;  %v4758_v22 = vld [vmem:[%s7782_s4 + $0x178] sm:$0xff] }
  0x1d   :  { %156 = vmatpush1.msra.mxu0 %v51_v55  ;;  %269 = vmatpush1.msra.mxu1 %v53_v56  ;;  %v37_v20 = vld [vmem:[%s7781_s0 + $0x10] sm:$0xff]  ;;  %v4765_v23 = vld [vmem:[%s7782_s4 + $0x160] sm:$0xff]  ;;  %v4775_v25 = vld [vmem:[%s7782_s4 + $0x148] sm:$0xff] }
  0x1e   :  { %157 = vmatprep.subr.mxu0 %v48_v57  ;;  %270 = vmatprep.subr.mxu1 %v50_v58  ;;  %v4770_v24 = vld [vmem:[%s7782_s4 + $0x170] sm:$0xff]  ;;  %v4780_v26 = vld [vmem:[%s7782_s4 + $0x158] sm:$0xff]  ;;  %v4789_v27 = vld [vmem:[%s7782_s4 + $0x140] sm:$0xff] }
  0x1f   :  { %158 = vmatpush1.msra.mxu0 %v47_v59  ;;  %271 = vmatpush1.msra.mxu1 %v49_v60  ;;  %v4794_v28 = vld [vmem:[%s7782_s4 + $0x150] sm:$0xff]  ;;  %v38_v29 = vld [vmem:[%s7781_s0 + $0x18] sm:$0xff]  ;;  %v4806_v30 = vld [vmem:[%s7782_s4 + $0x128] sm:$0xff] }
  0x20   :  { %159 = vmatprep.subr.mxu0 %v44_v61  ;;  %272 = vmatprep.subr.mxu1 %v46_v62  ;;  %v4811_v31 = vld [vmem:[%s7782_s4 + $0x138] sm:$0xff]  ;;  %v4818_v32 = vld [vmem:[%s7782_s4 + $0x120] sm:$0xff]  ;;  %v4823_v33 = vld [vmem:[%s7782_s4 + $0x130] sm:$0xff] }
  0x21   :  { %160 = vmatpush1.msra.mxu0 %v43_v63  ;;  %273 = vmatpush1.msra.mxu1 %v45_v0  ;;  %v4828_v34 = vld [vmem:[%s7782_s4 + $0x108] sm:$0xff]  ;;  %v4833_v35 = vld [vmem:[%s7782_s4 + $0x118] sm:$0xff]  ;;  %v4842_v36 = vld [vmem:[%s7782_s4 + $0x100] sm:$0xff] }
  0x22   :  { %194 = vmatmul.mubr.f32.vlgmr.msra.gmra.mxu0 %v35_v1  ;;  %307 = vmatmul.mubr.f32.vlgmr.msra.gmra.mxu1 %v35_v1  ;;  %v4847_v37 = vld [vmem:[%s7782_s4 + $0x110] sm:$0xff]  ;;  %v39_v38 = vld [vmem:[%s7781_s0 + $0x20] sm:$0xff]  ;;  %v4859_v39 = vld [vmem:[%s7782_s4 + $0xe8] sm:$0xff] }
  0x23   :  { %455 = vmatprep.subr.mxu0 %v4649_v2  ;;  %526 = vmatprep.subr.mxu1 %v4654_v4  ;;  %v4864_v40 = vld [vmem:[%s7782_s4 + $0xf8] sm:$0xff]  ;;  %v4871_v41 = vld [vmem:[%s7782_s4 + $0xe0] sm:$0xff]  ;;  %v4876_v42 = vld [vmem:[%s7782_s4 + $0xf0] sm:$0xff] }
  0x24   :  { %456 = vmatpush1.msra.mxu0 %v4659_v5  ;;  %527 = vmatpush1.msra.mxu1 %v4664_v6  ;;  %v4881_v43 = vld [vmem:[%s7782_s4 + $0xc8] sm:$0xff]  ;;  %v4886_v44 = vld [vmem:[%s7782_s4 + $0xd8] sm:$0xff]  ;;  %v4895_v45 = vld [vmem:[%s7782_s4 + $0xc0] sm:$0xff] }
  0x25   :  { %457 = vmatprep.subr.mxu0 %v4669_v7  ;;  %528 = vmatprep.subr.mxu1 %v4674_v8  ;;  %v4900_v46 = vld [vmem:[%s7782_s4 + $0xd0] sm:$0xff]  ;;  %v40_v47 = vld [vmem:[%s7781_s0 + $0x28] sm:$0xff]  ;;  %v4917_v49 = vld [vmem:[%s7782_s4 + $0xb8] sm:$0xff] }
  0x26   :  { %199 = vmatprep.mubr.f32.mxu0 %v7791_v3  ;;  %312 = vmatprep.mubr.f32.mxu1 %v7791_v3  ;;  %v4912_v48 = vld [vmem:[%s7782_s4 + $0xa8] sm:$0xff]  ;;  %v4924_v50 = vld [vmem:[%s7782_s4 + $0xa0] sm:$0xff]  ;;  %v4929_v51 = vld [vmem:[%s7782_s4 + $0xb0] sm:$0xff] }
  0x27   :  { %458 = vmatpush1.msra.mxu0 %v4683_v9  ;;  %529 = vmatpush1.msra.mxu1 %v4688_v10  ;;  %8014 = vst [vmem:[#allocation6_spill] sm:$0xff] %v4929_v51  ;;  %v4934_v52 = vld [vmem:[%s7782_s4 + $0x88] sm:$0xff]  ;;  %v4939_v53 = vld [vmem:[%s7782_s4 + $0x98] sm:$0xff]  ;;  %v4948_v54 = vld [vmem:[%s7782_s4 + $0x80] sm:$0xff] }
  0x28   :  { %200 = vmatmul.mubr.f32.gmra.mxu0 %v36_v11  ;;  %313 = vmatmul.mubr.f32.gmra.mxu1 %v36_v11  ;;  %8015 = vst [vmem:[#allocation7_spill] sm:$0xff] %v4934_v52  ;;  %8016 = vst [vmem:[#allocation8_spill] sm:$0xff] %v4939_v53  ;;  %v4953_v55 = vld [vmem:[%s7782_s4 + $0x90] sm:$0xff]  ;;  %v4965_v57 = vld [vmem:[%s7782_s4 + $0x68] sm:$0xff] }
  0x29   :  { %459 = vmatprep.subr.mxu0 %v4700_v12  ;;  %530 = vmatprep.subr.mxu1 %v4705_v13  ;;  %8017 = vst [vmem:[#allocation9_spill] sm:$0xff] %v4948_v54  ;;  %8018 = vst [vmem:[#allocation10_spill] sm:$0xff] %v4953_v55  ;;  %v41_v56 = vld [vmem:[%s7781_s0 + $0x30] sm:$0xff]  ;;  %v4970_v58 = vld [vmem:[%s7782_s4 + $0x78] sm:$0xff] }
  0x2a   :  { %460 = vmatpush1.msra.mxu0 %v4712_v14  ;;  %531 = vmatpush1.msra.mxu1 %v4717_v15  ;;  %8019 = vst [vmem:[#allocation11_spill] sm:$0xff] %v4965_v57  ;;  %8020 = vst [vmem:[#allocation12_spill] sm:$0xff] %v4970_v58  ;;  %v4977_v59 = vld [vmem:[%s7782_s4 + $0x60] sm:$0xff]  ;;  %v4982_v60 = vld [vmem:[%s7782_s4 + $0x70] sm:$0xff] }
  0x2b   :  { %461 = vmatprep.subr.mxu0 %v4722_v16  ;;  %532 = vmatprep.subr.mxu1 %v4727_v17  ;;  %8021 = vst [vmem:[#allocation13_spill] sm:$0xff] %v4977_v59  ;;  %8022 = vst [vmem:[#allocation14_spill] sm:$0xff] %v4982_v60  ;;  %v4987_v61 = vld [vmem:[%s7782_s4 + $0x48] sm:$0xff]  ;;  %v4992_v62 = vld [vmem:[%s7782_s4 + $0x58] sm:$0xff] }
  0x2c   :  { %205 = vmatprep.mubr.f32.mxu0 %v7791_v3  ;;  %318 = vmatprep.mubr.f32.mxu1 %v7791_v3  ;;  %8023 = vst [vmem:[#allocation15_spill] sm:$0xff] %v4987_v61  ;;  %8024 = vst [vmem:[#allocation16_spill] sm:$0xff] %v4992_v62  ;;  %v5001_v63 = vld [vmem:[%s7782_s4 + $0x40] sm:$0xff]  ;;  %v5006_v0 = vld [vmem:[%s7782_s4 + $0x50] sm:$0xff] }
  0x2d   :  { %462 = vmatpush1.msra.mxu0 %v4736_v18  ;;  %533 = vmatpush1.msra.mxu1 %v4741_v19  ;;  %8025 = vst [vmem:[#allocation17_spill] sm:$0xff] %v5001_v63  ;;  %8026 = vst [vmem:[#allocation18_spill] sm:$0xff] %v5006_v0  ;;  %v42_v1 = vld [vmem:[%s7781_s0 + $0x38] sm:$0xff]  ;;  %v5018_v11 = vld [vmem:[%s7782_s4 + $0x28] sm:$0xff] }
  0x2e   :  { %206 = vmatmul.mubr.f32.gmra.mxu0 %v37_v20  ;;  %319 = vmatmul.mubr.f32.gmra.mxu1 %v37_v20  ;;  %8027 = vst [vmem:[#allocation19_spill] sm:$0xff] %v5018_v11  ;;  %v5023_v20 = vld [vmem:[%s7782_s4 + $0x38] sm:$0xff] }
  0x2f   :  { %463 = vmatprep.subr.mxu0 %v4753_v21  ;;  %534 = vmatprep.subr.mxu1 %v4758_v22  ;;  %8028 = vst [vmem:[#allocation20_spill] sm:$0xff] %v5023_v20 }
  0x30   :  { %464 = vmatpush1.msra.mxu0 %v4765_v23  ;;  %535 = vmatpush1.msra.mxu1 %v4770_v24 }
  0x31   :  { %465 = vmatprep.subr.mxu0 %v4775_v25  ;;  %536 = vmatprep.subr.mxu1 %v4780_v26 }
  0x32   :  { %211 = vmatprep.mubr.f32.mxu0 %v7791_v3  ;;  %324 = vmatprep.mubr.f32.mxu1 %v7791_v3 }
  0x33   :  { %466 = vmatpush1.msra.mxu0 %v4789_v27  ;;  %537 = vmatpush1.msra.mxu1 %v4794_v28 }
  0x34   :  { %212 = vmatmul.mubr.f32.gmra.mxu0 %v38_v29  ;;  %325 = vmatmul.mubr.f32.gmra.mxu1 %v38_v29  ;;  %v5030_v29 = vld [vmem:[%s7782_s4 + $0x20] sm:$0xff] }
  0x35   :  { %467 = vmatprep.subr.mxu0 %v4806_v30  ;;  %538 = vmatprep.subr.mxu1 %v4811_v31  ;;  %8029 = vst [vmem:[#allocation21_spill] sm:$0xff] %v5030_v29 }
  0x36   :  { %468 = vmatpush1.msra.mxu0 %v4818_v32  ;;  %539 = vmatpush1.msra.mxu1 %v4823_v33 }
  0x37   :  { %469 = vmatprep.subr.mxu0 %v4828_v34  ;;  %540 = vmatprep.subr.mxu1 %v4833_v35 }
  0x38   :  { %217 = vmatprep.mubr.f32.mxu0 %v7791_v3  ;;  %330 = vmatprep.mubr.f32.mxu1 %v7791_v3 }
  0x39   :  { %470 = vmatpush1.msra.mxu0 %v4842_v36  ;;  %541 = vmatpush1.msra.mxu1 %v4847_v37 }
  0x3a   :  { %218 = vmatmul.mubr.f32.gmra.mxu0 %v39_v38  ;;  %331 = vmatmul.mubr.f32.gmra.mxu1 %v39_v38  ;;  %v5035_v38 = vld [vmem:[%s7782_s4 + $0x30] sm:$0xff] }
  0x3b   :  { %471 = vmatprep.subr.mxu0 %v4859_v39  ;;  %542 = vmatprep.subr.mxu1 %v4864_v40  ;;  %8030 = vst [vmem:[#allocation22_spill] sm:$0xff] %v5035_v38 }
  0x3c   :  { %472 = vmatpush1.msra.mxu0 %v4871_v41  ;;  %543 = vmatpush1.msra.mxu1 %v4876_v42 }
  0x3d   :  { %473 = vmatprep.subr.mxu0 %v4881_v43  ;;  %544 = vmatprep.subr.mxu1 %v4886_v44 }
  0x3e   :  { %223 = vmatprep.mubr.f32.mxu0 %v7791_v3  ;;  %336 = vmatprep.mubr.f32.mxu1 %v7791_v3 }
  0x3f   :  { %474 = vmatpush1.msra.mxu0 %v4895_v45  ;;  %545 = vmatpush1.msra.mxu1 %v4900_v46 }
  0x40   :  { %224 = vmatmul.mubr.f32.gmra.mxu0 %v40_v47  ;;  %337 = vmatmul.mubr.f32.gmra.mxu1 %v40_v47  ;;  %v5040_v47 = vld [vmem:[%s7782_s4 + $0x8] sm:$0xff] }
  0x41   :  { %475 = vmatprep.subr.mxu0 %v4912_v48  ;;  %546 = vmatprep.subr.mxu1 %v4917_v49  ;;  %8031 = vst [vmem:[#allocation23_spill] sm:$0xff] %v5040_v47 }
  0x42   :  { %476 = vmatpush1.msra.mxu0 %v4924_v50  ;;  %547 = vmatpush1.msra.mxu1 %v4929_v51 }
  0x43   :  { %477 = vmatprep.subr.mxu0 %v4934_v52  ;;  %548 = vmatprep.subr.mxu1 %v4939_v53 }
  0x44   :  { %229 = vmatprep.mubr.f32.mxu0 %v7791_v3  ;;  %342 = vmatprep.mubr.f32.mxu1 %v7791_v3 }
  0x45   :  { %478 = vmatpush1.msra.mxu0 %v4948_v54  ;;  %549 = vmatpush1.msra.mxu1 %v4953_v55 }
  0x46   :  { %230 = vmatmul.mubr.f32.gmra.mxu0 %v41_v56  ;;  %343 = vmatmul.mubr.f32.gmra.mxu1 %v41_v56  ;;  %v5045_v56 = vld [vmem:[%s7782_s4 + $0x18] sm:$0xff] }
  0x47   :  { %479 = vmatprep.subr.mxu0 %v4965_v57  ;;  %550 = vmatprep.subr.mxu1 %v4970_v58  ;;  %8032 = vst [vmem:[#allocation24_spill] sm:$0xff] %v5045_v56 }
  0x48   :  { %480 = vmatpush1.msra.mxu0 %v4977_v59  ;;  %551 = vmatpush1.msra.mxu1 %v4982_v60 }
  0x49   :  { %481 = vmatprep.subr.mxu0 %v4987_v61  ;;  %552 = vmatprep.subr.mxu1 %v4992_v62 }
  0x4a   :  { %235 = vmatprep.mubr.f32.mxu0 %v7791_v3  ;;  %348 = vmatprep.mubr.f32.mxu1 %v7791_v3  ;;  %v5052_v3 = vld [vmem:[%s7782_s4] sm:$0xff] }
  0x4b   :  { %482 = vmatpush1.msra.mxu0 %v5001_v63  ;;  %553 = vmatpush1.msra.mxu1 %v5006_v0  ;;  %8033 = vst [vmem:[#allocation25_spill] sm:$0xff] %v5052_v3 }
  0x4c   :  { %236 = vmatmul.mubr.f32.gmra.mxu0 %v42_v1  ;;  %349 = vmatmul.mubr.f32.gmra.mxu1 %v42_v1  ;;  %v5059_v1 = vld [vmem:[%s7782_s4 + $0x10] sm:$0xff] }
  0x4d   :  { %483 = vmatprep.subr.mxu0 %v5018_v11  ;;  %554 = vmatprep.subr.mxu1 %v5023_v20  ;;  %8034 = vst [vmem:[#allocation26_spill] sm:$0xff] %v5059_v1  ;;  %v8035_v20 = vmov 0.0  }
  0x4e   :  { %484 = vmatpush1.msra.mxu0 %v5030_v29  ;;  %555 = vmatpush1.msra.mxu1 %v5035_v38 }
  0x4f   :  { %485 = vmatprep.subr.mxu0 %v5040_v47  ;;  %556 = vmatprep.subr.mxu1 %v5045_v56 }
  0x50   :  { %486 = vmatpush1.msra.mxu0 %v5052_v3  ;;  %519 = vmatprep.mubr.f32.mxu0 %v8035_v20 }
  0x51   :  { %557 = vmatpush1.msra.mxu1 %v5059_v1  ;;  %590 = vmatprep.mubr.f32.mxu1 %v8035_v20 }
  0x52   :  { %520 = vmatmul.mubr.f32.vlgmr.msra.gmra.mxu0 %v8035_v20  ;;  %591 = vmatmul.mubr.f32.vlgmr.msra.gmra.mxu1 %v8035_v20 }
  0x53   :  { %636 = vmatprep.subr.mxu0 %v4649_v2  ;;  %707 = vmatprep.subr.mxu1 %v4654_v4 }
  0x54   :  { %637 = vmatpush1.msra.mxu0 %v4659_v5  ;;  %708 = vmatpush1.msra.mxu1 %v4664_v6 }
  0x55   :  { %638 = vmatprep.subr.mxu0 %v4669_v7  ;;  %709 = vmatprep.subr.mxu1 %v4674_v8 }
  0x56   :  { %639 = vmatpush1.msra.mxu0 %v4683_v9  ;;  %710 = vmatpush1.msra.mxu1 %v4688_v10 }
  0x57   :  { %640 = vmatprep.subr.mxu0 %v4700_v12  ;;  %711 = vmatprep.subr.mxu1 %v4705_v13 }
  0x58   :  { %641 = vmatpush1.msra.mxu0 %v4712_v14  ;;  %712 = vmatpush1.msra.mxu1 %v4717_v15 }
  0x59   :  { %642 = vmatprep.subr.mxu0 %v4722_v16  ;;  %713 = vmatprep.subr.mxu1 %v4727_v17 }
  0x5a   :  { %643 = vmatpush1.msra.mxu0 %v4736_v18  ;;  %714 = vmatpush1.msra.mxu1 %v4741_v19 }
  0x5b   :  { %644 = vmatprep.subr.mxu0 %v4753_v21  ;;  %715 = vmatprep.subr.mxu1 %v4758_v22 }
  0x5c   :  { %645 = vmatpush1.msra.mxu0 %v4765_v23  ;;  %716 = vmatpush1.msra.mxu1 %v4770_v24 }
  0x5d   :  { %646 = vmatprep.subr.mxu0 %v4775_v25  ;;  %717 = vmatprep.subr.mxu1 %v4780_v26 }
  0x5e   :  { %647 = vmatpush1.msra.mxu0 %v4789_v27  ;;  %718 = vmatpush1.msra.mxu1 %v4794_v28 }
  0x5f   :  { %648 = vmatprep.subr.mxu0 %v4806_v30  ;;  %719 = vmatprep.subr.mxu1 %v4811_v31 }
  0x60   :  { %649 = vmatpush1.msra.mxu0 %v4818_v32  ;;  %720 = vmatpush1.msra.mxu1 %v4823_v33 }
  0x61   :  { %650 = vmatprep.subr.mxu0 %v4828_v34  ;;  %721 = vmatprep.subr.mxu1 %v4833_v35 }
  0x62   :  { %651 = vmatpush1.msra.mxu0 %v4842_v36  ;;  %722 = vmatpush1.msra.mxu1 %v4847_v37 }
  0x63   :  { %652 = vmatprep.subr.mxu0 %v4859_v39  ;;  %723 = vmatprep.subr.mxu1 %v4864_v40 }
  0x64   :  { %653 = vmatpush1.msra.mxu0 %v4871_v41  ;;  %724 = vmatpush1.msra.mxu1 %v4876_v42 }
  0x65   :  { %654 = vmatprep.subr.mxu0 %v4881_v43  ;;  %725 = vmatprep.subr.mxu1 %v4886_v44 }
  0x66   :  { %655 = vmatpush1.msra.mxu0 %v4895_v45  ;;  %726 = vmatpush1.msra.mxu1 %v4900_v46 }
  0x67   :  { %656 = vmatprep.subr.mxu0 %v4912_v48  ;;  %727 = vmatprep.subr.mxu1 %v4917_v49 }
  0x68   :  { %657 = vmatpush1.msra.mxu0 %v4924_v50  ;;  %728 = vmatpush1.msra.mxu1 %v4929_v51 }
  0x69   :  { %658 = vmatprep.subr.mxu0 %v4934_v52  ;;  %729 = vmatprep.subr.mxu1 %v4939_v53 }
  0x6a   :  { %659 = vmatpush1.msra.mxu0 %v4948_v54  ;;  %730 = vmatpush1.msra.mxu1 %v4953_v55  ;;  %v8036_v54 = vld [vmem:[#allocation20_spill] sm:$0xff] }
  0x6b   :  { %660 = vmatprep.subr.mxu0 %v4965_v57  ;;  %731 = vmatprep.subr.mxu1 %v4970_v58 }
  0x6c   :  { %661 = vmatpush1.msra.mxu0 %v4977_v59  ;;  %732 = vmatpush1.msra.mxu1 %v4982_v60 }
  0x6d   :  { %662 = vmatprep.subr.mxu0 %v4987_v61  ;;  %733 = vmatprep.subr.mxu1 %v4992_v62 }
  0x6e   :  { %663 = vmatpush1.msra.mxu0 %v5001_v63  ;;  %734 = vmatpush1.msra.mxu1 %v5006_v0 }
  0x6f   :  { %664 = vmatprep.subr.mxu0 %v5018_v11  ;;  %735 = vmatprep.subr.mxu1 %v8036_v54  ;;  %v109_v54 = vlaneseq }
  0x70   :  { %665 = vmatpush1.msra.mxu0 %v5030_v29  ;;  %736 = vmatpush1.msra.mxu1 %v5035_v38 }
  0x71   :  { %666 = vmatprep.subr.mxu0 %v5040_v47  ;;  %737 = vmatprep.subr.mxu1 %v5045_v56  ;;  %v5137_v29 = vshrl.u32 %v109_v54, 7 }
  0x72   :  { %667 = vmatpush1.msra.mxu0 %v5052_v3  ;;  %700 = vmatprep.mubr.f32.mxu0 %v8035_v20 }
  0x73   :  { %738 = vmatpush1.msra.mxu1 %v5059_v1  ;;  %771 = vmatprep.mubr.f32.mxu1 %v8035_v20  ;;  %8037 = vst [vmem:[#allocation27_spill] sm:$0xff] %v5137_v29  ;;  %v7830_v56 = vsub.s32 0, %v5137_v29  ;;  %v7833_v3 = vsub.s32 2, %v5137_v29  ;;  %v107_v1 = vld [vmem:[%s7783_s6] sm:$0xf]  ;;  %v7841_v54 = vsub.s32 3, %v5137_v29 }
  0x74   :  { %821 = vmatprep.subr.mxu0 %v4649_v2  ;;  %892 = vmatprep.subr.mxu1 %v4654_v4  ;;  %v7840_v4 = vsub.s32 1, %v5137_v29 }
  0x75   :  { %v112_v11 = vrot.slane %v107_v1, %v7830_v56  ;;  %v5158_v0 = vrot.slane %v107_v1, %v7833_v3  ;;  %v5164_v60 = vrot.slane %v107_v1, %v7841_v54 }
  0x76   :  { %v116_v61 = vrot.slane %v107_v1, %v7840_v4 }
  0xe2   :  { %v5139_v38 = vpop.f32.mrf.mxu0  ;;  %v5141_v47 = vpop.f32.mrf.mxu1 }
  0xe4   :  { %v5148_v20 = vpop.f32.mrf.mxu0  ;;  %v5150_v2 = vpop.f32.mrf.mxu1 }
  0xe8   :  { %v201_v63 = vpop.f32.mrf.mxu0  ;;  %v314_v62 = vpop.f32.mrf.mxu1 }
  0xe9   :  { %v5166_v59 = vadd.f32 %v201_v63, %v112_v11  ;;  %v5169_v58 = vadd.f32 %v314_v62, %v5158_v0 }
  0xea   :  { %v203_v57 = vpop.f32.mrf.mxu0  ;;  %v316_v56 = vpop.f32.mrf.mxu1 }
  0xeb   :  { %8038 = vst [vmem:[#allocation28_spill] sm:$0xff] %v5169_v58  ;;  %v5171_v55 = vadd.f32 %v203_v57, %v116_v61  ;;  %v5174_v3 = vadd.f32 %v316_v56, %v5164_v60 }
  0xed   :  { %8039 = vst [vmem:[#allocation29_spill] sm:$0xff] %v5171_v55  ;;  %8040 = vst [vmem:[#allocation30_spill] sm:$0xff] %v5174_v3 }
  0xee   :  { %v207_v53 = vpop.f32.mrf.mxu0  ;;  %v320_v52 = vpop.f32.mrf.mxu1 }
  0xef   :  { %v5176_v51 = vadd.f32 %v207_v53, %v112_v11  ;;  %v5179_v4 = vadd.f32 %v320_v52, %v5158_v0 }
  0xf0   :  { %v209_v1 = vpop.f32.mrf.mxu0  ;;  %v322_v63 = vpop.f32.mrf.mxu1 }
  0xf1   :  { %8041 = vst [vmem:[#allocation31_spill] sm:$0xff] %v5176_v51  ;;  %8042 = vst [vmem:[#allocation32_spill] sm:$0xff] %v5179_v4  ;;  %v5181_v54 = vadd.f32 %v209_v1, %v116_v61  ;;  %v5184_v62 = vadd.f32 %v322_v63, %v5164_v60 }
  0xf3   :  { %8043 = vst [vmem:[#allocation33_spill] sm:$0xff] %v5181_v54  ;;  %8044 = vst [vmem:[#allocation34_spill] sm:$0xff] %v5184_v62 }
  0xf4   :  { %v213_v29 = vpop.f32.mrf.mxu0  ;;  %v326_v57 = vpop.f32.mrf.mxu1 }
  0xf5   :  { %v5186_v58 = vadd.f32 %v213_v29, %v112_v11  ;;  %v5189_v56 = vadd.f32 %v326_v57, %v5158_v0 }
  0xf6   :  { %v215_v3 = vpop.f32.mrf.mxu0  ;;  %v328_v53 = vpop.f32.mrf.mxu1 }
  0xf7   :  { %8045 = vst [vmem:[#allocation35_spill] sm:$0xff] %v5186_v58  ;;  %8046 = vst [vmem:[#allocation36_spill] sm:$0xff] %v5189_v56  ;;  %v5191_v51 = vadd.f32 %v215_v3, %v116_v61  ;;  %v5194_v52 = vadd.f32 %v328_v53, %v5164_v60 }
  0xf9   :  { %8047 = vst [vmem:[#allocation37_spill] sm:$0xff] %v5191_v51  ;;  %8048 = vst [vmem:[#allocation38_spill] sm:$0xff] %v5194_v52 }
  0xfa   :  { %v219_v4 = vpop.f32.mrf.mxu0  ;;  %v332_v1 = vpop.f32.mrf.mxu1 }
  0xfb   :  { %v5196_v54 = vadd.f32 %v219_v4, %v112_v11  ;;  %v5199_v63 = vadd.f32 %v332_v1, %v5158_v0 }
  0xfc   :  { %v221_v62 = vpop.f32.mrf.mxu0  ;;  %v334_v29 = vpop.f32.mrf.mxu1 }
  0xfd   :  { %8049 = vst [vmem:[#allocation39_spill] sm:$0xff] %v5196_v54  ;;  %8050 = vst [vmem:[#allocation40_spill] sm:$0xff] %v5199_v63  ;;  %v5201_v58 = vadd.f32 %v221_v62, %v116_v61  ;;  %v5204_v57 = vadd.f32 %v334_v29, %v5164_v60 }
  0xff   :  { %8051 = vst [vmem:[#allocation41_spill] sm:$0xff] %v5201_v58  ;;  %8052 = vst [vmem:[#allocation42_spill] sm:$0xff] %v5204_v57 }
 0x100   :  { %v225_v56 = vpop.f32.mrf.mxu0  ;;  %v338_v3 = vpop.f32.mrf.mxu1 }
 0x101   :  { %v5206_v51 = vadd.f32 %v225_v56, %v112_v11  ;;  %v5209_v53 = vadd.f32 %v338_v3, %v5158_v0 }
 0x102   :  { %v227_v52 = vpop.f32.mrf.mxu0  ;;  %v340_v4 = vpop.f32.mrf.mxu1 }
 0x103   :  { %8053 = vst [vmem:[#allocation43_spill] sm:$0xff] %v5206_v51  ;;  %8054 = vst [vmem:[#allocation44_spill] sm:$0xff] %v5209_v53  ;;  %v5211_v54 = vadd.f32 %v227_v52, %v116_v61  ;;  %v5214_v1 = vadd.f32 %v340_v4, %v5164_v60 }
 0x105   :  { %8055 = vst [vmem:[#allocation45_spill] sm:$0xff] %v5211_v54  ;;  %8056 = vst [vmem:[#allocation46_spill] sm:$0xff] %v5214_v1 }
 0x106   :  { %v231_v63 = vpop.f32.mrf.mxu0  ;;  %v344_v62 = vpop.f32.mrf.mxu1 }
 0x107   :  { %v5216_v58 = vadd.f32 %v231_v63, %v112_v11  ;;  %v5219_v29 = vadd.f32 %v344_v62, %v5158_v0 }
 0x108   :  { %v233_v57 = vpop.f32.mrf.mxu0  ;;  %v346_v56 = vpop.f32.mrf.mxu1 }
 0x109   :  { %8057 = vst [vmem:[#allocation47_spill] sm:$0xff] %v5216_v58  ;;  %8058 = vst [vmem:[#allocation48_spill] sm:$0xff] %v5219_v29  ;;  %v5221_v51 = vadd.f32 %v233_v57, %v116_v61  ;;  %v5224_v3 = vadd.f32 %v346_v56, %v5164_v60  ;;  %v196_v57 = vadd.f32 %v5139_v38, %v112_v11 }
 0x10a   :  { %v198_v56 = vadd.f32 %v5148_v20, %v116_v61 }
 0x10b   :  { %8059 = vst [vmem:[#allocation49_spill] sm:$0xff] %v5221_v51  ;;  %8060 = vst [vmem:[#allocation50_spill] sm:$0xff] %v5224_v3 }
 0x10c   :  { %v237_v53 = vpop.f32.mrf.mxu0  ;;  %v350_v52 = vpop.f32.mrf.mxu1 }
 0x10d   :  { %v5226_v54 = vadd.f32 %v237_v53, %v112_v11  ;;  %v5229_v4 = vadd.f32 %v350_v52, %v5158_v0 }
 0x10e   :  { %v239_v1 = vpop.f32.mrf.mxu0  ;;  %v352_v63 = vpop.f32.mrf.mxu1 }
 0x10f   :  { %8061 = vst [vmem:[#allocation51_spill] sm:$0xff] %v5226_v54  ;;  %8062 = vst [vmem:[#allocation52_spill] sm:$0xff] %v5229_v4  ;;  %v5231_v58 = vadd.f32 %v239_v1, %v116_v61  ;;  %v5234_v62 = vadd.f32 %v352_v63, %v5164_v60  ;;  %v311_v1 = vadd.f32 %v5150_v2, %v5164_v60 }
 0x110   :  { %v309_v63 = vadd.f32 %v5141_v47, %v5158_v0 }
 0x111   :  { %8063 = vst [vmem:[#allocation53_spill] sm:$0xff] %v5231_v58  ;;  %8064 = vst [vmem:[#allocation54_spill] sm:$0xff] %v5234_v62 }
 0x112   :  { %v521_v29 = vpop.f32.mrf.mxu0  ;;  %v592_v54 = vpop.f32.mrf.mxu1 }
 0x113   :  { %v597_v3 = vadd.f32 %v521_v29, %v196_v57  ;;  %v599_v62 = vadd.f32 %v592_v54, %v309_v63  ;;  %v8068_v63 = vld [vmem:[#allocation8_spill] sm:$0xff] }
 0x114   :  { %v523_v51 = vpop.f32.mrf.mxu0  ;;  %v594_v4 = vpop.f32.mrf.mxu1 }
 0x115   :  { %v3886_v55 = vmul.f32 -1.442695, %v597_v3  ;;  %v598_v53 = vadd.f32 %v523_v51, %v198_v56  ;;  %v600_v58 = vadd.f32 %v594_v4, %v311_v1  ;;  %v8067_v1 = vld [vmem:[#allocation7_spill] sm:$0xff] }
 0x117   :  { %4004 = vpow2.f32 %v3886_v55  ;;  %v3887_v52 = vmul.f32 -1.442695, %v598_v53  ;;  %v3888_v11 = vmul.f32 -1.442695, %v600_v58  ;;  %v625_v58 = vld [vmem:[%s7784_s1] sm:$0xff] }
 0x119   :  { %4006 = vpow2.f32 %v3887_v52  ;;  %v8066_v52 = vld [vmem:[#allocation6_spill] sm:$0xff] }
 0x11a   :  { %4008 = vpow2.f32 %v3888_v11  ;;  %v8069_v11 = vld [vmem:[#allocation9_spill] sm:$0xff] }
 0x124   :  { %v4005_v38 = vpop.eup %4004 }
 0x125   :  { %v604_v61 = vadd.f32 1.0, %v4005_v38  ;;  %v8070_v38 = vld [vmem:[#allocation10_spill] sm:$0xff] }
 0x126   :  { %v4007_v20 = vpop.eup %4006 }
 0x127   :  { %4010 = vrcp.f32 %v604_v61  ;;  %v610_v51 = vadd.f32 1.0, %v4007_v20  ;;  %v4009_v55 = vpop.eup %4008  ;;  %v8071_v61 = vld [vmem:[#allocation11_spill] sm:$0xff]  ;;  %v8072_v20 = vld [vmem:[#allocation12_spill] sm:$0xff] }
 0x128   :  { %4012 = vtanh.f32 %v599_v62  ;;  %v617_v56 = vadd.f32 1.0, %v4009_v55  ;;  %v8074_v55 = vld [vmem:[#allocation14_spill] sm:$0xff] }
 0x129   :  { %4014 = vrcp.f32 %v610_v51  ;;  %v8073_v51 = vld [vmem:[#allocation13_spill] sm:$0xff] }
 0x12a   :  { %4016 = vrcp.f32 %v617_v56  ;;  %v8078_v56 = vld [vmem:[#allocation18_spill] sm:$0xff] }
 0x134   :  { %v4011_v29 = vpop.eup %4010 }
 0x135   :  { %v4013_v3 = vpop.eup %4012 }
 0x136   :  { %v4015_v57 = vpop.eup %4014  ;;  %v621_v60 = vmul.f32 %v4013_v3, %v4011_v29  ;;  %v8075_v29 = vld [vmem:[#allocation15_spill] sm:$0xff]  ;;  %v8076_v3 = vld [vmem:[#allocation16_spill] sm:$0xff] }
 0x137   :  { %v620_v2 = vmul.f32 0.0, %v4015_v57  ;;  %v4017_v54 = vpop.eup %4016  ;;  %v8077_v57 = vld [vmem:[#allocation17_spill] sm:$0xff] }
 0x139   :  { %v622_v0 = vadd.f32 %v621_v60, %v620_v2  ;;  %v8079_v2 = vld [vmem:[#allocation19_spill] sm:$0xff]  ;;  %v8080_v60 = vld [vmem:[#allocation20_spill] sm:$0xff] }
 0x13b   :  { %4018 = vtanh.f32 %v622_v0  ;;  %v5245_v47 = vmul.f32 %v625_v58, %v622_v0  ;;  %v8082_v0 = vld [vmem:[#allocation22_spill] sm:$0xff] }
 0x148   :  { %v4019_v4 = vpop.eup %4018 }
 0x149   :  { %v624_v62 = vmul.f32 %v4019_v4, %v4017_v54  ;;  %v8083_v54 = vld [vmem:[#allocation23_spill] sm:$0xff]  ;;  %v8084_v4 = vld [vmem:[#allocation24_spill] sm:$0xff] }
 0x14b   :  { %v5247_v53 = vmul.f32 %v625_v58, %v624_v62  ;;  %v8081_v58 = vld [vmem:[#allocation21_spill] sm:$0xff] }
 0x14c   :  { %v8085_v62 = vld [vmem:[#allocation25_spill] sm:$0xff] }
 0x14d   :  { %8065 = vst [vmem:[#allocation55_spill] sm:$0xff] %v5247_v53  ;;  %701 = vmatmul.mubr.f32.vlgmr.msra.gmra.mxu0 %v5247_v53  ;;  %772 = vmatmul.mubr.f32.vlgmr.msra.gmra.mxu1 %v5247_v53 }
 0x14e   :  { %822 = vmatpush1.msra.mxu0 %v4659_v5  ;;  %893 = vmatpush1.msra.mxu1 %v4664_v6 }
 0x14f   :  { %823 = vmatprep.subr.mxu0 %v4669_v7  ;;  %894 = vmatprep.subr.mxu1 %v4674_v8 }
 0x150   :  { %824 = vmatpush1.msra.mxu0 %v4683_v9  ;;  %895 = vmatpush1.msra.mxu1 %v4688_v10 }
 0x151   :  { %825 = vmatprep.subr.mxu0 %v4700_v12  ;;  %896 = vmatprep.subr.mxu1 %v4705_v13 }
 0x152   :  { %826 = vmatpush1.msra.mxu0 %v4712_v14  ;;  %897 = vmatpush1.msra.mxu1 %v4717_v15 }
 0x153   :  { %827 = vmatprep.subr.mxu0 %v4722_v16  ;;  %898 = vmatprep.subr.mxu1 %v4727_v17 }
 0x154   :  { %828 = vmatpush1.msra.mxu0 %v4736_v18  ;;  %899 = vmatpush1.msra.mxu1 %v4741_v19 }
 0x155   :  { %829 = vmatprep.subr.mxu0 %v4753_v21  ;;  %900 = vmatprep.subr.mxu1 %v4758_v22 }
 0x156   :  { %830 = vmatpush1.msra.mxu0 %v4765_v23  ;;  %901 = vmatpush1.msra.mxu1 %v4770_v24 }
 0x157   :  { %831 = vmatprep.subr.mxu0 %v4775_v25  ;;  %902 = vmatprep.subr.mxu1 %v4780_v26 }
 0x158   :  { %832 = vmatpush1.msra.mxu0 %v4789_v27  ;;  %903 = vmatpush1.msra.mxu1 %v4794_v28 }
 0x159   :  { %833 = vmatprep.subr.mxu0 %v4806_v30  ;;  %904 = vmatprep.subr.mxu1 %v4811_v31 }
 0x15a   :  { %834 = vmatpush1.msra.mxu0 %v4818_v32  ;;  %905 = vmatpush1.msra.mxu1 %v4823_v33 }
 0x15b   :  { %835 = vmatprep.subr.mxu0 %v4828_v34  ;;  %906 = vmatprep.subr.mxu1 %v4833_v35 }
 0x15c   :  { %836 = vmatpush1.msra.mxu0 %v4842_v36  ;;  %907 = vmatpush1.msra.mxu1 %v4847_v37 }
 0x15d   :  { %837 = vmatprep.subr.mxu0 %v4859_v39  ;;  %908 = vmatprep.subr.mxu1 %v4864_v40 }
 0x15e   :  { %838 = vmatpush1.msra.mxu0 %v4871_v41  ;;  %909 = vmatpush1.msra.mxu1 %v4876_v42 }
 0x15f   :  { %839 = vmatprep.subr.mxu0 %v4881_v43  ;;  %910 = vmatprep.subr.mxu1 %v4886_v44 }
 0x160   :  { %840 = vmatpush1.msra.mxu0 %v4895_v45  ;;  %911 = vmatpush1.msra.mxu1 %v4900_v46 }
 0x161   :  { %841 = vmatprep.subr.mxu0 %v4912_v48  ;;  %912 = vmatprep.subr.mxu1 %v4917_v49 }
 0x162   :  { %842 = vmatpush1.msra.mxu0 %v4924_v50  ;;  %913 = vmatpush1.msra.mxu1 %v8066_v52 }
 0x163   :  { %843 = vmatprep.subr.mxu0 %v8067_v1  ;;  %914 = vmatprep.subr.mxu1 %v8068_v63 }
 0x164   :  { %844 = vmatpush1.msra.mxu0 %v8069_v11  ;;  %915 = vmatpush1.msra.mxu1 %v8070_v38 }
 0x165   :  { %845 = vmatprep.subr.mxu0 %v8071_v61  ;;  %916 = vmatprep.subr.mxu1 %v8072_v20  ;;  %v8091_v20 = vld [vmem:[#allocation30_spill] sm:$0xff]  ;;  %v8092_v61 = vld [vmem:[#allocation28_spill] sm:$0xff] }
 0x166   :  { %846 = vmatpush1.msra.mxu0 %v8073_v51  ;;  %917 = vmatpush1.msra.mxu1 %v8074_v55 }
 0x167   :  { %847 = vmatprep.subr.mxu0 %v8075_v29  ;;  %918 = vmatprep.subr.mxu1 %v8076_v3  ;;  %v8086_v29 = vmov 0.0   ;;  %v8087_v3 = vld [vmem:[#allocation26_spill] sm:$0xff] }
 0x168   :  { %848 = vmatpush1.msra.mxu0 %v8077_v57  ;;  %919 = vmatpush1.msra.mxu1 %v8078_v56  ;;  %v8088_v56 = vld [vmem:[#allocation4_spill] sm:$0xff] }
 0x169   :  { %849 = vmatprep.subr.mxu0 %v8079_v2  ;;  %920 = vmatprep.subr.mxu1 %v8080_v60  ;;  %v8089_v2 = vld [vmem:[#allocation5_spill] sm:$0xff] }
 0x16a   :  { %850 = vmatpush1.msra.mxu0 %v8081_v58  ;;  %921 = vmatpush1.msra.mxu1 %v8082_v0 }
 0x16b   :  { %851 = vmatprep.subr.mxu0 %v8083_v54  ;;  %922 = vmatprep.subr.mxu1 %v8084_v4  ;;  %v8090_v54 = vld [vmem:[#allocation29_spill] sm:$0xff] }
 0x16c   :  { %852 = vmatpush1.msra.mxu0 %v8085_v62  ;;  %885 = vmatprep.mubr.f32.mxu0 %v8086_v29 }
 0x16d   :  { %923 = vmatpush1.msra.mxu1 %v8087_v3  ;;  %956 = vmatprep.mubr.f32.mxu1 %v8086_v29 }
 0x16e   :  { %1006 = vmatprep.subr.mxu0 %v8088_v56  ;;  %1077 = vmatprep.subr.mxu1 %v8089_v2 }
 0x20d   :  { %v702_v60 = vpop.f32.mrf.mxu0  ;;  %v773_v4 = vpop.f32.mrf.mxu1 }
 0x20e   :  { %v778_v58 = vadd.f32 %v702_v60, %v5166_v59  ;;  %v780_v29 = vadd.f32 %v773_v4, %v8092_v61  ;;  %v3892_v61 = vld [vmem:[%s7784_s1 + $0x8] sm:$0xff] }
 0x20f   :  { %v704_v0 = vpop.f32.mrf.mxu0  ;;  %v775_v51 = vpop.f32.mrf.mxu1 }
 0x210   :  { %v3889_v57 = vmul.f32 -1.442695, %v778_v58  ;;  %v779_v55 = vadd.f32 %v704_v0, %v8090_v54  ;;  %v781_v3 = vadd.f32 %v775_v51, %v8091_v20 }
 0x212   :  { %4020 = vpow2.f32 %v3889_v57  ;;  %v3890_v62 = vmul.f32 -1.442695, %v779_v55  ;;  %v3891_v38 = vmul.f32 -1.442695, %v781_v3 }
 0x214   :  { %4022 = vpow2.f32 %v3890_v62 }
 0x215   :  { %4024 = vtanh.f32 %v780_v29 }
 0x216   :  { %4026 = vpow2.f32 %v3891_v38 }
 0x21f   :  { %v4021_v56 = vpop.eup %4020 }
 0x220   :  { %v785_v11 = vadd.f32 1.0, %v4021_v56 }
 0x221   :  { %v4023_v2 = vpop.eup %4022 }
 0x222   :  { %4028 = vrcp.f32 %v785_v11  ;;  %v791_v59 = vadd.f32 1.0, %v4023_v2  ;;  %v4025_v60 = vpop.eup %4024 }
 0x223   :  { %v4027_v58 = vpop.eup %4026 }
 0x224   :  { %4030 = vrcp.f32 %v791_v59  ;;  %v798_v54 = vadd.f32 1.0, %v4027_v58 }
 0x226   :  { %4032 = vrcp.f32 %v798_v54 }
 0x22f   :  { %v4029_v57 = vpop.eup %4028 }
 0x230   :  { %v802_v0 = vmul.f32 %v4029_v57, %v4025_v60 }
 0x231   :  { %v4031_v55 = vpop.eup %4030 }
 0x232   :  { %v801_v62 = vmul.f32 %v4031_v55, %v5245_v47 }
 0x233   :  { %v4033_v29 = vpop.eup %4032 }
 0x234   :  { %v803_v20 = vadd.f32 %v802_v0, %v801_v62 }
 0x236   :  { %4034 = vtanh.f32 %v803_v20  ;;  %v808_v38 = vsub.f32 %v803_v20, %v5245_v47 }
 0x238   :  { %v809_v11 = vmul.f32 %v3892_v61, %v808_v38 }
 0x23a   :  { %v5327_v51 = vadd.f32 %v809_v11, %v5245_v47 }
 0x243   :  { %v4035_v3 = vpop.eup %4034 }
 0x244   :  { %v805_v4 = vmul.f32 %v4035_v3, %v4033_v29  ;;  %v3896_v29 = vld [vmem:[%s7784_s1 + $0x10] sm:$0xff] }
 0x246   :  { %v811_v56 = vsub.f32 %v805_v4, %v5247_v53 }
 0x248   :  { %v812_v2 = vmul.f32 %v3892_v61, %v811_v56 }
 0x24a   :  { %v5331_v59 = vadd.f32 %v812_v2, %v5247_v53  ;;  %v5624_v53 = vld [vmem:[%s7782_s4 + $0xe0] sm:$0xff] }
 0x24c   :  { %8093 = vst [vmem:[#allocation6_spill] sm:$0xff] %v5331_v59  ;;  %886 = vmatmul.mubr.f32.vlgmr.msra.gmra.mxu0 %v5331_v59  ;;  %957 = vmatmul.mubr.f32.vlgmr.msra.gmra.mxu1 %v5331_v59 }
 0x24d   :  { %1007 = vmatpush1.msra.mxu0 %v4659_v5  ;;  %1078 = vmatpush1.msra.mxu1 %v4664_v6  ;;  %v8094_v5 = vld [vmem:[#allocation9_spill] sm:$0xff]  ;;  %v8095_v6 = vld [vmem:[#allocation10_spill] sm:$0xff] }
 0x24e   :  { %1008 = vmatprep.subr.mxu0 %v4669_v7  ;;  %1079 = vmatprep.subr.mxu1 %v4674_v8  ;;  %v8096_v7 = vld [vmem:[#allocation11_spill] sm:$0xff]  ;;  %v8097_v8 = vld [vmem:[#allocation12_spill] sm:$0xff] }
 0x24f   :  { %1009 = vmatpush1.msra.mxu0 %v4683_v9  ;;  %1080 = vmatpush1.msra.mxu1 %v4688_v10  ;;  %v8098_v9 = vld [vmem:[#allocation13_spill] sm:$0xff]  ;;  %v8099_v10 = vld [vmem:[#allocation14_spill] sm:$0xff] }
 0x250   :  { %1010 = vmatprep.subr.mxu0 %v4700_v12  ;;  %1081 = vmatprep.subr.mxu1 %v4705_v13  ;;  %v8100_v12 = vld [vmem:[#allocation15_spill] sm:$0xff]  ;;  %v8101_v13 = vld [vmem:[#allocation16_spill] sm:$0xff] }
 0x251   :  { %1011 = vmatpush1.msra.mxu0 %v4712_v14  ;;  %1082 = vmatpush1.msra.mxu1 %v4717_v15  ;;  %v8102_v14 = vld [vmem:[#allocation17_spill] sm:$0xff]  ;;  %v8103_v15 = vld [vmem:[#allocation18_spill] sm:$0xff] }
 0x252   :  { %1012 = vmatprep.subr.mxu0 %v4722_v16  ;;  %1083 = vmatprep.subr.mxu1 %v4727_v17  ;;  %v8104_v16 = vld [vmem:[#allocation19_spill] sm:$0xff]  ;;  %v8105_v17 = vld [vmem:[#allocation20_spill] sm:$0xff] }
 0x253   :  { %1013 = vmatpush1.msra.mxu0 %v4736_v18  ;;  %1084 = vmatpush1.msra.mxu1 %v4741_v19  ;;  %v8106_v18 = vld [vmem:[#allocation21_spill] sm:$0xff]  ;;  %v8107_v19 = vld [vmem:[#allocation22_spill] sm:$0xff] }
 0x254   :  { %1014 = vmatprep.subr.mxu0 %v4753_v21  ;;  %1085 = vmatprep.subr.mxu1 %v4758_v22  ;;  %v8108_v21 = vld [vmem:[#allocation23_spill] sm:$0xff]  ;;  %v8109_v22 = vld [vmem:[#allocation24_spill] sm:$0xff] }
 0x255   :  { %1015 = vmatpush1.msra.mxu0 %v4765_v23  ;;  %1086 = vmatpush1.msra.mxu1 %v4770_v24  ;;  %v8110_v23 = vld [vmem:[#allocation25_spill] sm:$0xff]  ;;  %v8111_v24 = vmov 0.0  }
 0x256   :  { %1016 = vmatprep.subr.mxu0 %v4775_v25  ;;  %1087 = vmatprep.subr.mxu1 %v4780_v26  ;;  %v8112_v25 = vld [vmem:[#allocation26_spill] sm:$0xff]  ;;  %v5402_v26 = vld [vmem:[%s7782_s4 + $0x1e8] sm:$0xff] }
 0x257   :  { %1017 = vmatpush1.msra.mxu0 %v4789_v27  ;;  %1088 = vmatpush1.msra.mxu1 %v4794_v28  ;;  %8113 = vst [vmem:[#allocation7_spill] sm:$0xff] %v5402_v26  ;;  %v5408_v27 = vld [vmem:[%s7782_s4 + $0x1f8] sm:$0xff] }
 0x258   :  { %1018 = vmatprep.subr.mxu0 %v4806_v30  ;;  %1089 = vmatprep.subr.mxu1 %v4811_v31  ;;  %8114 = vst [vmem:[#allocation8_spill] sm:$0xff] %v5408_v27  ;;  %v8115_v30 = vld [vmem:[#allocation31_spill] sm:$0xff] }
 0x259   :  { %1019 = vmatpush1.msra.mxu0 %v4818_v32  ;;  %1090 = vmatpush1.msra.mxu1 %v4823_v33 }
 0x25a   :  { %1020 = vmatprep.subr.mxu0 %v4828_v34  ;;  %1091 = vmatprep.subr.mxu1 %v4833_v35  ;;  %v8116_v34 = vld [vmem:[#allocation33_spill] sm:$0xff] }
 0x25b   :  { %1021 = vmatpush1.msra.mxu0 %v4842_v36  ;;  %1092 = vmatpush1.msra.mxu1 %v4847_v37 }
 0x25c   :  { %1022 = vmatprep.subr.mxu0 %v4859_v39  ;;  %1093 = vmatprep.subr.mxu1 %v4864_v40  ;;  %v8117_v40 = vld [vmem:[#allocation34_spill] sm:$0xff] }
 0x25d   :  { %1023 = vmatpush1.msra.mxu0 %v4871_v41  ;;  %1094 = vmatpush1.msra.mxu1 %v4876_v42  ;;  %v8118_v42 = vld [vmem:[#allocation32_spill] sm:$0xff] }
 0x25e   :  { %1024 = vmatprep.subr.mxu0 %v4881_v43  ;;  %1095 = vmatprep.subr.mxu1 %v4886_v44 }
 0x25f   :  { %1025 = vmatpush1.msra.mxu0 %v4895_v45  ;;  %1096 = vmatpush1.msra.mxu1 %v4900_v46 }
 0x260   :  { %1026 = vmatprep.subr.mxu0 %v4912_v48  ;;  %1097 = vmatprep.subr.mxu1 %v4917_v49 }
 0x261   :  { %1027 = vmatpush1.msra.mxu0 %v4924_v50  ;;  %1098 = vmatpush1.msra.mxu1 %v8066_v52 }
 0x262   :  { %1028 = vmatprep.subr.mxu0 %v8067_v1  ;;  %1099 = vmatprep.subr.mxu1 %v8068_v63 }
 0x263   :  { %1029 = vmatpush1.msra.mxu0 %v8094_v5  ;;  %1100 = vmatpush1.msra.mxu1 %v8095_v6 }
 0x264   :  { %1030 = vmatprep.subr.mxu0 %v8096_v7  ;;  %1101 = vmatprep.subr.mxu1 %v8097_v8 }
 0x265   :  { %1031 = vmatpush1.msra.mxu0 %v8098_v9  ;;  %1102 = vmatpush1.msra.mxu1 %v8099_v10 }
 0x266   :  { %1032 = vmatprep.subr.mxu0 %v8100_v12  ;;  %1103 = vmatprep.subr.mxu1 %v8101_v13 }
 0x267   :  { %1033 = vmatpush1.msra.mxu0 %v8102_v14  ;;  %1104 = vmatpush1.msra.mxu1 %v8103_v15 }
 0x268   :  { %1034 = vmatprep.subr.mxu0 %v8104_v16  ;;  %1105 = vmatprep.subr.mxu1 %v8105_v17 }
 0x269   :  { %1035 = vmatpush1.msra.mxu0 %v8106_v18  ;;  %1106 = vmatpush1.msra.mxu1 %v8107_v19 }
 0x26a   :  { %1036 = vmatprep.subr.mxu0 %v8108_v21  ;;  %1107 = vmatprep.subr.mxu1 %v8109_v22 }
 0x26b   :  { %1037 = vmatpush1.msra.mxu0 %v8110_v23  ;;  %1070 = vmatprep.mubr.f32.mxu0 %v8111_v24 }
 0x26c   :  { %1108 = vmatpush1.msra.mxu1 %v8112_v25  ;;  %1141 = vmatprep.mubr.f32.mxu1 %v8111_v24 }
 0x26d   :  { %1191 = vmatprep.subr.mxu0 %v5402_v26  ;;  %1262 = vmatprep.subr.mxu1 %v5408_v27 }
 0x30c   :  { %v887_v28 = vpop.f32.mrf.mxu0  ;;  %v958_v36 = vpop.f32.mrf.mxu1 }
 0x30d   :  { %v963_v31 = vadd.f32 %v887_v28, %v8115_v30  ;;  %v965_v43 = vadd.f32 %v958_v36, %v8118_v42  ;;  %v5450_v36 = vld [vmem:[%s7782_s4 + $0x1d8] sm:$0xff]  ;;  %v5480_v42 = vld [vmem:[%s7782_s4 + $0x1a0] sm:$0xff] }
 0x30e   :  { %v889_v32 = vpop.f32.mrf.mxu0  ;;  %v960_v39 = vpop.f32.mrf.mxu1 }
 0x30f   :  { %v3893_v33 = vmul.f32 -1.442695, %v963_v31  ;;  %v964_v35 = vadd.f32 %v889_v32, %v8116_v34  ;;  %v966_v41 = vadd.f32 %v960_v39, %v8117_v40  ;;  %v5432_v34 = vld [vmem:[%s7782_s4 + $0x1e0] sm:$0xff]  ;;  %v5462_v39 = vld [vmem:[%s7782_s4 + $0x1d0] sm:$0xff]  ;;  %v5468_v40 = vld [vmem:[%s7782_s4 + $0x1a8] sm:$0xff] }
 0x311   :  { %4036 = vpow2.f32 %v3893_v33  ;;  %v3894_v37 = vmul.f32 -1.442695, %v964_v35  ;;  %v3895_v44 = vmul.f32 -1.442695, %v966_v41  ;;  %v5444_v35 = vld [vmem:[%s7782_s4 + $0x1c8] sm:$0xff]  ;;  %v5474_v41 = vld [vmem:[%s7782_s4 + $0x1b8] sm:$0xff] }
 0x313   :  { %4038 = vpow2.f32 %v3894_v37  ;;  %v5456_v37 = vld [vmem:[%s7782_s4 + $0x1c0] sm:$0xff] }
 0x314   :  { %4040 = vtanh.f32 %v965_v43  ;;  %v5486_v43 = vld [vmem:[%s7782_s4 + $0x1b0] sm:$0xff] }
 0x315   :  { %4042 = vpow2.f32 %v3895_v44  ;;  %v5492_v44 = vld [vmem:[%s7782_s4 + $0x188] sm:$0xff] }
 0x31e   :  { %v4037_v47 = vpop.eup %4036 }
 0x31f   :  { %v970_v60 = vadd.f32 1.0, %v4037_v47  ;;  %v5498_v47 = vld [vmem:[%s7782_s4 + $0x198] sm:$0xff] }
 0x320   :  { %v4039_v58 = vpop.eup %4038 }
 0x321   :  { %4044 = vrcp.f32 %v970_v60  ;;  %v976_v57 = vadd.f32 1.0, %v4039_v58  ;;  %v4041_v0 = vpop.eup %4040  ;;  %v5504_v60 = vld [vmem:[%s7782_s4 + $0x180] sm:$0xff]  ;;  %v5510_v58 = vld [vmem:[%s7782_s4 + $0x190] sm:$0xff] }
 0x322   :  { %v4043_v55 = vpop.eup %4042 }
 0x323   :  { %4046 = vrcp.f32 %v976_v57  ;;  %v983_v61 = vadd.f32 1.0, %v4043_v55  ;;  %v5516_v57 = vld [vmem:[%s7782_s4 + $0x168] sm:$0xff]  ;;  %v5528_v55 = vld [vmem:[%s7782_s4 + $0x160] sm:$0xff] }
 0x325   :  { %4048 = vrcp.f32 %v983_v61  ;;  %v5552_v61 = vld [vmem:[%s7782_s4 + $0x140] sm:$0xff] }
 0x32e   :  { %v4045_v54 = vpop.eup %4044 }
 0x32f   :  { %v987_v62 = vmul.f32 %v4045_v54, %v4041_v0  ;;  %v5522_v0 = vld [vmem:[%s7782_s4 + $0x178] sm:$0xff]  ;;  %v5534_v54 = vld [vmem:[%s7782_s4 + $0x170] sm:$0xff] }
 0x330   :  { %v4047_v20 = vpop.eup %4046 }
 0x331   :  { %v986_v38 = vmul.f32 %v4047_v20, %v5327_v51  ;;  %v5546_v20 = vld [vmem:[%s7782_s4 + $0x158] sm:$0xff] }
 0x332   :  { %v4049_v2 = vpop.eup %4048 }
 0x333   :  { %v988_v11 = vadd.f32 %v987_v62, %v986_v38  ;;  %v5540_v62 = vld [vmem:[%s7782_s4 + $0x148] sm:$0xff]  ;;  %v5558_v38 = vld [vmem:[%s7782_s4 + $0x150] sm:$0xff] }
 0x335   :  { %4050 = vtanh.f32 %v988_v11  ;;  %v993_v3 = vsub.f32 %v988_v11, %v5327_v51  ;;  %v5564_v11 = vld [vmem:[%s7782_s4 + $0x128] sm:$0xff] }
 0x337   :  { %v994_v4 = vmul.f32 %v3896_v29, %v993_v3  ;;  %v5576_v3 = vld [vmem:[%s7782_s4 + $0x120] sm:$0xff] }
 0x339   :  { %v5421_v56 = vadd.f32 %v994_v4, %v5327_v51  ;;  %v5438_v51 = vld [vmem:[%s7782_s4 + $0x1f0] sm:$0xff] }
 0x33a   :  { %v5582_v4 = vld [vmem:[%s7782_s4 + $0x130] sm:$0xff] }
 0x342   :  { %v4051_v28 = vpop.eup %4050 }
 0x343   :  { %v990_v30 = vmul.f32 %v4051_v28, %v4049_v2  ;;  %v5588_v2 = vld [vmem:[%s7782_s4 + $0x108] sm:$0xff]  ;;  %v5594_v28 = vld [vmem:[%s7782_s4 + $0x118] sm:$0xff] }
 0x345   :  { %v996_v31 = vsub.f32 %v990_v30, %v5331_v59  ;;  %v5600_v30 = vld [vmem:[%s7782_s4 + $0x100] sm:$0xff] }
 0x347   :  { %v997_v32 = vmul.f32 %v3896_v29, %v996_v31  ;;  %v5570_v29 = vld [vmem:[%s7782_s4 + $0x138] sm:$0xff]  ;;  %v5606_v31 = vld [vmem:[%s7782_s4 + $0x110] sm:$0xff] }
 0x348   :  { %8120 = vst [vmem:[#allocation5_spill] sm:$0xff] %v5606_v31 }
 0x349   :  { %v5425_v33 = vadd.f32 %v997_v32, %v5331_v59  ;;  %v5612_v32 = vld [vmem:[%s7782_s4 + $0xe8] sm:$0xff]  ;;  %v5618_v59 = vld [vmem:[%s7782_s4 + $0xf8] sm:$0xff] }
 0x34a   :  { %8121 = vst [vmem:[#allocation29_spill] sm:$0xff] %v5612_v32  ;;  %8122 = vst [vmem:[#allocation30_spill] sm:$0xff] %v5618_v59 }
 0x34b   :  { %8119 = vst [vmem:[#allocation4_spill] sm:$0xff] %v5425_v33  ;;  %1071 = vmatmul.mubr.f32.vlgmr.msra.gmra.mxu0 %v5425_v33  ;;  %1142 = vmatmul.mubr.f32.vlgmr.msra.gmra.mxu1 %v5425_v33 }
 0x34c   :  { %1192 = vmatpush1.msra.mxu0 %v5432_v34  ;;  %1263 = vmatpush1.msra.mxu1 %v5438_v51 }
 0x34d   :  { %1193 = vmatprep.subr.mxu0 %v5444_v35  ;;  %1264 = vmatprep.subr.mxu1 %v5450_v36 }
 0x34e   :  { %1194 = vmatpush1.msra.mxu0 %v5456_v37  ;;  %1265 = vmatpush1.msra.mxu1 %v5462_v39 }
 0x34f   :  { %1195 = vmatprep.subr.mxu0 %v5468_v40  ;;  %1266 = vmatprep.subr.mxu1 %v5474_v41 }
 0x350   :  { %1196 = vmatpush1.msra.mxu0 %v5480_v42  ;;  %1267 = vmatpush1.msra.mxu1 %v5486_v43 }
 0x351   :  { %1197 = vmatprep.subr.mxu0 %v5492_v44  ;;  %1268 = vmatprep.subr.mxu1 %v5498_v47 }
 0x352   :  { %1198 = vmatpush1.msra.mxu0 %v5504_v60  ;;  %1269 = vmatpush1.msra.mxu1 %v5510_v58 }
 0x353   :  { %1199 = vmatprep.subr.mxu0 %v5516_v57  ;;  %1270 = vmatprep.subr.mxu1 %v5522_v0 }
 0x354   :  { %1200 = vmatpush1.msra.mxu0 %v5528_v55  ;;  %1271 = vmatpush1.msra.mxu1 %v5534_v54 }
 0x355   :  { %1201 = vmatprep.subr.mxu0 %v5540_v62  ;;  %1272 = vmatprep.subr.mxu1 %v5546_v20 }
 0x356   :  { %1202 = vmatpush1.msra.mxu0 %v5552_v61  ;;  %1273 = vmatpush1.msra.mxu1 %v5558_v38 }
 0x357   :  { %1203 = vmatprep.subr.mxu0 %v5564_v11  ;;  %1274 = vmatprep.subr.mxu1 %v5570_v29 }
 0x358   :  { %1204 = vmatpush1.msra.mxu0 %v5576_v3  ;;  %1275 = vmatpush1.msra.mxu1 %v5582_v4 }
 0x359   :  { %1205 = vmatprep.subr.mxu0 %v5588_v2  ;;  %1276 = vmatprep.subr.mxu1 %v5594_v28 }
 0x35a   :  { %1206 = vmatpush1.msra.mxu0 %v5600_v30  ;;  %1277 = vmatpush1.msra.mxu1 %v5606_v31  ;;  %v5630_v31 = vld [vmem:[%s7782_s4 + $0xf0] sm:$0xff] }
 0x35b   :  { %1207 = vmatprep.subr.mxu0 %v5612_v32  ;;  %1278 = vmatprep.subr.mxu1 %v5618_v59  ;;  %v5636_v32 = vld [vmem:[%s7782_s4 + $0xc8] sm:$0xff]  ;;  %v5642_v59 = vld [vmem:[%s7782_s4 + $0xd8] sm:$0xff] }
 0x35c   :  { %1208 = vmatpush1.msra.mxu0 %v5624_v53  ;;  %1279 = vmatpush1.msra.mxu1 %v5630_v31 }
 0x35d   :  { %1209 = vmatprep.subr.mxu0 %v5636_v32  ;;  %1280 = vmatprep.subr.mxu1 %v5642_v59 }
 0x35e   :  { %1210 = vmatpush1.msra.mxu0 %v4895_v45  ;;  %1281 = vmatpush1.msra.mxu1 %v4900_v46  ;;  %v8123_v46 = vld [vmem:[#allocation35_spill] sm:$0xff] }
 0x35f   :  { %1211 = vmatprep.subr.mxu0 %v4912_v48  ;;  %1282 = vmatprep.subr.mxu1 %v4917_v49 }
 0x360   :  { %1212 = vmatpush1.msra.mxu0 %v4924_v50  ;;  %1283 = vmatpush1.msra.mxu1 %v8066_v52  ;;  %v8124_v52 = vld [vmem:[#allocation37_spill] sm:$0xff] }
 0x361   :  { %1213 = vmatprep.subr.mxu0 %v8067_v1  ;;  %1284 = vmatprep.subr.mxu1 %v8068_v63 }
 0x362   :  { %1214 = vmatpush1.msra.mxu0 %v8094_v5  ;;  %1285 = vmatpush1.msra.mxu1 %v8095_v6 }
 0x363   :  { %1215 = vmatprep.subr.mxu0 %v8096_v7  ;;  %1286 = vmatprep.subr.mxu1 %v8097_v8  ;;  %v8125_v7 = vld [vmem:[#allocation38_spill] sm:$0xff] }
 0x364   :  { %1216 = vmatpush1.msra.mxu0 %v8098_v9  ;;  %1287 = vmatpush1.msra.mxu1 %v8099_v10  ;;  %v8126_v9 = vld [vmem:[#allocation36_spill] sm:$0xff] }
 0x365   :  { %1217 = vmatprep.subr.mxu0 %v8100_v12  ;;  %1288 = vmatprep.subr.mxu1 %v8101_v13 }
 0x366   :  { %1218 = vmatpush1.msra.mxu0 %v8102_v14  ;;  %1289 = vmatpush1.msra.mxu1 %v8103_v15 }
 0x367   :  { %1219 = vmatprep.subr.mxu0 %v8104_v16  ;;  %1290 = vmatprep.subr.mxu1 %v8105_v17 }
 0x368   :  { %1220 = vmatpush1.msra.mxu0 %v8106_v18  ;;  %1291 = vmatpush1.msra.mxu1 %v8107_v19 }
 0x369   :  { %1221 = vmatprep.subr.mxu0 %v8108_v21  ;;  %1292 = vmatprep.subr.mxu1 %v8109_v22 }
 0x36a   :  { %1222 = vmatpush1.msra.mxu0 %v8110_v23  ;;  %1255 = vmatprep.mubr.f32.mxu0 %v8111_v24 }
 0x36b   :  { %1293 = vmatpush1.msra.mxu1 %v8112_v25  ;;  %1326 = vmatprep.mubr.f32.mxu1 %v8111_v24 }
 0x36c   :  { %1376 = vmatprep.subr.mxu0 %v5402_v26  ;;  %1447 = vmatprep.subr.mxu1 %v5408_v27 }
 0x40b   :  { %v1072_v45 = vpop.f32.mrf.mxu0  ;;  %v1143_v63 = vpop.f32.mrf.mxu1 }
 0x40c   :  { %v1148_v48 = vadd.f32 %v1072_v45, %v8123_v46  ;;  %v1150_v10 = vadd.f32 %v1143_v63, %v8126_v9  ;;  %v3900_v46 = vld [vmem:[%s7784_s1 + $0x18] sm:$0xff]  ;;  %v8130_v9 = vld [vmem:[#allocation30_spill] sm:$0xff] }
 0x40d   :  { %v1074_v49 = vpop.f32.mrf.mxu0  ;;  %v1145_v6 = vpop.f32.mrf.mxu1 }
 0x40e   :  { %v3897_v50 = vmul.f32 -1.442695, %v1148_v48  ;;  %v1149_v1 = vadd.f32 %v1074_v49, %v8124_v52  ;;  %v1151_v8 = vadd.f32 %v1145_v6, %v8125_v7 }
 0x410   :  { %4052 = vpow2.f32 %v3897_v50  ;;  %v3898_v5 = vmul.f32 -1.442695, %v1149_v1  ;;  %v3899_v12 = vmul.f32 -1.442695, %v1151_v8  ;;  %v8129_v8 = vld [vmem:[#allocation29_spill] sm:$0xff] }
 0x412   :  { %4054 = vpow2.f32 %v3898_v5 }
 0x413   :  { %4056 = vtanh.f32 %v1150_v10  ;;  %v5732_v10 = vld [vmem:[%s7782_s4 + $0xc0] sm:$0xff] }
 0x414   :  { %4058 = vpow2.f32 %v3899_v12  ;;  %v5738_v12 = vld [vmem:[%s7782_s4 + $0xd0] sm:$0xff] }
 0x41d   :  { %v4053_v13 = vpop.eup %4052 }
 0x41e   :  { %v1155_v14 = vadd.f32 1.0, %v4053_v13  ;;  %v5744_v13 = vld [vmem:[%s7782_s4 + $0xa8] sm:$0xff] }
 0x41f   :  { %v4055_v15 = vpop.eup %4054 }
 0x420   :  { %4060 = vrcp.f32 %v1155_v14  ;;  %v1161_v16 = vadd.f32 1.0, %v4055_v15  ;;  %v4057_v17 = vpop.eup %4056  ;;  %v5750_v14 = vld [vmem:[%s7782_s4 + $0xb8] sm:$0xff]  ;;  %v5756_v15 = vld [vmem:[%s7782_s4 + $0xa0] sm:$0xff] }
 0x421   :  { %v4059_v18 = vpop.eup %4058 }
 0x422   :  { %4062 = vrcp.f32 %v1161_v16  ;;  %v1168_v23 = vadd.f32 1.0, %v4059_v18  ;;  %v5762_v16 = vld [vmem:[%s7782_s4 + $0xb0] sm:$0xff]  ;;  %v5774_v18 = vld [vmem:[%s7782_s4 + $0x98] sm:$0xff] }
 0x424   :  { %4064 = vrcp.f32 %v1168_v23  ;;  %v5798_v23 = vld [vmem:[%s7782_s4 + $0x78] sm:$0xff] }
 0x425   :  { %8134 = vst [vmem:[#allocation12_spill] sm:$0xff] %v5798_v23 }
 0x42d   :  { %v4061_v19 = vpop.eup %4060 }
 0x42e   :  { %v1172_v21 = vmul.f32 %v4061_v19, %v4057_v17  ;;  %v5768_v17 = vld [vmem:[%s7782_s4 + $0x88] sm:$0xff]  ;;  %v5780_v19 = vld [vmem:[%s7782_s4 + $0x80] sm:$0xff] }
 0x42f   :  { %v4063_v22 = vpop.eup %4062  ;;  %8131 = vst [vmem:[#allocation9_spill] sm:$0xff] %v5780_v19 }
 0x430   :  { %v1171_v25 = vmul.f32 %v4063_v22, %v5421_v56  ;;  %v5792_v22 = vld [vmem:[%s7782_s4 + $0x68] sm:$0xff] }
 0x431   :  { %v4065_v52 = vpop.eup %4064  ;;  %8133 = vst [vmem:[#allocation11_spill] sm:$0xff] %v5792_v22 }
 0x432   :  { %v1173_v45 = vadd.f32 %v1172_v21, %v1171_v25  ;;  %v5786_v21 = vld [vmem:[%s7782_s4 + $0x90] sm:$0xff]  ;;  %v5804_v25 = vld [vmem:[%s7782_s4 + $0x60] sm:$0xff] }
 0x433   :  { %8132 = vst [vmem:[#allocation10_spill] sm:$0xff] %v5786_v21  ;;  %8135 = vst [vmem:[#allocation13_spill] sm:$0xff] %v5804_v25 }
 0x434   :  { %4066 = vtanh.f32 %v1173_v45  ;;  %v1178_v48 = vsub.f32 %v1173_v45, %v5421_v56  ;;  %v5810_v45 = vld [vmem:[%s7782_s4 + $0x70] sm:$0xff] }
 0x435   :  { %8136 = vst [vmem:[#allocation14_spill] sm:$0xff] %v5810_v45 }
 0x436   :  { %v1179_v49 = vmul.f32 %v3900_v46, %v1178_v48  ;;  %v5822_v48 = vld [vmem:[%s7782_s4 + $0x58] sm:$0xff] }
 0x437   :  { %8138 = vst [vmem:[#allocation16_spill] sm:$0xff] %v5822_v48 }
 0x438   :  { %v5685_v50 = vadd.f32 %v1179_v49, %v5421_v56  ;;  %v8128_v56 = vld [vmem:[#allocation5_spill] sm:$0xff]  ;;  %v5828_v49 = vld [vmem:[%s7782_s4 + $0x40] sm:$0xff] }
 0x439   :  { %8139 = vst [vmem:[#allocation17_spill] sm:$0xff] %v5828_v49 }
 0x441   :  { %v4067_v1 = vpop.eup %4066 }
 0x442   :  { %v1175_v63 = vmul.f32 %v4067_v1, %v4065_v52  ;;  %v5834_v52 = vld [vmem:[%s7782_s4 + $0x50] sm:$0xff]  ;;  %v5840_v1 = vld [vmem:[%s7782_s4 + $0x28] sm:$0xff] }
 0x443   :  { %8140 = vst [vmem:[#allocation18_spill] sm:$0xff] %v5834_v52  ;;  %8141 = vst [vmem:[#allocation19_spill] sm:$0xff] %v5840_v1 }
 0x444   :  { %v1181_v5 = vsub.f32 %v1175_v63, %v5425_v33  ;;  %v5846_v63 = vld [vmem:[%s7782_s4 + $0x38] sm:$0xff] }
 0x445   :  { %8142 = vst [vmem:[#allocation20_spill] sm:$0xff] %v5846_v63 }
 0x446   :  { %v1182_v6 = vmul.f32 %v3900_v46, %v1181_v5  ;;  %v5816_v46 = vld [vmem:[%s7782_s4 + $0x48] sm:$0xff]  ;;  %v5852_v5 = vld [vmem:[%s7782_s4 + $0x20] sm:$0xff] }
 0x447   :  { %8137 = vst [vmem:[#allocation15_spill] sm:$0xff] %v5816_v46  ;;  %8143 = vst [vmem:[#allocation21_spill] sm:$0xff] %v5852_v5 }
 0x448   :  { %v5689_v7 = vadd.f32 %v1182_v6, %v5425_v33  ;;  %v5858_v6 = vld [vmem:[%s7782_s4 + $0x30] sm:$0xff]  ;;  %v5864_v33 = vld [vmem:[%s7782_s4 + $0x8] sm:$0xff] }
 0x449   :  { %8144 = vst [vmem:[#allocation22_spill] sm:$0xff] %v5858_v6  ;;  %8145 = vst [vmem:[#allocation23_spill] sm:$0xff] %v5864_v33 }
 0x44a   :  { %8127 = vst [vmem:[#allocation28_spill] sm:$0xff] %v5689_v7  ;;  %1256 = vmatmul.mubr.f32.vlgmr.msra.gmra.mxu0 %v5689_v7  ;;  %1327 = vmatmul.mubr.f32.vlgmr.msra.gmra.mxu1 %v5689_v7 }
 0x44b   :  { %1377 = vmatpush1.msra.mxu0 %v5432_v34  ;;  %1448 = vmatpush1.msra.mxu1 %v5438_v51 }
 0x44c   :  { %1378 = vmatprep.subr.mxu0 %v5444_v35  ;;  %1449 = vmatprep.subr.mxu1 %v5450_v36 }
 0x44d   :  { %1379 = vmatpush1.msra.mxu0 %v5456_v37  ;;  %1450 = vmatpush1.msra.mxu1 %v5462_v39 }
 0x44e   :  { %1380 = vmatprep.subr.mxu0 %v5468_v40  ;;  %1451 = vmatprep.subr.mxu1 %v5474_v41 }
 0x44f   :  { %1381 = vmatpush1.msra.mxu0 %v5480_v42  ;;  %1452 = vmatpush1.msra.mxu1 %v5486_v43 }
 0x450   :  { %1382 = vmatprep.subr.mxu0 %v5492_v44  ;;  %1453 = vmatprep.subr.mxu1 %v5498_v47 }
 0x451   :  { %1383 = vmatpush1.msra.mxu0 %v5504_v60  ;;  %1454 = vmatpush1.msra.mxu1 %v5510_v58 }
 0x452   :  { %1384 = vmatprep.subr.mxu0 %v5516_v57  ;;  %1455 = vmatprep.subr.mxu1 %v5522_v0 }
 0x453   :  { %1385 = vmatpush1.msra.mxu0 %v5528_v55  ;;  %1456 = vmatpush1.msra.mxu1 %v5534_v54 }
 0x454   :  { %1386 = vmatprep.subr.mxu0 %v5540_v62  ;;  %1457 = vmatprep.subr.mxu1 %v5546_v20 }
 0x455   :  { %1387 = vmatpush1.msra.mxu0 %v5552_v61  ;;  %1458 = vmatpush1.msra.mxu1 %v5558_v38 }
 0x456   :  { %1388 = vmatprep.subr.mxu0 %v5564_v11  ;;  %1459 = vmatprep.subr.mxu1 %v5570_v29 }
 0x457   :  { %1389 = vmatpush1.msra.mxu0 %v5576_v3  ;;  %1460 = vmatpush1.msra.mxu1 %v5582_v4 }
 0x458   :  { %1390 = vmatprep.subr.mxu0 %v5588_v2  ;;  %1461 = vmatprep.subr.mxu1 %v5594_v28 }
 0x459   :  { %1391 = vmatpush1.msra.mxu0 %v5600_v30  ;;  %1462 = vmatpush1.msra.mxu1 %v8128_v56 }
 0x45a   :  { %1392 = vmatprep.subr.mxu0 %v8129_v8  ;;  %1463 = vmatprep.subr.mxu1 %v8130_v9 }
 0x45b   :  { %1393 = vmatpush1.msra.mxu0 %v5624_v53  ;;  %1464 = vmatpush1.msra.mxu1 %v5630_v31 }
 0x45c   :  { %1394 = vmatprep.subr.mxu0 %v5636_v32  ;;  %1465 = vmatprep.subr.mxu1 %v5642_v59 }
 0x45d   :  { %1395 = vmatpush1.msra.mxu0 %v5732_v10  ;;  %1466 = vmatpush1.msra.mxu1 %v5738_v12 }
 0x45e   :  { %1396 = vmatprep.subr.mxu0 %v5744_v13  ;;  %1467 = vmatprep.subr.mxu1 %v5750_v14 }
 0x45f   :  { %1397 = vmatpush1.msra.mxu0 %v5756_v15  ;;  %1468 = vmatpush1.msra.mxu1 %v5762_v16 }
 0x460   :  { %1398 = vmatprep.subr.mxu0 %v5768_v17  ;;  %1469 = vmatprep.subr.mxu1 %v5774_v18 }
 0x461   :  { %1399 = vmatpush1.msra.mxu0 %v5780_v19  ;;  %1470 = vmatpush1.msra.mxu1 %v5786_v21 }
 0x462   :  { %1400 = vmatprep.subr.mxu0 %v5792_v22  ;;  %1471 = vmatprep.subr.mxu1 %v5798_v23  ;;  %v8151_v23 = vld [vmem:[#allocation42_spill] sm:$0xff]  ;;  %v8152_v22 = vld [vmem:[#allocation40_spill] sm:$0xff] }
 0x463   :  { %1401 = vmatpush1.msra.mxu0 %v5804_v25  ;;  %1472 = vmatpush1.msra.mxu1 %v5810_v45 }
 0x464   :  { %1402 = vmatprep.subr.mxu0 %v5816_v46  ;;  %1473 = vmatprep.subr.mxu1 %v5822_v48 }
 0x465   :  { %1403 = vmatpush1.msra.mxu0 %v5828_v49  ;;  %1474 = vmatpush1.msra.mxu1 %v5834_v52  ;;  %v8150_v49 = vld [vmem:[#allocation41_spill] sm:$0xff] }
 0x466   :  { %1404 = vmatprep.subr.mxu0 %v5840_v1  ;;  %1475 = vmatprep.subr.mxu1 %v5846_v63  ;;  %v5870_v63 = vld [vmem:[%s7782_s4 + $0x18] sm:$0xff] }
 0x467   :  { %1405 = vmatpush1.msra.mxu0 %v5852_v5  ;;  %1476 = vmatpush1.msra.mxu1 %v5858_v6  ;;  %8146 = vst [vmem:[#allocation24_spill] sm:$0xff] %v5870_v63  ;;  %v5876_v5 = vld [vmem:[%s7782_s4] sm:$0xff]  ;;  %v8149_v6 = vld [vmem:[#allocation39_spill] sm:$0xff] }
 0x468   :  { %1406 = vmatprep.subr.mxu0 %v5864_v33  ;;  %1477 = vmatprep.subr.mxu1 %v5870_v63  ;;  %8147 = vst [vmem:[#allocation25_spill] sm:$0xff] %v5876_v5  ;;  %v5883_v33 = vld [vmem:[%s7782_s4 + $0x10] sm:$0xff] }
 0x469   :  { %1407 = vmatpush1.msra.mxu0 %v5876_v5  ;;  %1440 = vmatprep.mubr.f32.mxu0 %v8111_v24  ;;  %8148 = vst [vmem:[#allocation26_spill] sm:$0xff] %v5883_v33 }
 0x46a   :  { %1478 = vmatpush1.msra.mxu1 %v5883_v33  ;;  %1511 = vmatprep.mubr.f32.mxu1 %v8111_v24 }
 0x46b   :  { %1561 = vmatprep.subr.mxu0 %v5402_v26  ;;  %1632 = vmatprep.subr.mxu1 %v5408_v27 }
 0x50a   :  { %v1257_v63 = vpop.f32.mrf.mxu0  ;;  %v1328_v46 = vpop.f32.mrf.mxu1 }
 0x50b   :  { %v1333_v1 = vadd.f32 %v1257_v63, %v8149_v6  ;;  %v1335_v24 = vadd.f32 %v1328_v46, %v8152_v22 }
 0x50c   :  { %v1259_v52 = vpop.f32.mrf.mxu0  ;;  %v1330_v25 = vpop.f32.mrf.mxu1 }
 0x50d   :  { %v3901_v5 = vmul.f32 -1.442695, %v1333_v1  ;;  %v1334_v48 = vadd.f32 %v1259_v52, %v8150_v49  ;;  %v1336_v33 = vadd.f32 %v1330_v25, %v8151_v23 }
 0x50f   :  { %4068 = vpow2.f32 %v3901_v5  ;;  %v3902_v45 = vmul.f32 -1.442695, %v1334_v48  ;;  %v3903_v21 = vmul.f32 -1.442695, %v1336_v33 }
 0x511   :  { %4070 = vpow2.f32 %v3902_v45 }
 0x512   :  { %4072 = vtanh.f32 %v1335_v24 }
 0x513   :  { %4074 = vpow2.f32 %v3903_v21 }
 0x51c   :  { %v4069_v26 = vpop.eup %4068 }
 0x51d   :  { %v1340_v19 = vadd.f32 1.0, %v4069_v26  ;;  %v3904_v26 = vld [vmem:[%s7784_s1 + $0x20] sm:$0xff] }
 0x51e   :  { %v4071_v27 = vpop.eup %4070 }
 0x51f   :  { %4076 = vrcp.f32 %v1340_v19  ;;  %v1346_v63 = vadd.f32 1.0, %v4071_v27  ;;  %v4073_v1 = vpop.eup %4072 }
 0x520   :  { %v4075_v49 = vpop.eup %4074 }
 0x521   :  { %4078 = vrcp.f32 %v1346_v63  ;;  %v1353_v45 = vadd.f32 1.0, %v4075_v49  ;;  %v8155_v49 = vld [vmem:[#allocation11_spill] sm:$0xff] }
 0x523   :  { %4080 = vrcp.f32 %v1353_v45  ;;  %v8159_v45 = vld [vmem:[#allocation15_spill] sm:$0xff] }
 0x52c   :  { %v4077_v52 = vpop.eup %4076 }
 0x52d   :  { %v1357_v5 = vmul.f32 %v4077_v52, %v4073_v1  ;;  %v8154_v1 = vld [vmem:[#allocation10_spill] sm:$0xff]  ;;  %v8156_v52 = vld [vmem:[#allocation12_spill] sm:$0xff] }
 0x52e   :  { %v4079_v48 = vpop.eup %4078 }
 0x52f   :  { %v1356_v6 = vmul.f32 %v4079_v48, %v5685_v50  ;;  %v8158_v48 = vld [vmem:[#allocation14_spill] sm:$0xff] }
 0x530   :  { %v4081_v19 = vpop.eup %4080 }
 0x531   :  { %v1358_v23 = vadd.f32 %v1357_v5, %v1356_v6  ;;  %v8157_v5 = vld [vmem:[#allocation13_spill] sm:$0xff]  ;;  %v8160_v6 = vld [vmem:[#allocation16_spill] sm:$0xff] }
 0x533   :  { %4082 = vtanh.f32 %v1358_v23  ;;  %v1363_v24 = vsub.f32 %v1358_v23, %v5685_v50  ;;  %v8161_v23 = vld [vmem:[#allocation17_spill] sm:$0xff] }
 0x535   :  { %v1364_v33 = vmul.f32 %v3904_v26, %v1363_v24  ;;  %v8163_v24 = vld [vmem:[#allocation19_spill] sm:$0xff] }
 0x537   :  { %v5899_v27 = vadd.f32 %v1364_v33, %v5685_v50  ;;  %v8153_v50 = vld [vmem:[#allocation9_spill] sm:$0xff]  ;;  %v8164_v33 = vld [vmem:[#allocation20_spill] sm:$0xff] }
 0x540   :  { %v4083_v21 = vpop.eup %4082 }
 0x541   :  { %v1360_v22 = vmul.f32 %v4083_v21, %v4081_v19  ;;  %v8165_v19 = vld [vmem:[#allocation21_spill] sm:$0xff]  ;;  %v8166_v21 = vld [vmem:[#allocation22_spill] sm:$0xff] }
 0x543   :  { %v1366_v25 = vsub.f32 %v1360_v22, %v5689_v7  ;;  %v8167_v22 = vld [vmem:[#allocation23_spill] sm:$0xff] }
 0x545   :  { %v1367_v46 = vmul.f32 %v3904_v26, %v1366_v25  ;;  %v8162_v26 = vld [vmem:[#allocation18_spill] sm:$0xff]  ;;  %v8168_v25 = vld [vmem:[#allocation24_spill] sm:$0xff] }
 0x547   :  { %v5903_v63 = vadd.f32 %v1367_v46, %v5689_v7  ;;  %v8169_v46 = vld [vmem:[#allocation25_spill] sm:$0xff]  ;;  %v8170_v7 = vmov 0.0  }
 0x549   :  { %1441 = vmatmul.mubr.f32.vlgmr.msra.gmra.mxu0 %v5903_v63  ;;  %1512 = vmatmul.mubr.f32.vlgmr.msra.gmra.mxu1 %v5903_v63 }
 0x54a   :  { %1562 = vmatpush1.msra.mxu0 %v5432_v34  ;;  %1633 = vmatpush1.msra.mxu1 %v5438_v51 }
 0x54b   :  { %1563 = vmatprep.subr.mxu0 %v5444_v35  ;;  %1634 = vmatprep.subr.mxu1 %v5450_v36 }
 0x54c   :  { %1564 = vmatpush1.msra.mxu0 %v5456_v37  ;;  %1635 = vmatpush1.msra.mxu1 %v5462_v39 }
 0x54d   :  { %1565 = vmatprep.subr.mxu0 %v5468_v40  ;;  %1636 = vmatprep.subr.mxu1 %v5474_v41 }
 0x54e   :  { %1566 = vmatpush1.msra.mxu0 %v5480_v42  ;;  %1637 = vmatpush1.msra.mxu1 %v5486_v43 }
 0x54f   :  { %1567 = vmatprep.subr.mxu0 %v5492_v44  ;;  %1638 = vmatprep.subr.mxu1 %v5498_v47 }
 0x550   :  { %1568 = vmatpush1.msra.mxu0 %v5504_v60  ;;  %1639 = vmatpush1.msra.mxu1 %v5510_v58 }
 0x551   :  { %1569 = vmatprep.subr.mxu0 %v5516_v57  ;;  %1640 = vmatprep.subr.mxu1 %v5522_v0 }
 0x552   :  { %1570 = vmatpush1.msra.mxu0 %v5528_v55  ;;  %1641 = vmatpush1.msra.mxu1 %v5534_v54 }
 0x553   :  { %1571 = vmatprep.subr.mxu0 %v5540_v62  ;;  %1642 = vmatprep.subr.mxu1 %v5546_v20 }
 0x554   :  { %1572 = vmatpush1.msra.mxu0 %v5552_v61  ;;  %1643 = vmatpush1.msra.mxu1 %v5558_v38 }
 0x555   :  { %1573 = vmatprep.subr.mxu0 %v5564_v11  ;;  %1644 = vmatprep.subr.mxu1 %v5570_v29 }
 0x556   :  { %1574 = vmatpush1.msra.mxu0 %v5576_v3  ;;  %1645 = vmatpush1.msra.mxu1 %v5582_v4 }
 0x557   :  { %1575 = vmatprep.subr.mxu0 %v5588_v2  ;;  %1646 = vmatprep.subr.mxu1 %v5594_v28 }
 0x558   :  { %1576 = vmatpush1.msra.mxu0 %v5600_v30  ;;  %1647 = vmatpush1.msra.mxu1 %v8128_v56 }
 0x559   :  { %1577 = vmatprep.subr.mxu0 %v8129_v8  ;;  %1648 = vmatprep.subr.mxu1 %v8130_v9 }
 0x55a   :  { %1578 = vmatpush1.msra.mxu0 %v5624_v53  ;;  %1649 = vmatpush1.msra.mxu1 %v5630_v31 }
 0x55b   :  { %1579 = vmatprep.subr.mxu0 %v5636_v32  ;;  %1650 = vmatprep.subr.mxu1 %v5642_v59 }
 0x55c   :  { %1580 = vmatpush1.msra.mxu0 %v5732_v10  ;;  %1651 = vmatpush1.msra.mxu1 %v5738_v12 }
 0x55d   :  { %1581 = vmatprep.subr.mxu0 %v5744_v13  ;;  %1652 = vmatprep.subr.mxu1 %v5750_v14 }
 0x55e   :  { %1582 = vmatpush1.msra.mxu0 %v5756_v15  ;;  %1653 = vmatpush1.msra.mxu1 %v5762_v16 }
 0x55f   :  { %1583 = vmatprep.subr.mxu0 %v5768_v17  ;;  %1654 = vmatprep.subr.mxu1 %v5774_v18 }
 0x560   :  { %1584 = vmatpush1.msra.mxu0 %v8153_v50  ;;  %1655 = vmatpush1.msra.mxu1 %v8154_v1 }
 0x561   :  { %1585 = vmatprep.subr.mxu0 %v8155_v49  ;;  %1656 = vmatprep.subr.mxu1 %v8156_v52  ;;  %v8176_v52 = vld [vmem:[#allocation46_spill] sm:$0xff]  ;;  %v8177_v49 = vld [vmem:[#allocation44_spill] sm:$0xff] }
 0x562   :  { %1586 = vmatpush1.msra.mxu0 %v8157_v5  ;;  %1657 = vmatpush1.msra.mxu1 %v8158_v48 }
 0x563   :  { %1587 = vmatprep.subr.mxu0 %v8159_v45  ;;  %1658 = vmatprep.subr.mxu1 %v8160_v6  ;;  %v8171_v6 = vld [vmem:[#allocation26_spill] sm:$0xff] }
 0x564   :  { %1588 = vmatpush1.msra.mxu0 %v8161_v23  ;;  %1659 = vmatpush1.msra.mxu1 %v8162_v26  ;;  %v8172_v26 = vld [vmem:[#allocation7_spill] sm:$0xff] }
 0x565   :  { %1589 = vmatprep.subr.mxu0 %v8163_v24  ;;  %1660 = vmatprep.subr.mxu1 %v8164_v33  ;;  %v8173_v24 = vld [vmem:[#allocation8_spill] sm:$0xff] }
 0x566   :  { %1590 = vmatpush1.msra.mxu0 %v8165_v19  ;;  %1661 = vmatpush1.msra.mxu1 %v8166_v21  ;;  %v8174_v19 = vld [vmem:[#allocation43_spill] sm:$0xff] }
 0x567   :  { %1591 = vmatprep.subr.mxu0 %v8167_v22  ;;  %1662 = vmatprep.subr.mxu1 %v8168_v25  ;;  %v8175_v22 = vld [vmem:[#allocation45_spill] sm:$0xff] }
 0x568   :  { %1592 = vmatpush1.msra.mxu0 %v8169_v46  ;;  %1625 = vmatprep.mubr.f32.mxu0 %v8170_v7 }
 0x569   :  { %1663 = vmatpush1.msra.mxu1 %v8171_v6  ;;  %1696 = vmatprep.mubr.f32.mxu1 %v8170_v7 }
 0x56a   :  { %1746 = vmatprep.subr.mxu0 %v8172_v26  ;;  %1817 = vmatprep.subr.mxu1 %v8173_v24 }
 0x609   :  { %v1442_v33 = vpop.f32.mrf.mxu0  ;;  %v1513_v25 = vpop.f32.mrf.mxu1 }
 0x60a   :  { %v1518_v23 = vadd.f32 %v1442_v33, %v8174_v19  ;;  %v1520_v7 = vadd.f32 %v1513_v25, %v8177_v49  ;;  %v3908_v49 = vld [vmem:[%s7784_s1 + $0x28] sm:$0xff] }
 0x60b   :  { %v1444_v21 = vpop.f32.mrf.mxu0  ;;  %v1515_v5 = vpop.f32.mrf.mxu1 }
 0x60c   :  { %v3905_v45 = vmul.f32 -1.442695, %v1518_v23  ;;  %v1519_v48 = vadd.f32 %v1444_v21, %v8175_v22  ;;  %v1521_v6 = vadd.f32 %v1515_v5, %v8176_v52 }
 0x60e   :  { %4084 = vpow2.f32 %v3905_v45  ;;  %v3906_v46 = vmul.f32 -1.442695, %v1519_v48  ;;  %v3907_v1 = vmul.f32 -1.442695, %v1521_v6 }
 0x610   :  { %4086 = vpow2.f32 %v3906_v46 }
 0x611   :  { %4088 = vtanh.f32 %v1520_v7 }
 0x612   :  { %4090 = vpow2.f32 %v3907_v1 }
 0x61b   :  { %v4085_v26 = vpop.eup %4084 }
 0x61c   :  { %v1525_v50 = vadd.f32 1.0, %v4085_v26 }
 0x61d   :  { %v4087_v24 = vpop.eup %4086 }
 0x61e   :  { %4092 = vrcp.f32 %v1525_v50  ;;  %v1531_v33 = vadd.f32 1.0, %v4087_v24  ;;  %v4089_v23 = vpop.eup %4088 }
 0x61f   :  { %v4091_v19 = vpop.eup %4090 }
 0x620   :  { %4094 = vrcp.f32 %v1531_v33  ;;  %v1538_v22 = vadd.f32 1.0, %v4091_v19 }
 0x622   :  { %4096 = vrcp.f32 %v1538_v22 }
 0x62b   :  { %v4093_v45 = vpop.eup %4092 }
 0x62c   :  { %v1542_v21 = vmul.f32 %v4093_v45, %v4089_v23 }
 0x62d   :  { %v4095_v48 = vpop.eup %4094 }
 0x62e   :  { %v1541_v46 = vmul.f32 %v4095_v48, %v5899_v27 }
 0x62f   :  { %v4097_v5 = vpop.eup %4096 }
 0x630   :  { %v1543_v52 = vadd.f32 %v1542_v21, %v1541_v46  ;;  %v3912_v21 = vld [vmem:[%s7784_s1 + $0x30] sm:$0xff] }
 0x632   :  { %4098 = vtanh.f32 %v1543_v52  ;;  %v1548_v7 = vsub.f32 %v1543_v52, %v5899_v27 }
 0x634   :  { %v1549_v50 = vmul.f32 %v3908_v49, %v1548_v7 }
 0x636   :  { %v5983_v1 = vadd.f32 %v1549_v50, %v5899_v27 }
 0x63f   :  { %v4099_v6 = vpop.eup %4098 }
 0x640   :  { %v1545_v25 = vmul.f32 %v4099_v6, %v4097_v5 }
 0x642   :  { %v1551_v26 = vsub.f32 %v1545_v25, %v5903_v63  ;;  %v1991_v25 = vld [vmem:[%s7785_s3 + $0x1e0] sm:$0xff] }
 0x644   :  { %v1552_v24 = vmul.f32 %v3908_v49, %v1551_v26  ;;  %v1993_v26 = vld [vmem:[%s7785_s3 + $0x1f0] sm:$0xff] }
 0x646   :  { %v5987_v33 = vadd.f32 %v1552_v24, %v5903_v63  ;;  %v1990_v24 = vld [vmem:[%s7785_s3 + $0x1d8] sm:$0xff] }
 0x648   :  { %1626 = vmatmul.mubr.f32.vlgmr.msra.gmra.mxu0 %v5987_v33  ;;  %1697 = vmatmul.mubr.f32.vlgmr.msra.gmra.mxu1 %v5987_v33 }
 0x649   :  { %1747 = vmatpush1.msra.mxu0 %v5432_v34  ;;  %1818 = vmatpush1.msra.mxu1 %v5438_v51  ;;  %v8179_v34 = vld [vmem:[#allocation10_spill] sm:$0xff]  ;;  %v8181_v51 = vld [vmem:[#allocation12_spill] sm:$0xff] }
 0x64a   :  { %1748 = vmatprep.subr.mxu0 %v5444_v35  ;;  %1819 = vmatprep.subr.mxu1 %v5450_v36  ;;  %v8182_v35 = vld [vmem:[#allocation13_spill] sm:$0xff]  ;;  %v8183_v36 = vld [vmem:[#allocation14_spill] sm:$0xff] }
 0x64b   :  { %1749 = vmatpush1.msra.mxu0 %v5456_v37  ;;  %1820 = vmatpush1.msra.mxu1 %v5462_v39  ;;  %v8184_v37 = vld [vmem:[#allocation15_spill] sm:$0xff]  ;;  %v8185_v39 = vld [vmem:[#allocation16_spill] sm:$0xff] }
 0x64c   :  { %1750 = vmatprep.subr.mxu0 %v5468_v40  ;;  %1821 = vmatprep.subr.mxu1 %v5474_v41  ;;  %v8186_v40 = vld [vmem:[#allocation17_spill] sm:$0xff]  ;;  %v8187_v41 = vld [vmem:[#allocation18_spill] sm:$0xff] }
 0x64d   :  { %1751 = vmatpush1.msra.mxu0 %v5480_v42  ;;  %1822 = vmatpush1.msra.mxu1 %v5486_v43  ;;  %v8188_v42 = vld [vmem:[#allocation19_spill] sm:$0xff]  ;;  %v8189_v43 = vld [vmem:[#allocation20_spill] sm:$0xff] }
 0x64e   :  { %1752 = vmatprep.subr.mxu0 %v5492_v44  ;;  %1823 = vmatprep.subr.mxu1 %v5498_v47  ;;  %v8190_v44 = vld [vmem:[#allocation21_spill] sm:$0xff]  ;;  %v8191_v47 = vld [vmem:[#allocation22_spill] sm:$0xff] }
 0x64f   :  { %1753 = vmatpush1.msra.mxu0 %v5504_v60  ;;  %1824 = vmatpush1.msra.mxu1 %v5510_v58  ;;  %v8192_v60 = vld [vmem:[#allocation23_spill] sm:$0xff]  ;;  %v8193_v58 = vld [vmem:[#allocation24_spill] sm:$0xff] }
 0x650   :  { %1754 = vmatprep.subr.mxu0 %v5516_v57  ;;  %1825 = vmatprep.subr.mxu1 %v5522_v0  ;;  %v8194_v57 = vld [vmem:[#allocation25_spill] sm:$0xff]  ;;  %v8195_v0 = vld [vmem:[#allocation26_spill] sm:$0xff] }
 0x651   :  { %1755 = vmatpush1.msra.mxu0 %v5528_v55  ;;  %1826 = vmatpush1.msra.mxu1 %v5534_v54  ;;  %v8196_v55 = vmov 0.0   ;;  %v1992_v54 = vld [vmem:[%s7785_s3 + $0x1e8] sm:$0xff] }
 0x652   :  { %1756 = vmatprep.subr.mxu0 %v5540_v62  ;;  %1827 = vmatprep.subr.mxu1 %v5546_v20  ;;  %v1994_v62 = vld [vmem:[%s7785_s3 + $0x1f8] sm:$0xff] }
 0x653   :  { %1757 = vmatpush1.msra.mxu0 %v5552_v61  ;;  %1828 = vmatpush1.msra.mxu1 %v5558_v38  ;;  %v8197_v61 = vld [vmem:[#allocation47_spill] sm:$0xff] }
 0x654   :  { %1758 = vmatprep.subr.mxu0 %v5564_v11  ;;  %1829 = vmatprep.subr.mxu1 %v5570_v29 }
 0x655   :  { %1759 = vmatpush1.msra.mxu0 %v5576_v3  ;;  %1830 = vmatpush1.msra.mxu1 %v5582_v4  ;;  %v8198_v3 = vld [vmem:[#allocation49_spill] sm:$0xff] }
 0x656   :  { %1760 = vmatprep.subr.mxu0 %v5588_v2  ;;  %1831 = vmatprep.subr.mxu1 %v5594_v28 }
 0x657   :  { %1761 = vmatpush1.msra.mxu0 %v5600_v30  ;;  %1832 = vmatpush1.msra.mxu1 %v8128_v56  ;;  %v8200_v56 = vld [vmem:[#allocation48_spill] sm:$0xff] }
 0x658   :  { %1762 = vmatprep.subr.mxu0 %v8129_v8  ;;  %1833 = vmatprep.subr.mxu1 %v8130_v9 }
 0x659   :  { %1763 = vmatpush1.msra.mxu0 %v5624_v53  ;;  %1834 = vmatpush1.msra.mxu1 %v5630_v31  ;;  %v8178_v53 = vld [vmem:[#allocation9_spill] sm:$0xff]  ;;  %v8199_v31 = vld [vmem:[#allocation50_spill] sm:$0xff] }
 0x65a   :  { %1764 = vmatprep.subr.mxu0 %v5636_v32  ;;  %1835 = vmatprep.subr.mxu1 %v5642_v59  ;;  %v8180_v59 = vld [vmem:[#allocation11_spill] sm:$0xff] }
 0x65b   :  { %1765 = vmatpush1.msra.mxu0 %v5732_v10  ;;  %1836 = vmatpush1.msra.mxu1 %v5738_v12 }
 0x65c   :  { %1766 = vmatprep.subr.mxu0 %v5744_v13  ;;  %1837 = vmatprep.subr.mxu1 %v5750_v14 }
 0x65d   :  { %1767 = vmatpush1.msra.mxu0 %v5756_v15  ;;  %1838 = vmatpush1.msra.mxu1 %v5762_v16 }
 0x65e   :  { %1768 = vmatprep.subr.mxu0 %v5768_v17  ;;  %1839 = vmatprep.subr.mxu1 %v5774_v18 }
 0x65f   :  { %1769 = vmatpush1.msra.mxu0 %v8178_v53  ;;  %1840 = vmatpush1.msra.mxu1 %v8179_v34  ;;  %v1987_v53 = vld [vmem:[%s7785_s3 + $0x1c0] sm:$0xff]  ;;  %v1989_v34 = vld [vmem:[%s7785_s3 + $0x1d0] sm:$0xff] }
 0x660   :  { %1770 = vmatprep.subr.mxu0 %v8180_v59  ;;  %1841 = vmatprep.subr.mxu1 %v8181_v51  ;;  %v1984_v59 = vld [vmem:[%s7785_s3 + $0x1a8] sm:$0xff]  ;;  %v1986_v51 = vld [vmem:[%s7785_s3 + $0x1b8] sm:$0xff] }
 0x661   :  { %1771 = vmatpush1.msra.mxu0 %v8182_v35  ;;  %1842 = vmatpush1.msra.mxu1 %v8183_v36  ;;  %v1983_v35 = vld [vmem:[%s7785_s3 + $0x1a0] sm:$0xff]  ;;  %v1985_v36 = vld [vmem:[%s7785_s3 + $0x1b0] sm:$0xff] }
 0x662   :  { %1772 = vmatprep.subr.mxu0 %v8184_v37  ;;  %1843 = vmatprep.subr.mxu1 %v8185_v39  ;;  %v1980_v37 = vld [vmem:[%s7785_s3 + $0x188] sm:$0xff]  ;;  %v1982_v39 = vld [vmem:[%s7785_s3 + $0x198] sm:$0xff] }
 0x663   :  { %1773 = vmatpush1.msra.mxu0 %v8186_v40  ;;  %1844 = vmatpush1.msra.mxu1 %v8187_v41  ;;  %v1979_v40 = vld [vmem:[%s7785_s3 + $0x180] sm:$0xff]  ;;  %v1981_v41 = vld [vmem:[%s7785_s3 + $0x190] sm:$0xff] }
 0x664   :  { %1774 = vmatprep.subr.mxu0 %v8188_v42  ;;  %1845 = vmatprep.subr.mxu1 %v8189_v43  ;;  %v1976_v42 = vld [vmem:[%s7785_s3 + $0x168] sm:$0xff]  ;;  %v1978_v43 = vld [vmem:[%s7785_s3 + $0x178] sm:$0xff] }
 0x665   :  { %1775 = vmatpush1.msra.mxu0 %v8190_v44  ;;  %1846 = vmatpush1.msra.mxu1 %v8191_v47  ;;  %v1975_v44 = vld [vmem:[%s7785_s3 + $0x160] sm:$0xff]  ;;  %v1977_v47 = vld [vmem:[%s7785_s3 + $0x170] sm:$0xff] }
 0x666   :  { %1776 = vmatprep.subr.mxu0 %v8192_v60  ;;  %1847 = vmatprep.subr.mxu1 %v8193_v58  ;;  %v1972_v60 = vld [vmem:[%s7785_s3 + $0x148] sm:$0xff]  ;;  %v1974_v58 = vld [vmem:[%s7785_s3 + $0x158] sm:$0xff] }
 0x667   :  { %1777 = vmatpush1.msra.mxu0 %v8194_v57  ;;  %1848 = vmatpush1.msra.mxu1 %v8195_v0  ;;  %v1971_v57 = vld [vmem:[%s7785_s3 + $0x140] sm:$0xff]  ;;  %v1973_v0 = vld [vmem:[%s7785_s3 + $0x150] sm:$0xff] }
 0x668   :  { %1810 = vmatprep.mubr.f32.mxu0 %v8196_v55  ;;  %1881 = vmatprep.mubr.f32.mxu1 %v8196_v55 }
 0x669   :  { %2017 = vmatprep.subr.mxu0 %v1992_v54  ;;  %2130 = vmatprep.subr.mxu1 %v1994_v62  ;;  %v1968_v54 = vld [vmem:[%s7785_s3 + $0x128] sm:$0xff]  ;;  %v1970_v62 = vld [vmem:[%s7785_s3 + $0x138] sm:$0xff] }
 0x708   :  { %v1627_v20 = vpop.f32.mrf.mxu0  ;;  %v1698_v2 = vpop.f32.mrf.mxu1 }
 0x709   :  { %v1703_v38 = vadd.f32 %v1627_v20, %v8197_v61  ;;  %v1705_v8 = vadd.f32 %v1698_v2, %v8200_v56  ;;  %v1967_v20 = vld [vmem:[%s7785_s3 + $0x120] sm:$0xff]  ;;  %v1969_v61 = vld [vmem:[%s7785_s3 + $0x130] sm:$0xff]  ;;  %v1962_v2 = vld [vmem:[%s7785_s3 + $0xf8] sm:$0xff] }
 0x70a   :  { %v1629_v11 = vpop.f32.mrf.mxu0  ;;  %v1700_v30 = vpop.f32.mrf.mxu1  ;;  %v1955_v56 = vld [vmem:[%s7785_s3 + $0xc0] sm:$0xff] }
 0x70b   :  { %v3909_v29 = vmul.f32 -1.442695, %v1703_v38  ;;  %v1704_v4 = vadd.f32 %v1629_v11, %v8198_v3  ;;  %v1706_v32 = vadd.f32 %v1700_v30, %v8199_v31  ;;  %v1964_v38 = vld [vmem:[%s7785_s3 + $0x108] sm:$0xff]  ;;  %v1966_v11 = vld [vmem:[%s7785_s3 + $0x118] sm:$0xff]  ;;  %v1965_v3 = vld [vmem:[%s7785_s3 + $0x110] sm:$0xff] }
 0x70c   :  { %v1961_v30 = vld [vmem:[%s7785_s3 + $0xf0] sm:$0xff]  ;;  %v1956_v31 = vld [vmem:[%s7785_s3 + $0xc8] sm:$0xff] }
 0x70d   :  { %4100 = vpow2.f32 %v3909_v29  ;;  %v3910_v28 = vmul.f32 -1.442695, %v1704_v4  ;;  %v3911_v9 = vmul.f32 -1.442695, %v1706_v32  ;;  %v1963_v29 = vld [vmem:[%s7785_s3 + $0x100] sm:$0xff]  ;;  %v1960_v4 = vld [vmem:[%s7785_s3 + $0xe8] sm:$0xff] }
 0x70e   :  { %v1958_v32 = vld [vmem:[%s7785_s3 + $0xd8] sm:$0xff] }
 0x70f   :  { %4102 = vpow2.f32 %v3910_v28  ;;  %v1959_v28 = vld [vmem:[%s7785_s3 + $0xe0] sm:$0xff] }
 0x710   :  { %4104 = vtanh.f32 %v1705_v8  ;;  %v1957_v8 = vld [vmem:[%s7785_s3 + $0xd0] sm:$0xff] }
 0x711   :  { %4106 = vpow2.f32 %v3911_v9  ;;  %v1952_v9 = vld [vmem:[%s7785_s3 + $0xa8] sm:$0xff] }
 0x71a   :  { %v4101_v10 = vpop.eup %4100 }
 0x71b   :  { %v1710_v12 = vadd.f32 1.0, %v4101_v10  ;;  %v1954_v10 = vld [vmem:[%s7785_s3 + $0xb8] sm:$0xff] }
 0x71c   :  { %v4103_v13 = vpop.eup %4102 }
 0x71d   :  { %4108 = vrcp.f32 %v1710_v12  ;;  %v1716_v14 = vadd.f32 1.0, %v4103_v13  ;;  %v4105_v15 = vpop.eup %4104  ;;  %v1951_v12 = vld [vmem:[%s7785_s3 + $0xa0] sm:$0xff]  ;;  %v1953_v13 = vld [vmem:[%s7785_s3 + $0xb0] sm:$0xff] }
 0x71e   :  { %v4107_v16 = vpop.eup %4106 }
 0x71f   :  { %4110 = vrcp.f32 %v1716_v14  ;;  %v1723_v23 = vadd.f32 1.0, %v4107_v16  ;;  %v1948_v14 = vld [vmem:[%s7785_s3 + $0x88] sm:$0xff]  ;;  %v1947_v16 = vld [vmem:[%s7785_s3 + $0x80] sm:$0xff] }
 0x721   :  { %4112 = vrcp.f32 %v1723_v23  ;;  %v1943_v23 = vld [vmem:[%s7785_s3 + $0x60] sm:$0xff] }
 0x72a   :  { %v4109_v17 = vpop.eup %4108 }
 0x72b   :  { %v1727_v18 = vmul.f32 %v4109_v17, %v4105_v15  ;;  %v1950_v15 = vld [vmem:[%s7785_s3 + $0x98] sm:$0xff]  ;;  %v1949_v17 = vld [vmem:[%s7785_s3 + $0x90] sm:$0xff] }
 0x72c   :  { %v4111_v27 = vpop.eup %4110 }
 0x72d   :  { %v1726_v19 = vmul.f32 %v4111_v27, %v5983_v1  ;;  %v1946_v27 = vld [vmem:[%s7785_s3 + $0x78] sm:$0xff] }
 0x72e   :  { %v4113_v52 = vpop.eup %4112 }
 0x72f   :  { %v1728_v45 = vadd.f32 %v1727_v18, %v1726_v19  ;;  %v1944_v18 = vld [vmem:[%s7785_s3 + $0x68] sm:$0xff]  ;;  %v1945_v19 = vld [vmem:[%s7785_s3 + $0x70] sm:$0xff] }
 0x731   :  { %4114 = vtanh.f32 %v1728_v45  ;;  %v1733_v48 = vsub.f32 %v1728_v45, %v5983_v1  ;;  %v1940_v45 = vld [vmem:[%s7785_s3 + $0x48] sm:$0xff] }
 0x733   :  { %v1734_v22 = vmul.f32 %v3912_v21, %v1733_v48  ;;  %v1939_v48 = vld [vmem:[%s7785_s3 + $0x40] sm:$0xff] }
 0x735   :  { %v6071_v46 = vadd.f32 %v1734_v22, %v5983_v1  ;;  %v1988_v1 = vld [vmem:[%s7785_s3 + $0x1c8] sm:$0xff]  ;;  %v1941_v22 = vld [vmem:[%s7785_s3 + $0x50] sm:$0xff] }
 0x73e   :  { %v4115_v49 = vpop.eup %4114 }
 0x73f   :  { %v1730_v7 = vmul.f32 %v4115_v49, %v4113_v52  ;;  %v1936_v52 = vld [vmem:[%s7785_s3 + $0x28] sm:$0xff]  ;;  %v1938_v49 = vld [vmem:[%s7785_s3 + $0x38] sm:$0xff] }
 0x741   :  { %v1736_v50 = vsub.f32 %v1730_v7, %v5987_v33  ;;  %v1935_v7 = vld [vmem:[%s7785_s3 + $0x20] sm:$0xff] }
 0x743   :  { %v1737_v5 = vmul.f32 %v3912_v21, %v1736_v50  ;;  %v1942_v21 = vld [vmem:[%s7785_s3 + $0x58] sm:$0xff]  ;;  %v1937_v50 = vld [vmem:[%s7785_s3 + $0x30] sm:$0xff] }
 0x745   :  { %v6075_v6 = vadd.f32 %v1737_v5, %v5987_v33  ;;  %v1932_v5 = vld [vmem:[%s7785_s3 + $0x8] sm:$0xff] }
 0x747   :  { %1811 = vmatmul.mubr.f32.vlgmr.msra.gmra.mxu0 %v6075_v6  ;;  %1882 = vmatmul.mubr.f32.vlgmr.msra.gmra.mxu1 %v6075_v6 }
 0x748   :  { %2018 = vmatpush1.msra.mxu0 %v1991_v25  ;;  %2131 = vmatpush1.msra.mxu1 %v1993_v26  ;;  %v1934_v25 = vld [vmem:[%s7785_s3 + $0x18] sm:$0xff]  ;;  %v1931_v26 = vld [vmem:[%s7785_s3] sm:$0xff] }
 0x749   :  { %2019 = vmatprep.subr.mxu0 %v1988_v1  ;;  %2132 = vmatprep.subr.mxu1 %v1990_v24  ;;  %v1933_v1 = vld [vmem:[%s7785_s3 + $0x10] sm:$0xff]  ;;  %v8201_v24 = vld [vmem:[#allocation55_spill] sm:$0xff] }
 0x74a   :  { %2020 = vmatpush1.msra.mxu0 %v1987_v53  ;;  %2133 = vmatpush1.msra.mxu1 %v1989_v34  ;;  %v8202_v53 = vld [vmem:[#allocation6_spill] sm:$0xff]  ;;  %v8203_v34 = vld [vmem:[#allocation4_spill] sm:$0xff] }
 0x74b   :  { %2021 = vmatprep.subr.mxu0 %v1984_v59  ;;  %2134 = vmatprep.subr.mxu1 %v1986_v51  ;;  %v8204_v59 = vld [vmem:[#allocation28_spill] sm:$0xff] }
 0x74c   :  { %2022 = vmatpush1.msra.mxu0 %v1983_v35  ;;  %2135 = vmatpush1.msra.mxu1 %v1985_v36  ;;  %v6310_v51 = vld [vmem:[%s7786_s5 + $0x1e0] sm:$0xff]  ;;  %v6315_v35 = vld [vmem:[%s7786_s5 + $0x1f0] sm:$0xff]  ;;  %v6322_v36 = vld [vmem:[%s7786_s5 + $0x1c8] sm:$0xff] }
 0x74d   :  { %2023 = vmatprep.subr.mxu0 %v1980_v37  ;;  %2136 = vmatprep.subr.mxu1 %v1982_v39  ;;  %v6327_v37 = vld [vmem:[%s7786_s5 + $0x1d8] sm:$0xff]  ;;  %v6334_v39 = vld [vmem:[%s7786_s5 + $0x1c0] sm:$0xff] }
 0x74e   :  { %2024 = vmatpush1.msra.mxu0 %v1979_v40  ;;  %2137 = vmatpush1.msra.mxu1 %v1981_v41  ;;  %v6339_v40 = vld [vmem:[%s7786_s5 + $0x1d0] sm:$0xff]  ;;  %v6346_v41 = vld [vmem:[%s7786_s5 + $0x1a8] sm:$0xff] }
 0x74f   :  { %2025 = vmatprep.subr.mxu0 %v1976_v42  ;;  %2138 = vmatprep.subr.mxu1 %v1978_v43  ;;  %v6351_v42 = vld [vmem:[%s7786_s5 + $0x1b8] sm:$0xff]  ;;  %v6358_v43 = vld [vmem:[%s7786_s5 + $0x1a0] sm:$0xff] }
 0x750   :  { %2026 = vmatpush1.msra.mxu0 %v1975_v44  ;;  %2139 = vmatpush1.msra.mxu1 %v1977_v47  ;;  %v6363_v44 = vld [vmem:[%s7786_s5 + $0x1b0] sm:$0xff]  ;;  %v6370_v47 = vld [vmem:[%s7786_s5 + $0x188] sm:$0xff] }
 0x751   :  { %2027 = vmatprep.subr.mxu0 %v1972_v60  ;;  %2140 = vmatprep.subr.mxu1 %v1974_v58  ;;  %v6375_v60 = vld [vmem:[%s7786_s5 + $0x198] sm:$0xff]  ;;  %v6382_v58 = vld [vmem:[%s7786_s5 + $0x180] sm:$0xff] }
 0x752   :  { %2028 = vmatpush1.msra.mxu0 %v1971_v57  ;;  %2141 = vmatpush1.msra.mxu1 %v1973_v0  ;;  %v6387_v57 = vld [vmem:[%s7786_s5 + $0x190] sm:$0xff]  ;;  %v6394_v0 = vld [vmem:[%s7786_s5 + $0x168] sm:$0xff] }
 0x753   :  { %2029 = vmatprep.subr.mxu0 %v1968_v54  ;;  %2142 = vmatprep.subr.mxu1 %v1970_v62  ;;  %v6399_v54 = vld [vmem:[%s7786_s5 + $0x178] sm:$0xff]  ;;  %v6406_v62 = vld [vmem:[%s7786_s5 + $0x160] sm:$0xff] }
 0x754   :  { %2030 = vmatpush1.msra.mxu0 %v1967_v20  ;;  %2143 = vmatpush1.msra.mxu1 %v1969_v61  ;;  %v6411_v20 = vld [vmem:[%s7786_s5 + $0x170] sm:$0xff]  ;;  %v6418_v61 = vld [vmem:[%s7786_s5 + $0x148] sm:$0xff] }
 0x755   :  { %2031 = vmatprep.subr.mxu0 %v1964_v38  ;;  %2144 = vmatprep.subr.mxu1 %v1966_v11  ;;  %v6423_v38 = vld [vmem:[%s7786_s5 + $0x158] sm:$0xff]  ;;  %v6430_v11 = vld [vmem:[%s7786_s5 + $0x140] sm:$0xff] }
 0x756   :  { %2032 = vmatpush1.msra.mxu0 %v1963_v29  ;;  %2145 = vmatpush1.msra.mxu1 %v1965_v3  ;;  %v6435_v29 = vld [vmem:[%s7786_s5 + $0x150] sm:$0xff]  ;;  %v6442_v3 = vld [vmem:[%s7786_s5 + $0x128] sm:$0xff] }
 0x757   :  { %2033 = vmatprep.subr.mxu0 %v1960_v4  ;;  %2146 = vmatprep.subr.mxu1 %v1962_v2  ;;  %v6447_v4 = vld [vmem:[%s7786_s5 + $0x138] sm:$0xff]  ;;  %v6454_v2 = vld [vmem:[%s7786_s5 + $0x120] sm:$0xff] }
 0x758   :  { %2034 = vmatpush1.msra.mxu0 %v1959_v28  ;;  %2147 = vmatpush1.msra.mxu1 %v1961_v30  ;;  %v6459_v28 = vld [vmem:[%s7786_s5 + $0x130] sm:$0xff]  ;;  %v6466_v30 = vld [vmem:[%s7786_s5 + $0x108] sm:$0xff] }
 0x759   :  { %2035 = vmatprep.subr.mxu0 %v1956_v31  ;;  %2148 = vmatprep.subr.mxu1 %v1958_v32  ;;  %v6471_v31 = vld [vmem:[%s7786_s5 + $0x118] sm:$0xff]  ;;  %v6478_v32 = vld [vmem:[%s7786_s5 + $0x100] sm:$0xff] }
 0x75a   :  { %2036 = vmatpush1.msra.mxu0 %v1955_v56  ;;  %2149 = vmatpush1.msra.mxu1 %v1957_v8  ;;  %v6483_v56 = vld [vmem:[%s7786_s5 + $0x110] sm:$0xff]  ;;  %v6490_v8 = vld [vmem:[%s7786_s5 + $0xe8] sm:$0xff] }
 0x75b   :  { %2037 = vmatprep.subr.mxu0 %v1952_v9  ;;  %2150 = vmatprep.subr.mxu1 %v1954_v10  ;;  %v6495_v9 = vld [vmem:[%s7786_s5 + $0xf8] sm:$0xff]  ;;  %v6502_v10 = vld [vmem:[%s7786_s5 + $0xe0] sm:$0xff] }
 0x75c   :  { %2038 = vmatpush1.msra.mxu0 %v1951_v12  ;;  %2151 = vmatpush1.msra.mxu1 %v1953_v13  ;;  %v6507_v12 = vld [vmem:[%s7786_s5 + $0xf0] sm:$0xff]  ;;  %v6514_v13 = vld [vmem:[%s7786_s5 + $0xc8] sm:$0xff] }
 0x75d   :  { %2039 = vmatprep.subr.mxu0 %v1948_v14  ;;  %2152 = vmatprep.subr.mxu1 %v1950_v15  ;;  %v6519_v14 = vld [vmem:[%s7786_s5 + $0xd8] sm:$0xff]  ;;  %v6526_v15 = vld [vmem:[%s7786_s5 + $0xc0] sm:$0xff] }
 0x75e   :  { %2040 = vmatpush1.msra.mxu0 %v1947_v16  ;;  %2153 = vmatpush1.msra.mxu1 %v1949_v17  ;;  %v6531_v16 = vld [vmem:[%s7786_s5 + $0xd0] sm:$0xff]  ;;  %v6538_v17 = vld [vmem:[%s7786_s5 + $0xa8] sm:$0xff] }
 0x75f   :  { %2041 = vmatprep.subr.mxu0 %v1944_v18  ;;  %2154 = vmatprep.subr.mxu1 %v1946_v27  ;;  %v6543_v18 = vld [vmem:[%s7786_s5 + $0xb8] sm:$0xff]  ;;  %v6550_v27 = vld [vmem:[%s7786_s5 + $0xa0] sm:$0xff] }
 0x760   :  { %2042 = vmatpush1.msra.mxu0 %v1943_v23  ;;  %2155 = vmatpush1.msra.mxu1 %v1945_v19  ;;  %8207 = vst [vmem:[#allocation34_spill] sm:$0xff] %v6550_v27  ;;  %v6555_v23 = vld [vmem:[%s7786_s5 + $0xb0] sm:$0xff]  ;;  %v6562_v19 = vld [vmem:[%s7786_s5 + $0x88] sm:$0xff] }
 0x761   :  { %2043 = vmatprep.subr.mxu0 %v1940_v45  ;;  %2156 = vmatprep.subr.mxu1 %v1942_v21  ;;  %8208 = vst [vmem:[#allocation32_spill] sm:$0xff] %v6555_v23  ;;  %8209 = vst [vmem:[#allocation35_spill] sm:$0xff] %v6562_v19  ;;  %v6567_v45 = vld [vmem:[%s7786_s5 + $0x98] sm:$0xff]  ;;  %v6574_v21 = vld [vmem:[%s7786_s5 + $0x80] sm:$0xff] }
 0x762   :  { %2044 = vmatpush1.msra.mxu0 %v1939_v48  ;;  %2157 = vmatpush1.msra.mxu1 %v1941_v22  ;;  %8210 = vst [vmem:[#allocation37_spill] sm:$0xff] %v6567_v45  ;;  %8211 = vst [vmem:[#allocation38_spill] sm:$0xff] %v6574_v21  ;;  %v6579_v48 = vld [vmem:[%s7786_s5 + $0x90] sm:$0xff]  ;;  %v6586_v22 = vld [vmem:[%s7786_s5 + $0x68] sm:$0xff] }
 0x763   :  { %2045 = vmatprep.subr.mxu0 %v1936_v52  ;;  %2158 = vmatprep.subr.mxu1 %v1938_v49  ;;  %8212 = vst [vmem:[#allocation36_spill] sm:$0xff] %v6579_v48  ;;  %8213 = vst [vmem:[#allocation5_spill] sm:$0xff] %v6586_v22  ;;  %v6591_v52 = vld [vmem:[%s7786_s5 + $0x78] sm:$0xff]  ;;  %v6596_v49 = vld [vmem:[%s7786_s5 + $0x60] sm:$0xff] }
 0x764   :  { %2046 = vmatpush1.msra.mxu0 %v1935_v7  ;;  %2159 = vmatpush1.msra.mxu1 %v1937_v50  ;;  %8214 = vst [vmem:[#allocation29_spill] sm:$0xff] %v6591_v52  ;;  %8215 = vst [vmem:[#allocation30_spill] sm:$0xff] %v6596_v49  ;;  %v6603_v7 = vld [vmem:[%s7786_s5 + $0x70] sm:$0xff]  ;;  %v6608_v50 = vld [vmem:[%s7786_s5 + $0x48] sm:$0xff] }
 0x765   :  { %2047 = vmatprep.subr.mxu0 %v1932_v5  ;;  %2160 = vmatprep.subr.mxu1 %v1934_v25  ;;  %8216 = vst [vmem:[#allocation39_spill] sm:$0xff] %v6603_v7  ;;  %8217 = vst [vmem:[#allocation41_spill] sm:$0xff] %v6608_v50  ;;  %v6613_v5 = vld [vmem:[%s7786_s5 + $0x58] sm:$0xff]  ;;  %v6620_v25 = vld [vmem:[%s7786_s5 + $0x40] sm:$0xff] }
 0x766   :  { %2048 = vmatpush1.msra.mxu0 %v1931_v26  ;;  %2081 = vmatprep.mubr.f32.mxu0 %v8196_v55  ;;  %8218 = vst [vmem:[#allocation42_spill] sm:$0xff] %v6613_v5  ;;  %8219 = vst [vmem:[#allocation40_spill] sm:$0xff] %v6620_v25  ;;  %v6625_v26 = vld [vmem:[%s7786_s5 + $0x50] sm:$0xff] }
 0x767   :  { %2161 = vmatpush1.msra.mxu1 %v1933_v1  ;;  %2194 = vmatprep.mubr.f32.mxu1 %v8196_v55  ;;  %8220 = vst [vmem:[#allocation7_spill] sm:$0xff] %v6625_v26  ;;  %v6632_v1 = vld [vmem:[%s7786_s5 + $0x28] sm:$0xff] }
 0x768   :  { %2082 = vmatmul.mubr.f32.vlgmr.msra.gmra.mxu0 %v8201_v24  ;;  %2195 = vmatmul.mubr.f32.vlgmr.msra.gmra.mxu1 %v8201_v24  ;;  %8221 = vst [vmem:[#allocation8_spill] sm:$0xff] %v6632_v1  ;;  %v6637_v24 = vld [vmem:[%s7786_s5 + $0x38] sm:$0xff] }
 0x769   :  { %2087 = vmatprep.mubr.f32.mxu0 %v8196_v55  ;;  %2200 = vmatprep.mubr.f32.mxu1 %v8196_v55  ;;  %8222 = vst [vmem:[#allocation43_spill] sm:$0xff] %v6637_v24 }
 0x76c   :  { %2088 = vmatmul.mubr.f32.gmra.mxu0 %v8202_v53  ;;  %2201 = vmatmul.mubr.f32.gmra.mxu1 %v8202_v53  ;;  %v6642_v53 = vld [vmem:[%s7786_s5 + $0x20] sm:$0xff] }
 0x76d   :  { %2093 = vmatprep.mubr.f32.mxu0 %v8196_v55  ;;  %2206 = vmatprep.mubr.f32.mxu1 %v8196_v55  ;;  %8223 = vst [vmem:[#allocation45_spill] sm:$0xff] %v6642_v53 }
 0x770   :  { %2094 = vmatmul.mubr.f32.gmra.mxu0 %v8203_v34  ;;  %2207 = vmatmul.mubr.f32.gmra.mxu1 %v8203_v34  ;;  %v6649_v34 = vld [vmem:[%s7786_s5 + $0x30] sm:$0xff] }
 0x771   :  { %2099 = vmatprep.mubr.f32.mxu0 %v8196_v55  ;;  %2212 = vmatprep.mubr.f32.mxu1 %v8196_v55  ;;  %8224 = vst [vmem:[#allocation46_spill] sm:$0xff] %v6649_v34 }
 0x774   :  { %2100 = vmatmul.mubr.f32.gmra.mxu0 %v8204_v59  ;;  %2213 = vmatmul.mubr.f32.gmra.mxu1 %v8204_v59  ;;  %v6654_v59 = vld [vmem:[%s7786_s5 + $0x8] sm:$0xff] }
 0x775   :  { %2105 = vmatprep.mubr.f32.mxu0 %v8196_v55  ;;  %2218 = vmatprep.mubr.f32.mxu1 %v8196_v55  ;;  %8225 = vst [vmem:[#allocation44_spill] sm:$0xff] %v6654_v59 }
 0x778   :  { %2106 = vmatmul.mubr.f32.gmra.mxu0 %v5903_v63  ;;  %2219 = vmatmul.mubr.f32.gmra.mxu1 %v5903_v63  ;;  %v6298_v63 = vld [vmem:[%s7786_s5 + $0x1e8] sm:$0xff] }
 0x779   :  { %2111 = vmatprep.mubr.f32.mxu0 %v8196_v55  ;;  %2224 = vmatprep.mubr.f32.mxu1 %v8196_v55  ;;  %8205 = vst [vmem:[#allocation31_spill] sm:$0xff] %v6298_v63 }
 0x77a   :  { %2343 = vmatprep.subr.mxu0 %v6298_v63 }
 0x77b   :  { %2344 = vmatpush1.msra.mxu0 %v6310_v51 }
 0x77c   :  { %2112 = vmatmul.mubr.f32.gmra.mxu0 %v5987_v33  ;;  %2225 = vmatmul.mubr.f32.gmra.mxu1 %v5987_v33  ;;  %v6303_v33 = vld [vmem:[%s7786_s5 + $0x1f8] sm:$0xff] }
 0x77d   :  { %2117 = vmatprep.mubr.f32.mxu0 %v8196_v55  ;;  %2230 = vmatprep.mubr.f32.mxu1 %v8196_v55  ;;  %8206 = vst [vmem:[#allocation33_spill] sm:$0xff] %v6303_v33 }
 0x77e   :  { %2414 = vmatprep.subr.mxu1 %v6303_v33  ;;  %2345 = vmatprep.subr.mxu0 %v6322_v36 }
 0x77f   :  { %2415 = vmatpush1.msra.mxu1 %v6315_v35  ;;  %2346 = vmatpush1.msra.mxu0 %v6334_v39 }
 0x780   :  { %2118 = vmatmul.mubr.f32.gmra.mxu0 %v6075_v6  ;;  %2231 = vmatmul.mubr.f32.gmra.mxu1 %v6075_v6 }
 0x781   :  { %2123 = vmatprep.mubr.f32.mxu0 %v8196_v55  ;;  %2236 = vmatprep.mubr.f32.mxu1 %v8196_v55 }
 0x782   :  { %2416 = vmatprep.subr.mxu1 %v6327_v37  ;;  %2347 = vmatprep.subr.mxu0 %v6346_v41 }
 0x783   :  { %2417 = vmatpush1.msra.mxu1 %v6339_v40  ;;  %2348 = vmatpush1.msra.mxu0 %v6358_v43 }
 0x784   :  { %2418 = vmatprep.subr.mxu1 %v6351_v42  ;;  %2349 = vmatprep.subr.mxu0 %v6370_v47 }
 0x785   :  { %2419 = vmatpush1.msra.mxu1 %v6363_v44  ;;  %2350 = vmatpush1.msra.mxu0 %v6382_v58 }
 0x786   :  { %2420 = vmatprep.subr.mxu1 %v6375_v60  ;;  %2351 = vmatprep.subr.mxu0 %v6394_v0 }
 0x787   :  { %2421 = vmatpush1.msra.mxu1 %v6387_v57  ;;  %2352 = vmatpush1.msra.mxu0 %v6406_v62 }
 0x788   :  { %2422 = vmatprep.subr.mxu1 %v6399_v54  ;;  %2353 = vmatprep.subr.mxu0 %v6418_v61 }
 0x789   :  { %2423 = vmatpush1.msra.mxu1 %v6411_v20  ;;  %2354 = vmatpush1.msra.mxu0 %v6430_v11 }
 0x78a   :  { %2424 = vmatprep.subr.mxu1 %v6423_v38  ;;  %2355 = vmatprep.subr.mxu0 %v6442_v3 }
 0x78b   :  { %2425 = vmatpush1.msra.mxu1 %v6435_v29  ;;  %2356 = vmatpush1.msra.mxu0 %v6454_v2 }
 0x78c   :  { %2426 = vmatprep.subr.mxu1 %v6447_v4  ;;  %2357 = vmatprep.subr.mxu0 %v6466_v30 }
 0x78d   :  { %2427 = vmatpush1.msra.mxu1 %v6459_v28  ;;  %2358 = vmatpush1.msra.mxu0 %v6478_v32 }
 0x78e   :  { %2428 = vmatprep.subr.mxu1 %v6471_v31  ;;  %2359 = vmatprep.subr.mxu0 %v6490_v8 }
 0x78f   :  { %2429 = vmatpush1.msra.mxu1 %v6483_v56  ;;  %2360 = vmatpush1.msra.mxu0 %v6502_v10 }
 0x790   :  { %2430 = vmatprep.subr.mxu1 %v6495_v9  ;;  %2361 = vmatprep.subr.mxu0 %v6514_v13 }
 0x791   :  { %2431 = vmatpush1.msra.mxu1 %v6507_v12  ;;  %2362 = vmatpush1.msra.mxu0 %v6526_v15 }
 0x792   :  { %2432 = vmatprep.subr.mxu1 %v6519_v14  ;;  %2363 = vmatprep.subr.mxu0 %v6538_v17 }
 0x793   :  { %2433 = vmatpush1.msra.mxu1 %v6531_v16  ;;  %2364 = vmatpush1.msra.mxu0 %v6550_v27 }
 0x794   :  { %2434 = vmatprep.subr.mxu1 %v6543_v18  ;;  %2365 = vmatprep.subr.mxu0 %v6562_v19 }
 0x795   :  { %2435 = vmatpush1.msra.mxu1 %v6555_v23  ;;  %2366 = vmatpush1.msra.mxu0 %v6574_v21 }
 0x796   :  { %2436 = vmatprep.subr.mxu1 %v6567_v45  ;;  %2367 = vmatprep.subr.mxu0 %v6586_v22  ;;  %v8231_v22 = vld [vmem:[#allocation54_spill] sm:$0xff] }
 0x797   :  { %2437 = vmatpush1.msra.mxu1 %v6579_v48  ;;  %2368 = vmatpush1.msra.mxu0 %v6596_v49  ;;  %v8232_v48 = vld [vmem:[#allocation52_spill] sm:$0xff] }
 0x798   :  { %2438 = vmatprep.subr.mxu1 %v6591_v52  ;;  %2369 = vmatprep.subr.mxu0 %v6608_v50 }
 0x799   :  { %2439 = vmatpush1.msra.mxu1 %v6603_v7  ;;  %2370 = vmatpush1.msra.mxu0 %v6620_v25  ;;  %v6671_v25 = vld [vmem:[%s7786_s5 + $0x10] sm:$0xff] }
 0x79a   :  { %2440 = vmatprep.subr.mxu1 %v6613_v5  ;;  %v6659_v5 = vld [vmem:[%s7786_s5 + $0x18] sm:$0xff]  ;;  %2371 = vmatprep.subr.mxu0 %v6632_v1  ;;  %8228 = vst [vmem:[#allocation11_spill] sm:$0xff] %v6671_v25 }
 0x79b   :  { %2441 = vmatpush1.msra.mxu1 %v6625_v26  ;;  %8226 = vst [vmem:[#allocation9_spill] sm:$0xff] %v6659_v5  ;;  %v6666_v26 = vld [vmem:[%s7786_s5] sm:$0xff]  ;;  %2372 = vmatpush1.msra.mxu0 %v6642_v53  ;;  %v8229_v1 = vld [vmem:[#allocation51_spill] sm:$0xff]  ;;  %v8230_v53 = vld [vmem:[#allocation53_spill] sm:$0xff] }
 0x79c   :  { %2442 = vmatprep.subr.mxu1 %v6637_v24  ;;  %8227 = vst [vmem:[#allocation10_spill] sm:$0xff] %v6666_v26  ;;  %2373 = vmatprep.subr.mxu0 %v6654_v59 }
 0x79d   :  { %2443 = vmatpush1.msra.mxu1 %v6649_v34  ;;  %2374 = vmatpush1.msra.mxu0 %v6666_v26 }
 0x79e   :  { %2444 = vmatprep.subr.mxu1 %v6659_v5  ;;  %2522 = vmatprep.subr.mxu0 %v6298_v63 }
 0x79f   :  { %2445 = vmatpush1.msra.mxu1 %v6671_v25 }
 0x7a0   :  { %2593 = vmatprep.subr.mxu1 %v6303_v33 }
 0x807   :  { %v1812_v24 = vpop.f32.mrf.mxu0  ;;  %v1883_v34 = vpop.f32.mrf.mxu1 }
 0x808   :  { %v1888_v50 = vadd.f32 %v1812_v24, %v8229_v1  ;;  %v1890_v25 = vadd.f32 %v1883_v34, %v8232_v48  ;;  %v8236_v34 = vld [vmem:[#allocation5_spill] sm:$0xff] }
 0x809   :  { %v1814_v7 = vpop.f32.mrf.mxu0  ;;  %v1885_v5 = vpop.f32.mrf.mxu1 }
 0x80a   :  { %v3913_v49 = vmul.f32 -1.442695, %v1888_v50  ;;  %v1889_v52 = vadd.f32 %v1814_v7, %v8230_v53  ;;  %v1891_v26 = vadd.f32 %v1885_v5, %v8231_v22 }
 0x80c   :  { %4116 = vpow2.f32 %v3913_v49  ;;  %v3914_v59 = vmul.f32 -1.442695, %v1889_v52  ;;  %v3915_v21 = vmul.f32 -1.442695, %v1891_v26  ;;  %v8235_v26 = vld [vmem:[#allocation36_spill] sm:$0xff] }
 0x80e   :  { %4118 = vpow2.f32 %v3914_v59 }
 0x80f   :  { %4120 = vtanh.f32 %v1890_v25 }
 0x810   :  { %4122 = vpow2.f32 %v3915_v21 }
 0x819   :  { %v4117_v63 = vpop.eup %4116 }
 0x81a   :  { %v1895_v45 = vadd.f32 1.0, %v4117_v63 }
 0x81b   :  { %v4119_v33 = vpop.eup %4118 }
 0x81c   :  { %4124 = vrcp.f32 %v1895_v45  ;;  %v1901_v1 = vadd.f32 1.0, %v4119_v33  ;;  %v4121_v50 = vpop.eup %4120  ;;  %v3916_v45 = vld [vmem:[%s7784_s1 + $0x38] sm:$0xff] }
 0x81d   :  { %v4123_v7 = vpop.eup %4122 }
 0x81e   :  { %4126 = vrcp.f32 %v1901_v1  ;;  %v1908_v53 = vadd.f32 1.0, %v4123_v7  ;;  %v8237_v1 = vld [vmem:[#allocation29_spill] sm:$0xff]  ;;  %v8239_v7 = vld [vmem:[#allocation39_spill] sm:$0xff] }
 0x820   :  { %4128 = vrcp.f32 %v1908_v53  ;;  %v8243_v53 = vld [vmem:[#allocation7_spill] sm:$0xff] }
 0x829   :  { %v4125_v49 = vpop.eup %4124 }
 0x82a   :  { %v1912_v24 = vmul.f32 %v4125_v49, %v4121_v50  ;;  %v8238_v50 = vld [vmem:[#allocation30_spill] sm:$0xff]  ;;  %v8240_v49 = vld [vmem:[#allocation41_spill] sm:$0xff] }
 0x82b   :  { %v4127_v52 = vpop.eup %4126 }
 0x82c   :  { %v1911_v59 = vmul.f32 %v4127_v52, %v6071_v46  ;;  %v8233_v46 = vld [vmem:[#allocation37_spill] sm:$0xff]  ;;  %v8242_v52 = vld [vmem:[#allocation40_spill] sm:$0xff] }
 0x82d   :  { %v4129_v48 = vpop.eup %4128 }
 0x82e   :  { %v1913_v22 = vadd.f32 %v1912_v24, %v1911_v59  ;;  %v8241_v24 = vld [vmem:[#allocation42_spill] sm:$0xff]  ;;  %v8244_v59 = vld [vmem:[#allocation8_spill] sm:$0xff] }
 0x830   :  { %4130 = vtanh.f32 %v1913_v22  ;;  %v8245_v22 = vld [vmem:[#allocation43_spill] sm:$0xff] }
 0x83d   :  { %v4131_v5 = vpop.eup %4130 }
 0x83e   :  { %v1915_v63 = vmul.f32 %v4131_v5, %v4129_v48  ;;  %v8246_v48 = vld [vmem:[#allocation45_spill] sm:$0xff]  ;;  %v8247_v5 = vld [vmem:[#allocation46_spill] sm:$0xff] }
 0x840   :  { %v1918_v33 = vsub.f32 %v1915_v63, %v6075_v6  ;;  %v8248_v63 = vld [vmem:[#allocation44_spill] sm:$0xff] }
 0x842   :  { %v1919_v21 = vmul.f32 %v3916_v45, %v1918_v33  ;;  %v8249_v45 = vld [vmem:[#allocation9_spill] sm:$0xff]  ;;  %v8250_v33 = vld [vmem:[#allocation10_spill] sm:$0xff] }
 0x844   :  { %v1920_v25 = vadd.f32 %v1919_v21, %v6075_v6  ;;  %v8234_v6 = vld [vmem:[#allocation38_spill] sm:$0xff]  ;;  %v8251_v21 = vld [vmem:[#allocation11_spill] sm:$0xff] }
 0x846   :  { %2124 = vmatmul.mubr.f32.gmra.mxu0 %v1920_v25  ;;  %2237 = vmatmul.mubr.f32.gmra.mxu1 %v1920_v25  ;;  %v8252_v25 = vld [vmem:[#allocation31_spill] sm:$0xff] }
 0x847   :  { %2407 = vmatprep.mubr.f32.mxu0 %v8196_v55  ;;  %2478 = vmatprep.mubr.f32.mxu1 %v8196_v55 }
 0x84a   :  { %2408 = vmatmul.mubr.f32.vlgmr.msra.gmra.mxu0 %v8196_v55  ;;  %2479 = vmatmul.mubr.f32.vlgmr.msra.gmra.mxu1 %v8196_v55 }
 0x84b   :  { %2523 = vmatpush1.msra.mxu0 %v6310_v51  ;;  %2594 = vmatpush1.msra.mxu1 %v6315_v35 }
 0x84c   :  { %2524 = vmatprep.subr.mxu0 %v6322_v36  ;;  %2595 = vmatprep.subr.mxu1 %v6327_v37 }
 0x84d   :  { %2525 = vmatpush1.msra.mxu0 %v6334_v39  ;;  %2596 = vmatpush1.msra.mxu1 %v6339_v40 }
 0x84e   :  { %2526 = vmatprep.subr.mxu0 %v6346_v41  ;;  %2597 = vmatprep.subr.mxu1 %v6351_v42 }
 0x84f   :  { %2527 = vmatpush1.msra.mxu0 %v6358_v43  ;;  %2598 = vmatpush1.msra.mxu1 %v6363_v44 }
 0x850   :  { %2528 = vmatprep.subr.mxu0 %v6370_v47  ;;  %2599 = vmatprep.subr.mxu1 %v6375_v60 }
 0x851   :  { %2529 = vmatpush1.msra.mxu0 %v6382_v58  ;;  %2600 = vmatpush1.msra.mxu1 %v6387_v57 }
 0x852   :  { %2530 = vmatprep.subr.mxu0 %v6394_v0  ;;  %2601 = vmatprep.subr.mxu1 %v6399_v54 }
 0x853   :  { %2531 = vmatpush1.msra.mxu0 %v6406_v62  ;;  %2602 = vmatpush1.msra.mxu1 %v6411_v20 }
 0x854   :  { %2532 = vmatprep.subr.mxu0 %v6418_v61  ;;  %2603 = vmatprep.subr.mxu1 %v6423_v38 }
 0x855   :  { %2533 = vmatpush1.msra.mxu0 %v6430_v11  ;;  %2604 = vmatpush1.msra.mxu1 %v6435_v29 }
 0x856   :  { %2534 = vmatprep.subr.mxu0 %v6442_v3  ;;  %2605 = vmatprep.subr.mxu1 %v6447_v4 }
 0x857   :  { %2535 = vmatpush1.msra.mxu0 %v6454_v2  ;;  %2606 = vmatpush1.msra.mxu1 %v6459_v28 }
 0x858   :  { %2536 = vmatprep.subr.mxu0 %v6466_v30  ;;  %2607 = vmatprep.subr.mxu1 %v6471_v31 }
 0x859   :  { %2537 = vmatpush1.msra.mxu0 %v6478_v32  ;;  %2608 = vmatpush1.msra.mxu1 %v6483_v56 }
 0x85a   :  { %2538 = vmatprep.subr.mxu0 %v6490_v8  ;;  %2609 = vmatprep.subr.mxu1 %v6495_v9 }
 0x85b   :  { %2539 = vmatpush1.msra.mxu0 %v6502_v10  ;;  %2610 = vmatpush1.msra.mxu1 %v6507_v12 }
 0x85c   :  { %2540 = vmatprep.subr.mxu0 %v6514_v13  ;;  %2611 = vmatprep.subr.mxu1 %v6519_v14 }
 0x85d   :  { %2541 = vmatpush1.msra.mxu0 %v6526_v15  ;;  %2612 = vmatpush1.msra.mxu1 %v6531_v16 }
 0x85e   :  { %2542 = vmatprep.subr.mxu0 %v6538_v17  ;;  %2613 = vmatprep.subr.mxu1 %v6543_v18 }
 0x85f   :  { %2543 = vmatpush1.msra.mxu0 %v6550_v27  ;;  %2614 = vmatpush1.msra.mxu1 %v6555_v23 }
 0x860   :  { %2544 = vmatprep.subr.mxu0 %v6562_v19  ;;  %2615 = vmatprep.subr.mxu1 %v8233_v46 }
 0x861   :  { %2545 = vmatpush1.msra.mxu0 %v8234_v6  ;;  %2616 = vmatpush1.msra.mxu1 %v8235_v26 }
 0x862   :  { %2546 = vmatprep.subr.mxu0 %v8236_v34  ;;  %2617 = vmatprep.subr.mxu1 %v8237_v1 }
 0x863   :  { %2547 = vmatpush1.msra.mxu0 %v8238_v50  ;;  %2618 = vmatpush1.msra.mxu1 %v8239_v7 }
 0x864   :  { %2548 = vmatprep.subr.mxu0 %v8240_v49  ;;  %2619 = vmatprep.subr.mxu1 %v8241_v24 }
 0x865   :  { %2549 = vmatpush1.msra.mxu0 %v8242_v52  ;;  %2620 = vmatpush1.msra.mxu1 %v8243_v53 }
 0x866   :  { %2550 = vmatprep.subr.mxu0 %v8244_v59  ;;  %2621 = vmatprep.subr.mxu1 %v8245_v22  ;;  %v8253_v59 = vld [vmem:[#allocation33_spill] sm:$0xff]  ;;  %v2083_v22 = vpop.f32.mrf.mxu0 }
 0x867   :  { %2551 = vmatpush1.msra.mxu0 %v8246_v48  ;;  %2622 = vmatpush1.msra.mxu1 %v8247_v5  ;;  %v2196_v48 = vpop.f32.mrf.mxu1 }
 0x868   :  { %2552 = vmatprep.subr.mxu0 %v8248_v63  ;;  %2623 = vmatprep.subr.mxu1 %v8249_v45  ;;  %v2085_v53 = vpop.f32.mrf.mxu0 }
 0x869   :  { %2553 = vmatpush1.msra.mxu0 %v8250_v33  ;;  %2586 = vmatprep.mubr.f32.mxu0 %v8196_v55  ;;  %v2198_v5 = vpop.f32.mrf.mxu1 }
 0x86a   :  { %2624 = vmatpush1.msra.mxu1 %v8251_v21  ;;  %2657 = vmatprep.mubr.f32.mxu1 %v8196_v55  ;;  %v6761_v52 = vpop.f32.mrf.mxu0 }
 0x86b   :  { %2703 = vmatprep.subr.mxu0 %v8252_v25  ;;  %2774 = vmatprep.subr.mxu1 %v8253_v59  ;;  %8254 = vst [vmem:[#allocation12_spill] sm:$0xff] %v6761_v52  ;;  %v6763_v63 = vpop.f32.mrf.mxu1 }
 0x86c   :  { %8255 = vst [vmem:[#allocation13_spill] sm:$0xff] %v6763_v63  ;;  %v6765_v45 = vpop.f32.mrf.mxu0 }
 0x86d   :  { %8256 = vst [vmem:[#allocation14_spill] sm:$0xff] %v6765_v45  ;;  %v6767_v33 = vpop.f32.mrf.mxu1 }
 0x86e   :  { %8257 = vst [vmem:[#allocation15_spill] sm:$0xff] %v6767_v33  ;;  %v6769_v24 = vpop.f32.mrf.mxu0 }
 0x86f   :  { %8258 = vst [vmem:[#allocation16_spill] sm:$0xff] %v6769_v24  ;;  %v6771_v21 = vpop.f32.mrf.mxu1 }
 0x870   :  { %8259 = vst [vmem:[#allocation17_spill] sm:$0xff] %v6771_v21  ;;  %v6773_v55 = vpop.f32.mrf.mxu0 }
 0x871   :  { %8260 = vst [vmem:[#allocation18_spill] sm:$0xff] %v6773_v55  ;;  %v6775_v25 = vpop.f32.mrf.mxu1 }
 0x872   :  { %8261 = vst [vmem:[#allocation19_spill] sm:$0xff] %v6775_v25  ;;  %v6777_v59 = vpop.f32.mrf.mxu0 }
 0x873   :  { %8262 = vst [vmem:[#allocation20_spill] sm:$0xff] %v6777_v59  ;;  %v6779_v49 = vpop.f32.mrf.mxu1 }
 0x874   :  { %8263 = vst [vmem:[#allocation21_spill] sm:$0xff] %v6779_v49  ;;  %v6781_v7 = vpop.f32.mrf.mxu0 }
 0x875   :  { %8264 = vst [vmem:[#allocation22_spill] sm:$0xff] %v6781_v7  ;;  %v6783_v52 = vpop.f32.mrf.mxu1 }
 0x876   :  { %8265 = vst [vmem:[#allocation23_spill] sm:$0xff] %v6783_v52  ;;  %v6785_v63 = vpop.f32.mrf.mxu0 }
 0x877   :  { %8266 = vst [vmem:[#allocation24_spill] sm:$0xff] %v6785_v63  ;;  %v6787_v45 = vpop.f32.mrf.mxu1 }
 0x878   :  { %8267 = vst [vmem:[#allocation25_spill] sm:$0xff] %v6787_v45  ;;  %v6789_v33 = vpop.f32.mrf.mxu0  ;;  %v1995_v45 = vld [vmem:[%s7787_s7] sm:$0xf] }
 0x879   :  { %8268 = vst [vmem:[#allocation26_spill] sm:$0xff] %v6789_v33  ;;  %v6791_v24 = vpop.f32.mrf.mxu1  ;;  %v8277_v33 = vld [vmem:[#allocation27_spill] sm:$0xff] }
 0x87a   :  { %8269 = vst [vmem:[#allocation47_spill] sm:$0xff] %v6791_v24  ;;  %v6793_v21 = vpop.f32.mrf.mxu0  ;;  %v8278_v24 = vsub.s32 0, %v8277_v33 }
 0x87b   :  { %8270 = vst [vmem:[#allocation49_spill] sm:$0xff] %v6793_v21  ;;  %v6795_v55 = vpop.f32.mrf.mxu1 }
 0x87c   :  { %8271 = vst [vmem:[#allocation50_spill] sm:$0xff] %v6795_v55  ;;  %v6797_v25 = vpop.f32.mrf.mxu0  ;;  %v6812_v52 = vrot.slane %v1995_v45, %v8278_v24 }
 0x87d   :  { %8272 = vst [vmem:[#allocation48_spill] sm:$0xff] %v6797_v25  ;;  %v6799_v59 = vpop.f32.mrf.mxu1 }
 0x87e   :  { %8273 = vst [vmem:[#allocation55_spill] sm:$0xff] %v6799_v59  ;;  %v6801_v49 = vpop.f32.mrf.mxu0  ;;  %8279 = vst [vmem:[#allocation51_spill] sm:$0xff] %v6812_v52  ;;  %v8282_v59 = vsub.s32 1, %v8277_v33  ;;  %v2084_v50 = vadd.f32 %v2083_v22, %v6812_v52 }
 0x87f   :  { %8274 = vst [vmem:[#allocation6_spill] sm:$0xff] %v6801_v49  ;;  %v6803_v7 = vpop.f32.mrf.mxu1 }
 0x880   :  { %8275 = vst [vmem:[#allocation4_spill] sm:$0xff] %v6803_v7  ;;  %v6808_v63 = vpop.f32.mrf.mxu0  ;;  %v6820_v25 = vrot.slane %v1995_v45, %v8282_v59  ;;  %v8286_v59 = vsub.s32 3, %v8277_v33 }
 0x881   :  { %8276 = vst [vmem:[#allocation28_spill] sm:$0xff] %v6808_v63  ;;  %v6814_v21 = vpop.f32.mrf.mxu1 }
 0x882   :  { %8280 = vst [vmem:[#allocation53_spill] sm:$0xff] %v6814_v21  ;;  %v2086_v63 = vadd.f32 %v2085_v53, %v6820_v25  ;;  %v6832_v19 = vrot.slane %v1995_v45, %v8286_v59 }
 0x884   :  { %8287 = vst [vmem:[#allocation57_spill] sm:$0xff] %v6832_v19  ;;  %v2199_v22 = vadd.f32 %v2198_v5, %v6832_v19 }
 0x906   :  { %v6816_v55 = vpop.f32.mrf.mxu0  ;;  %v6822_v49 = vpop.f32.mrf.mxu1 }
 0x907   :  { %8281 = vst [vmem:[#allocation54_spill] sm:$0xff] %v6816_v55  ;;  %8283 = vst [vmem:[#allocation52_spill] sm:$0xff] %v6822_v49 }
 0x908   :  { %v6824_v7 = vpop.f32.mrf.mxu0  ;;  %v6828_v34 = vpop.f32.mrf.mxu1 }
 0x909   :  { %8284 = vst [vmem:[#allocation27_spill] sm:$0xff] %v6824_v7  ;;  %8285 = vst [vmem:[#allocation56_spill] sm:$0xff] %v6828_v34  ;;  %v8288_v7 = vsub.s32 2, %v8277_v33 }
 0x90a   :  { %v2409_v1 = vpop.f32.mrf.mxu0  ;;  %v2480_v55 = vpop.f32.mrf.mxu1 }
 0x90b   :  { %v2485_v24 = vadd.f32 %v2409_v1, %v2084_v50  ;;  %v6837_v53 = vrot.slane %v1995_v45, %v8288_v7 }
 0x90c   :  { %v2411_v26 = vpop.f32.mrf.mxu0  ;;  %v2482_v49 = vpop.f32.mrf.mxu1 }
 0x90d   :  { %v3917_v21 = vmul.f32 -1.442695, %v2485_v24  ;;  %v2486_v6 = vadd.f32 %v2411_v26, %v2086_v63  ;;  %v2488_v34 = vadd.f32 %v2482_v49, %v2199_v22  ;;  %v2197_v1 = vadd.f32 %v2196_v48, %v6837_v53 }
 0x90f   :  { %4132 = vpow2.f32 %v3917_v21  ;;  %v3918_v46 = vmul.f32 -1.442695, %v2486_v6  ;;  %v3919_v50 = vmul.f32 -1.442695, %v2488_v34  ;;  %v2487_v63 = vadd.f32 %v2480_v55, %v2197_v1  ;;  %v2513_v34 = vld [vmem:[%s7784_s1] sm:$0xff] }
 0x911   :  { %4134 = vpow2.f32 %v3918_v46 }
 0x912   :  { %4136 = vpow2.f32 %v3919_v50 }
 0x91c   :  { %v4133_v26 = vpop.eup %4132 }
 0x91d   :  { %v2492_v21 = vadd.f32 1.0, %v4133_v26  ;;  %v8290_v26 = vld [vmem:[#allocation37_spill] sm:$0xff] }
 0x91e   :  { %v4135_v6 = vpop.eup %4134 }
 0x91f   :  { %4138 = vrcp.f32 %v2492_v21  ;;  %v2498_v24 = vadd.f32 1.0, %v4135_v6  ;;  %v4137_v46 = vpop.eup %4136  ;;  %v8292_v21 = vld [vmem:[#allocation36_spill] sm:$0xff]  ;;  %v8293_v6 = vld [vmem:[#allocation5_spill] sm:$0xff] }
 0x920   :  { %4140 = vtanh.f32 %v2487_v63  ;;  %v2505_v33 = vadd.f32 1.0, %v4137_v46  ;;  %v8291_v63 = vld [vmem:[#allocation38_spill] sm:$0xff] }
 0x921   :  { %4142 = vrcp.f32 %v2498_v24  ;;  %v8294_v24 = vld [vmem:[#allocation29_spill] sm:$0xff]  ;;  %v8295_v46 = vld [vmem:[#allocation30_spill] sm:$0xff] }
 0x922   :  { %4144 = vrcp.f32 %v2505_v33  ;;  %v8298_v33 = vld [vmem:[#allocation42_spill] sm:$0xff] }
 0x92c   :  { %v4139_v59 = vpop.eup %4138 }
 0x92d   :  { %v4141_v5 = vpop.eup %4140 }
 0x92e   :  { %v4143_v19 = vpop.eup %4142  ;;  %v2509_v45 = vmul.f32 %v4141_v5, %v4139_v59  ;;  %v8296_v59 = vld [vmem:[#allocation39_spill] sm:$0xff]  ;;  %v8297_v5 = vld [vmem:[#allocation41_spill] sm:$0xff] }
 0x92f   :  { %v2508_v7 = vmul.f32 0.0, %v4143_v19  ;;  %v4145_v48 = vpop.eup %4144  ;;  %v8289_v19 = vld [vmem:[#allocation35_spill] sm:$0xff] }
 0x931   :  { %v2510_v49 = vadd.f32 %v2509_v45, %v2508_v7  ;;  %v8299_v7 = vld [vmem:[#allocation40_spill] sm:$0xff]  ;;  %v8300_v45 = vld [vmem:[#allocation7_spill] sm:$0xff] }
 0x933   :  { %4146 = vtanh.f32 %v2510_v49  ;;  %v6843_v55 = vmul.f32 %v2513_v34, %v2510_v49  ;;  %v8302_v49 = vld [vmem:[#allocation43_spill] sm:$0xff] }
 0x940   :  { %v4147_v22 = vpop.eup %4146 }
 0x941   :  { %v2512_v1 = vmul.f32 %v4147_v22, %v4145_v48  ;;  %v8303_v48 = vld [vmem:[#allocation45_spill] sm:$0xff]  ;;  %v8304_v22 = vld [vmem:[#allocation46_spill] sm:$0xff] }
 0x943   :  { %v6845_v50 = vmul.f32 %v2513_v34, %v2512_v1  ;;  %v8301_v34 = vld [vmem:[#allocation8_spill] sm:$0xff] }
 0x944   :  { %v8305_v1 = vld [vmem:[#allocation44_spill] sm:$0xff] }
 0x945   :  { %2587 = vmatmul.mubr.f32.vlgmr.msra.gmra.mxu0 %v6845_v50  ;;  %2658 = vmatmul.mubr.f32.vlgmr.msra.gmra.mxu1 %v6845_v50 }
 0x946   :  { %2704 = vmatpush1.msra.mxu0 %v6310_v51  ;;  %2775 = vmatpush1.msra.mxu1 %v6315_v35 }
 0x947   :  { %2705 = vmatprep.subr.mxu0 %v6322_v36  ;;  %2776 = vmatprep.subr.mxu1 %v6327_v37 }
 0x948   :  { %2706 = vmatpush1.msra.mxu0 %v6334_v39  ;;  %2777 = vmatpush1.msra.mxu1 %v6339_v40 }
 0x949   :  { %2707 = vmatprep.subr.mxu0 %v6346_v41  ;;  %2778 = vmatprep.subr.mxu1 %v6351_v42 }
 0x94a   :  { %2708 = vmatpush1.msra.mxu0 %v6358_v43  ;;  %2779 = vmatpush1.msra.mxu1 %v6363_v44 }
 0x94b   :  { %2709 = vmatprep.subr.mxu0 %v6370_v47  ;;  %2780 = vmatprep.subr.mxu1 %v6375_v60 }
 0x94c   :  { %2710 = vmatpush1.msra.mxu0 %v6382_v58  ;;  %2781 = vmatpush1.msra.mxu1 %v6387_v57 }
 0x94d   :  { %2711 = vmatprep.subr.mxu0 %v6394_v0  ;;  %2782 = vmatprep.subr.mxu1 %v6399_v54 }
 0x94e   :  { %2712 = vmatpush1.msra.mxu0 %v6406_v62  ;;  %2783 = vmatpush1.msra.mxu1 %v6411_v20 }
 0x94f   :  { %2713 = vmatprep.subr.mxu0 %v6418_v61  ;;  %2784 = vmatprep.subr.mxu1 %v6423_v38 }
 0x950   :  { %2714 = vmatpush1.msra.mxu0 %v6430_v11  ;;  %2785 = vmatpush1.msra.mxu1 %v6435_v29 }
 0x951   :  { %2715 = vmatprep.subr.mxu0 %v6442_v3  ;;  %2786 = vmatprep.subr.mxu1 %v6447_v4 }
 0x952   :  { %2716 = vmatpush1.msra.mxu0 %v6454_v2  ;;  %2787 = vmatpush1.msra.mxu1 %v6459_v28 }
 0x953   :  { %2717 = vmatprep.subr.mxu0 %v6466_v30  ;;  %2788 = vmatprep.subr.mxu1 %v6471_v31 }
 0x954   :  { %2718 = vmatpush1.msra.mxu0 %v6478_v32  ;;  %2789 = vmatpush1.msra.mxu1 %v6483_v56 }
 0x955   :  { %2719 = vmatprep.subr.mxu0 %v6490_v8  ;;  %2790 = vmatprep.subr.mxu1 %v6495_v9 }
 0x956   :  { %2720 = vmatpush1.msra.mxu0 %v6502_v10  ;;  %2791 = vmatpush1.msra.mxu1 %v6507_v12 }
 0x957   :  { %2721 = vmatprep.subr.mxu0 %v6514_v13  ;;  %2792 = vmatprep.subr.mxu1 %v6519_v14 }
 0x958   :  { %2722 = vmatpush1.msra.mxu0 %v6526_v15  ;;  %2793 = vmatpush1.msra.mxu1 %v6531_v16 }
 0x959   :  { %2723 = vmatprep.subr.mxu0 %v6538_v17  ;;  %2794 = vmatprep.subr.mxu1 %v6543_v18 }
 0x95a   :  { %2724 = vmatpush1.msra.mxu0 %v6550_v27  ;;  %2795 = vmatpush1.msra.mxu1 %v6555_v23 }
 0x95b   :  { %2725 = vmatprep.subr.mxu0 %v8289_v19  ;;  %2796 = vmatprep.subr.mxu1 %v8290_v26  ;;  %v8316_v19 = vld [vmem:[#allocation13_spill] sm:$0xff] }
 0x95c   :  { %2726 = vmatpush1.msra.mxu0 %v8291_v63  ;;  %2797 = vmatpush1.msra.mxu1 %v8292_v21  ;;  %v8314_v63 = vld [vmem:[#allocation57_spill] sm:$0xff] }
 0x95d   :  { %2727 = vmatprep.subr.mxu0 %v8293_v6  ;;  %2798 = vmatprep.subr.mxu1 %v8294_v24 }
 0x95e   :  { %2728 = vmatpush1.msra.mxu0 %v8295_v46  ;;  %2799 = vmatpush1.msra.mxu1 %v8296_v59  ;;  %v8306_v46 = vld [vmem:[#allocation9_spill] sm:$0xff]  ;;  %v8307_v59 = vld [vmem:[#allocation10_spill] sm:$0xff] }
 0x95f   :  { %2729 = vmatprep.subr.mxu0 %v8297_v5  ;;  %2800 = vmatprep.subr.mxu1 %v8298_v33  ;;  %v8308_v5 = vmov 0.0   ;;  %v8309_v33 = vld [vmem:[#allocation11_spill] sm:$0xff] }
 0x960   :  { %2730 = vmatpush1.msra.mxu0 %v8299_v7  ;;  %2801 = vmatpush1.msra.mxu1 %v8300_v45  ;;  %v8310_v45 = vld [vmem:[#allocation31_spill] sm:$0xff] }
 0x961   :  { %2731 = vmatprep.subr.mxu0 %v8301_v34  ;;  %2802 = vmatprep.subr.mxu1 %v8302_v49  ;;  %v8311_v34 = vld [vmem:[#allocation33_spill] sm:$0xff] }
 0x962   :  { %2732 = vmatpush1.msra.mxu0 %v8303_v48  ;;  %2803 = vmatpush1.msra.mxu1 %v8304_v22  ;;  %v8312_v48 = vld [vmem:[#allocation12_spill] sm:$0xff] }
 0x963   :  { %2733 = vmatprep.subr.mxu0 %v8305_v1  ;;  %2804 = vmatprep.subr.mxu1 %v8306_v46  ;;  %v2090_v49 = vadd.f32 %v8312_v48, %v6812_v52  ;;  %v8313_v1 = vld [vmem:[#allocation14_spill] sm:$0xff]  ;;  %v2203_v48 = vadd.f32 %v8316_v19, %v6837_v53 }
 0x964   :  { %2734 = vmatpush1.msra.mxu0 %v8307_v59  ;;  %2767 = vmatprep.mubr.f32.mxu0 %v8308_v5  ;;  %v2092_v7 = vadd.f32 %v8313_v1, %v6820_v25 }
 0x965   :  { %2805 = vmatpush1.msra.mxu1 %v8309_v33  ;;  %2838 = vmatprep.mubr.f32.mxu1 %v8308_v5 }
 0x966   :  { %2884 = vmatprep.subr.mxu0 %v8310_v45  ;;  %2955 = vmatprep.subr.mxu1 %v8311_v34  ;;  %v8315_v45 = vld [vmem:[#allocation15_spill] sm:$0xff] }
 0x967   :  { %v2205_v26 = vadd.f32 %v8315_v45, %v8314_v63 }
 0xa05   :  { %v2588_v22 = vpop.f32.mrf.mxu0  ;;  %v2659_v21 = vpop.f32.mrf.mxu1 }
 0xa06   :  { %v2664_v46 = vadd.f32 %v2588_v22, %v2090_v49  ;;  %v2666_v52 = vadd.f32 %v2659_v21, %v2203_v48 }
 0xa07   :  { %v2590_v24 = vpop.f32.mrf.mxu0  ;;  %v2661_v5 = vpop.f32.mrf.mxu1 }
 0xa08   :  { %v3920_v59 = vmul.f32 -1.442695, %v2664_v46  ;;  %v2665_v6 = vadd.f32 %v2590_v24, %v2092_v7  ;;  %v2667_v34 = vadd.f32 %v2661_v5, %v2205_v26 }
 0xa0a   :  { %4148 = vpow2.f32 %v3920_v59  ;;  %v3921_v33 = vmul.f32 -1.442695, %v2665_v6  ;;  %v3922_v23 = vmul.f32 -1.442695, %v2667_v34 }
 0xa0c   :  { %4150 = vpow2.f32 %v3921_v33 }
 0xa0d   :  { %4152 = vtanh.f32 %v2666_v52 }
 0xa0e   :  { %4154 = vpow2.f32 %v3922_v23 }
 0xa17   :  { %v4149_v27 = vpop.eup %4148 }
 0xa18   :  { %v2671_v1 = vadd.f32 1.0, %v4149_v27  ;;  %v3923_v27 = vld [vmem:[%s7784_s1 + $0x8] sm:$0xff] }
 0xa19   :  { %v4151_v49 = vpop.eup %4150 }
 0xa1a   :  { %4156 = vrcp.f32 %v2671_v1  ;;  %v2677_v24 = vadd.f32 1.0, %v4151_v49  ;;  %v4153_v6 = vpop.eup %4152 }
 0xa1b   :  { %v4155_v46 = vpop.eup %4154 }
 0xa1c   :  { %4158 = vrcp.f32 %v2677_v24  ;;  %v2684_v45 = vadd.f32 1.0, %v4155_v46 }
 0xa1e   :  { %4160 = vrcp.f32 %v2684_v45 }
 0xa27   :  { %v4157_v59 = vpop.eup %4156 }
 0xa28   :  { %v2688_v33 = vmul.f32 %v4157_v59, %v4153_v6 }
 0xa29   :  { %v4159_v7 = vpop.eup %4158 }
 0xa2a   :  { %v2687_v26 = vmul.f32 %v4159_v7, %v6843_v55 }
 0xa2b   :  { %v4161_v21 = vpop.eup %4160 }
 0xa2c   :  { %v2689_v5 = vadd.f32 %v2688_v33, %v2687_v26  ;;  %v8345_v33 = vld [vmem:[#allocation19_spill] sm:$0xff]  ;;  %v8346_v26 = vld [vmem:[#allocation17_spill] sm:$0xff] }
 0xa2d   :  { %v2211_v7 = vadd.f32 %v8345_v33, %v8314_v63 }
 0xa2e   :  { %4162 = vtanh.f32 %v2689_v5  ;;  %v2693_v23 = vsub.f32 %v2689_v5, %v6843_v55  ;;  %v2209_v5 = vadd.f32 %v8346_v26, %v6837_v53  ;;  %v7046_v26 = vld [vmem:[%s7786_s5 + $0x1d8] sm:$0xff] }
 0xa30   :  { %v2694_v52 = vmul.f32 %v3923_v27, %v2693_v23 }
 0xa32   :  { %v6929_v19 = vadd.f32 %v2694_v52, %v6843_v55 }
 0xa3b   :  { %v4163_v34 = vpop.eup %4162 }
 0xa3c   :  { %v2691_v22 = vmul.f32 %v4163_v34, %v4161_v21 }
 0xa3e   :  { %v2696_v48 = vsub.f32 %v2691_v22, %v6845_v50 }
 0xa40   :  { %v2697_v1 = vmul.f32 %v3923_v27, %v2696_v48 }
 0xa42   :  { %v6933_v49 = vadd.f32 %v2697_v1, %v6845_v50 }
 0xa44   :  { %2768 = vmatmul.mubr.f32.vlgmr.msra.gmra.mxu0 %v6933_v49  ;;  %2839 = vmatmul.mubr.f32.vlgmr.msra.gmra.mxu1 %v6933_v49 }
 0xa45   :  { %2885 = vmatpush1.msra.mxu0 %v6310_v51  ;;  %2956 = vmatpush1.msra.mxu1 %v6315_v35  ;;  %v8317_v51 = vld [vmem:[#allocation34_spill] sm:$0xff]  ;;  %v8318_v35 = vld [vmem:[#allocation32_spill] sm:$0xff] }
 0xa46   :  { %2886 = vmatprep.subr.mxu0 %v6322_v36  ;;  %2957 = vmatprep.subr.mxu1 %v6327_v37  ;;  %v8319_v36 = vld [vmem:[#allocation35_spill] sm:$0xff]  ;;  %v8320_v37 = vld [vmem:[#allocation37_spill] sm:$0xff] }
 0xa47   :  { %2887 = vmatpush1.msra.mxu0 %v6334_v39  ;;  %2958 = vmatpush1.msra.mxu1 %v6339_v40  ;;  %v8321_v39 = vld [vmem:[#allocation38_spill] sm:$0xff]  ;;  %v8322_v40 = vld [vmem:[#allocation36_spill] sm:$0xff] }
 0xa48   :  { %2888 = vmatprep.subr.mxu0 %v6346_v41  ;;  %2959 = vmatprep.subr.mxu1 %v6351_v42  ;;  %v8323_v41 = vld [vmem:[#allocation5_spill] sm:$0xff] }
 0xa49   :  { %2889 = vmatpush1.msra.mxu0 %v6358_v43  ;;  %2960 = vmatpush1.msra.mxu1 %v6363_v44  ;;  %v8324_v42 = vld [vmem:[#allocation29_spill] sm:$0xff]  ;;  %v8325_v43 = vld [vmem:[#allocation30_spill] sm:$0xff]  ;;  %v8326_v44 = vld [vmem:[#allocation39_spill] sm:$0xff] }
 0xa4a   :  { %2890 = vmatprep.subr.mxu0 %v6370_v47  ;;  %2961 = vmatprep.subr.mxu1 %v6375_v60  ;;  %v8327_v47 = vld [vmem:[#allocation41_spill] sm:$0xff]  ;;  %v8328_v60 = vld [vmem:[#allocation42_spill] sm:$0xff] }
 0xa4b   :  { %2891 = vmatpush1.msra.mxu0 %v6382_v58  ;;  %2962 = vmatpush1.msra.mxu1 %v6387_v57  ;;  %v8329_v58 = vld [vmem:[#allocation40_spill] sm:$0xff]  ;;  %v8330_v57 = vld [vmem:[#allocation7_spill] sm:$0xff] }
 0xa4c   :  { %2892 = vmatprep.subr.mxu0 %v6394_v0  ;;  %2963 = vmatprep.subr.mxu1 %v6399_v54  ;;  %v8331_v0 = vld [vmem:[#allocation8_spill] sm:$0xff]  ;;  %v8332_v54 = vld [vmem:[#allocation43_spill] sm:$0xff] }
 0xa4d   :  { %2893 = vmatpush1.msra.mxu0 %v6406_v62  ;;  %2964 = vmatpush1.msra.mxu1 %v6411_v20  ;;  %v8333_v62 = vld [vmem:[#allocation45_spill] sm:$0xff]  ;;  %v8334_v20 = vld [vmem:[#allocation46_spill] sm:$0xff] }
 0xa4e   :  { %2894 = vmatprep.subr.mxu0 %v6418_v61  ;;  %2965 = vmatprep.subr.mxu1 %v6423_v38  ;;  %v8335_v61 = vld [vmem:[#allocation44_spill] sm:$0xff]  ;;  %v8336_v38 = vld [vmem:[#allocation9_spill] sm:$0xff] }
 0xa4f   :  { %2895 = vmatpush1.msra.mxu0 %v6430_v11  ;;  %2966 = vmatpush1.msra.mxu1 %v6435_v29  ;;  %v8337_v11 = vld [vmem:[#allocation10_spill] sm:$0xff]  ;;  %v8338_v29 = vmov 0.0  }
 0xa50   :  { %2896 = vmatprep.subr.mxu0 %v6442_v3  ;;  %2967 = vmatprep.subr.mxu1 %v6447_v4  ;;  %v8339_v3 = vld [vmem:[#allocation11_spill] sm:$0xff] }
 0xa51   :  { %2897 = vmatpush1.msra.mxu0 %v6454_v2  ;;  %2968 = vmatpush1.msra.mxu1 %v6459_v28  ;;  %v8340_v4 = vld [vmem:[#allocation31_spill] sm:$0xff]  ;;  %v8341_v2 = vld [vmem:[#allocation33_spill] sm:$0xff] }
 0xa52   :  { %2898 = vmatprep.subr.mxu0 %v6466_v30  ;;  %2969 = vmatprep.subr.mxu1 %v6471_v31  ;;  %v8342_v28 = vld [vmem:[#allocation51_spill] sm:$0xff]  ;;  %v8343_v30 = vld [vmem:[#allocation16_spill] sm:$0xff] }
 0xa53   :  { %2899 = vmatpush1.msra.mxu0 %v6478_v32  ;;  %2970 = vmatpush1.msra.mxu1 %v6483_v56  ;;  %v2096_v31 = vadd.f32 %v8343_v30, %v8342_v28  ;;  %v8344_v56 = vld [vmem:[#allocation18_spill] sm:$0xff] }
 0xa54   :  { %2900 = vmatprep.subr.mxu0 %v6490_v8  ;;  %2971 = vmatprep.subr.mxu1 %v6495_v9  ;;  %v2098_v8 = vadd.f32 %v8344_v56, %v6820_v25 }
 0xa55   :  { %2901 = vmatpush1.msra.mxu0 %v6502_v10  ;;  %2972 = vmatpush1.msra.mxu1 %v6507_v12 }
 0xa56   :  { %2902 = vmatprep.subr.mxu0 %v6514_v13  ;;  %2973 = vmatprep.subr.mxu1 %v6519_v14 }
 0xa57   :  { %2903 = vmatpush1.msra.mxu0 %v6526_v15  ;;  %2974 = vmatpush1.msra.mxu1 %v6531_v16 }
 0xa58   :  { %2904 = vmatprep.subr.mxu0 %v6538_v17  ;;  %2975 = vmatprep.subr.mxu1 %v6543_v18 }
 0xa59   :  { %2905 = vmatpush1.msra.mxu0 %v8317_v51  ;;  %2976 = vmatpush1.msra.mxu1 %v8318_v35 }
 0xa5a   :  { %2906 = vmatprep.subr.mxu0 %v8319_v36  ;;  %2977 = vmatprep.subr.mxu1 %v8320_v37 }
 0xa5b   :  { %2907 = vmatpush1.msra.mxu0 %v8321_v39  ;;  %2978 = vmatpush1.msra.mxu1 %v8322_v40 }
 0xa5c   :  { %2908 = vmatprep.subr.mxu0 %v8323_v41  ;;  %2979 = vmatprep.subr.mxu1 %v8324_v42 }
 0xa5d   :  { %2909 = vmatpush1.msra.mxu0 %v8325_v43  ;;  %2980 = vmatpush1.msra.mxu1 %v8326_v44 }
 0xa5e   :  { %2910 = vmatprep.subr.mxu0 %v8327_v47  ;;  %2981 = vmatprep.subr.mxu1 %v8328_v60 }
 0xa5f   :  { %2911 = vmatpush1.msra.mxu0 %v8329_v58  ;;  %2982 = vmatpush1.msra.mxu1 %v8330_v57 }
 0xa60   :  { %2912 = vmatprep.subr.mxu0 %v8331_v0  ;;  %2983 = vmatprep.subr.mxu1 %v8332_v54 }
 0xa61   :  { %2913 = vmatpush1.msra.mxu0 %v8333_v62  ;;  %2984 = vmatpush1.msra.mxu1 %v8334_v20 }
 0xa62   :  { %2914 = vmatprep.subr.mxu0 %v8335_v61  ;;  %2985 = vmatprep.subr.mxu1 %v8336_v38 }
 0xa63   :  { %2915 = vmatpush1.msra.mxu0 %v8337_v11  ;;  %2948 = vmatprep.mubr.f32.mxu0 %v8338_v29 }
 0xa64   :  { %2986 = vmatpush1.msra.mxu1 %v8339_v3  ;;  %3019 = vmatprep.mubr.f32.mxu1 %v8338_v29 }
 0xa65   :  { %3065 = vmatprep.subr.mxu0 %v8340_v4  ;;  %3136 = vmatprep.subr.mxu1 %v8341_v2 }
 0xb04   :  { %v2769_v32 = vpop.f32.mrf.mxu0  ;;  %v2840_v6 = vpop.f32.mrf.mxu1 }
 0xb05   :  { %v2845_v9 = vadd.f32 %v2769_v32, %v2096_v31  ;;  %v2847_v27 = vadd.f32 %v2840_v6, %v2209_v5  ;;  %v7052_v5 = vld [vmem:[%s7786_s5 + $0x1c0] sm:$0xff] }
 0xb06   :  { %v2771_v55 = vpop.f32.mrf.mxu0  ;;  %v2842_v59 = vpop.f32.mrf.mxu1 }
 0xb07   :  { %v3924_v50 = vmul.f32 -1.442695, %v2845_v9  ;;  %v2846_v24 = vadd.f32 %v2771_v55, %v2098_v8  ;;  %v2848_v45 = vadd.f32 %v2842_v59, %v2211_v7  ;;  %v3927_v8 = vld [vmem:[%s7784_s1 + $0x10] sm:$0xff] }
 0xb09   :  { %4164 = vpow2.f32 %v3924_v50  ;;  %v3925_v46 = vmul.f32 -1.442695, %v2846_v24  ;;  %v3926_v23 = vmul.f32 -1.442695, %v2848_v45  ;;  %v7028_v45 = vld [vmem:[%s7786_s5 + $0x1e0] sm:$0xff] }
 0xb0b   :  { %4166 = vpow2.f32 %v3925_v46 }
 0xb0c   :  { %4168 = vtanh.f32 %v2847_v27  ;;  %v7058_v27 = vld [vmem:[%s7786_s5 + $0x1d0] sm:$0xff] }
 0xb0d   :  { %4170 = vpow2.f32 %v3926_v23  ;;  %v7064_v23 = vld [vmem:[%s7786_s5 + $0x1a8] sm:$0xff] }
 0xb16   :  { %v4165_v52 = vpop.eup %4164 }
 0xb17   :  { %v2852_v21 = vadd.f32 1.0, %v4165_v52  ;;  %v7070_v52 = vld [vmem:[%s7786_s5 + $0x1b8] sm:$0xff] }
 0xb18   :  { %v4167_v34 = vpop.eup %4166 }
 0xb19   :  { %4172 = vrcp.f32 %v2852_v21  ;;  %v2858_v22 = vadd.f32 1.0, %v4167_v34  ;;  %v4169_v48 = vpop.eup %4168  ;;  %v7076_v21 = vld [vmem:[%s7786_s5 + $0x1a0] sm:$0xff]  ;;  %v7082_v34 = vld [vmem:[%s7786_s5 + $0x1b0] sm:$0xff] }
 0xb1a   :  { %v4171_v1 = vpop.eup %4170 }
 0xb1b   :  { %4174 = vrcp.f32 %v2858_v22  ;;  %v2865_v31 = vadd.f32 1.0, %v4171_v1  ;;  %v7088_v22 = vld [vmem:[%s7786_s5 + $0x188] sm:$0xff]  ;;  %v7100_v1 = vld [vmem:[%s7786_s5 + $0x180] sm:$0xff] }
 0xb1d   :  { %4176 = vrcp.f32 %v2865_v31  ;;  %v7124_v31 = vld [vmem:[%s7786_s5 + $0x160] sm:$0xff] }
 0xb26   :  { %v4173_v4 = vpop.eup %4172 }
 0xb27   :  { %v2869_v2 = vmul.f32 %v4173_v4, %v4169_v48  ;;  %v7094_v48 = vld [vmem:[%s7786_s5 + $0x198] sm:$0xff]  ;;  %v7106_v4 = vld [vmem:[%s7786_s5 + $0x190] sm:$0xff] }
 0xb28   :  { %v4175_v30 = vpop.eup %4174 }
 0xb29   :  { %v2868_v32 = vmul.f32 %v4175_v30, %v6929_v19  ;;  %v7118_v30 = vld [vmem:[%s7786_s5 + $0x178] sm:$0xff] }
 0xb2a   :  { %v4177_v24 = vpop.eup %4176 }
 0xb2b   :  { %v2870_v56 = vadd.f32 %v2869_v2, %v2868_v32  ;;  %v7112_v2 = vld [vmem:[%s7786_s5 + $0x168] sm:$0xff]  ;;  %v7130_v32 = vld [vmem:[%s7786_s5 + $0x170] sm:$0xff] }
 0xb2d   :  { %4178 = vtanh.f32 %v2870_v56  ;;  %v2874_v9 = vsub.f32 %v2870_v56, %v6929_v19  ;;  %v7136_v56 = vld [vmem:[%s7786_s5 + $0x148] sm:$0xff] }
 0xb2f   :  { %v2875_v55 = vmul.f32 %v3927_v8, %v2874_v9  ;;  %v7148_v9 = vld [vmem:[%s7786_s5 + $0x140] sm:$0xff] }
 0xb31   :  { %v7017_v50 = vadd.f32 %v2875_v55, %v6929_v19  ;;  %v7034_v19 = vld [vmem:[%s7786_s5 + $0x1f0] sm:$0xff] }
 0xb32   :  { %v7154_v55 = vld [vmem:[%s7786_s5 + $0x150] sm:$0xff] }
 0xb3a   :  { %v4179_v6 = vpop.eup %4178 }
 0xb3b   :  { %v2872_v46 = vmul.f32 %v4179_v6, %v4177_v24  ;;  %v7160_v24 = vld [vmem:[%s7786_s5 + $0x128] sm:$0xff]  ;;  %v7166_v6 = vld [vmem:[%s7786_s5 + $0x138] sm:$0xff] }
 0xb3c   :  { %8347 = vst [vmem:[#allocation12_spill] sm:$0xff] %v7166_v6 }
 0xb3d   :  { %v2877_v59 = vsub.f32 %v2872_v46, %v6933_v49  ;;  %v7172_v46 = vld [vmem:[%s7786_s5 + $0x120] sm:$0xff] }
 0xb3e   :  { %8348 = vst [vmem:[#allocation14_spill] sm:$0xff] %v7172_v46 }
 0xb3f   :  { %v2878_v33 = vmul.f32 %v3927_v8, %v2877_v59  ;;  %v7142_v8 = vld [vmem:[%s7786_s5 + $0x158] sm:$0xff]  ;;  %v7178_v59 = vld [vmem:[%s7786_s5 + $0x130] sm:$0xff] }
 0xb40   :  { %8349 = vst [vmem:[#allocation57_spill] sm:$0xff] %v7178_v59 }
 0xb41   :  { %v7021_v7 = vadd.f32 %v2878_v33, %v6933_v49  ;;  %v7040_v49 = vld [vmem:[%s7786_s5 + $0x1c8] sm:$0xff] }
 0xb42   :  { %v7184_v33 = vld [vmem:[%s7786_s5 + $0x108] sm:$0xff] }
 0xb43   :  { %2949 = vmatmul.mubr.f32.vlgmr.msra.gmra.mxu0 %v7021_v7  ;;  %3020 = vmatmul.mubr.f32.vlgmr.msra.gmra.mxu1 %v7021_v7  ;;  %8350 = vst [vmem:[#allocation15_spill] sm:$0xff] %v7184_v33 }
 0xb44   :  { %3066 = vmatpush1.msra.mxu0 %v7028_v45  ;;  %3137 = vmatpush1.msra.mxu1 %v7034_v19 }
 0xb45   :  { %3067 = vmatprep.subr.mxu0 %v7040_v49  ;;  %3138 = vmatprep.subr.mxu1 %v7046_v26 }
 0xb46   :  { %3068 = vmatpush1.msra.mxu0 %v7052_v5  ;;  %3139 = vmatpush1.msra.mxu1 %v7058_v27 }
 0xb47   :  { %3069 = vmatprep.subr.mxu0 %v7064_v23  ;;  %3140 = vmatprep.subr.mxu1 %v7070_v52 }
 0xb48   :  { %3070 = vmatpush1.msra.mxu0 %v7076_v21  ;;  %3141 = vmatpush1.msra.mxu1 %v7082_v34 }
 0xb49   :  { %3071 = vmatprep.subr.mxu0 %v7088_v22  ;;  %3142 = vmatprep.subr.mxu1 %v7094_v48 }
 0xb4a   :  { %3072 = vmatpush1.msra.mxu0 %v7100_v1  ;;  %3143 = vmatpush1.msra.mxu1 %v7106_v4 }
 0xb4b   :  { %3073 = vmatprep.subr.mxu0 %v7112_v2  ;;  %3144 = vmatprep.subr.mxu1 %v7118_v30 }
 0xb4c   :  { %3074 = vmatpush1.msra.mxu0 %v7124_v31  ;;  %3145 = vmatpush1.msra.mxu1 %v7130_v32 }
 0xb4d   :  { %3075 = vmatprep.subr.mxu0 %v7136_v56  ;;  %3146 = vmatprep.subr.mxu1 %v7142_v8 }
 0xb4e   :  { %3076 = vmatpush1.msra.mxu0 %v7148_v9  ;;  %3147 = vmatpush1.msra.mxu1 %v7154_v55 }
 0xb4f   :  { %3077 = vmatprep.subr.mxu0 %v7160_v24  ;;  %3148 = vmatprep.subr.mxu1 %v7166_v6  ;;  %v7190_v6 = vld [vmem:[%s7786_s5 + $0x118] sm:$0xff] }
 0xb50   :  { %3078 = vmatpush1.msra.mxu0 %v7172_v46  ;;  %3149 = vmatpush1.msra.mxu1 %v7178_v59  ;;  %8351 = vst [vmem:[#allocation13_spill] sm:$0xff] %v7190_v6  ;;  %v7196_v46 = vld [vmem:[%s7786_s5 + $0x100] sm:$0xff]  ;;  %v7202_v59 = vld [vmem:[%s7786_s5 + $0x110] sm:$0xff] }
 0xb51   :  { %3079 = vmatprep.subr.mxu0 %v7184_v33  ;;  %3150 = vmatprep.subr.mxu1 %v7190_v6  ;;  %v7208_v33 = vld [vmem:[%s7786_s5 + $0xe8] sm:$0xff]  ;;  %v7214_v6 = vld [vmem:[%s7786_s5 + $0xf8] sm:$0xff] }
 0xb52   :  { %3080 = vmatpush1.msra.mxu0 %v7196_v46  ;;  %3151 = vmatpush1.msra.mxu1 %v7202_v59 }
 0xb53   :  { %3081 = vmatprep.subr.mxu0 %v7208_v33  ;;  %3152 = vmatprep.subr.mxu1 %v7214_v6 }
 0xb54   :  { %3082 = vmatpush1.msra.mxu0 %v6502_v10  ;;  %3153 = vmatpush1.msra.mxu1 %v6507_v12  ;;  %v7252_v10 = vld [vmem:[%s7786_s5 + $0x1e8] sm:$0xff]  ;;  %v7258_v12 = vld [vmem:[%s7786_s5 + $0x1f8] sm:$0xff] }
 0xb55   :  { %3083 = vmatprep.subr.mxu0 %v6514_v13  ;;  %3154 = vmatprep.subr.mxu1 %v6519_v14  ;;  %8352 = vst [vmem:[#allocation34_spill] sm:$0xff] %v7252_v10  ;;  %8353 = vst [vmem:[#allocation32_spill] sm:$0xff] %v7258_v12  ;;  %v8354_v13 = vld [vmem:[#allocation20_spill] sm:$0xff] }
 0xb56   :  { %3084 = vmatpush1.msra.mxu0 %v6526_v15  ;;  %3155 = vmatpush1.msra.mxu1 %v6531_v16  ;;  %v2102_v14 = vadd.f32 %v8354_v13, %v8342_v28  ;;  %v8355_v16 = vld [vmem:[#allocation22_spill] sm:$0xff] }
 0xb57   :  { %3085 = vmatprep.subr.mxu0 %v6538_v17  ;;  %3156 = vmatprep.subr.mxu1 %v6543_v18  ;;  %v2104_v17 = vadd.f32 %v8355_v16, %v6820_v25  ;;  %v3931_v16 = vld [vmem:[%s7784_s1 + $0x18] sm:$0xff] }
 0xb58   :  { %3086 = vmatpush1.msra.mxu0 %v8317_v51  ;;  %3157 = vmatpush1.msra.mxu1 %v8318_v35 }
 0xb59   :  { %3087 = vmatprep.subr.mxu0 %v8319_v36  ;;  %3158 = vmatprep.subr.mxu1 %v8320_v37 }
 0xb5a   :  { %3088 = vmatpush1.msra.mxu0 %v8321_v39  ;;  %3159 = vmatpush1.msra.mxu1 %v8322_v40 }
 0xb5b   :  { %3089 = vmatprep.subr.mxu0 %v8323_v41  ;;  %3160 = vmatprep.subr.mxu1 %v8324_v42  ;;  %v8356_v41 = vld [vmem:[#allocation23_spill] sm:$0xff] }
 0xb5c   :  { %3090 = vmatpush1.msra.mxu0 %v8325_v43  ;;  %3161 = vmatpush1.msra.mxu1 %v8326_v44  ;;  %v2217_v42 = vadd.f32 %v8356_v41, %v8314_v63  ;;  %v8357_v44 = vld [vmem:[#allocation21_spill] sm:$0xff] }
 0xb5d   :  { %3091 = vmatprep.subr.mxu0 %v8327_v47  ;;  %3162 = vmatprep.subr.mxu1 %v8328_v60  ;;  %v2215_v47 = vadd.f32 %v8357_v44, %v6837_v53  ;;  %v8362_v44 = vld [vmem:[#allocation13_spill] sm:$0xff] }
 0xb5e   :  { %3092 = vmatpush1.msra.mxu0 %v8329_v58  ;;  %3163 = vmatpush1.msra.mxu1 %v8330_v57 }
 0xb5f   :  { %3093 = vmatprep.subr.mxu0 %v8331_v0  ;;  %3164 = vmatprep.subr.mxu1 %v8332_v54 }
 0xb60   :  { %3094 = vmatpush1.msra.mxu0 %v8333_v62  ;;  %3165 = vmatpush1.msra.mxu1 %v8334_v20 }
 0xb61   :  { %3095 = vmatprep.subr.mxu0 %v8335_v61  ;;  %3166 = vmatprep.subr.mxu1 %v8336_v38 }
 0xb62   :  { %3096 = vmatpush1.msra.mxu0 %v8337_v11  ;;  %3129 = vmatprep.mubr.f32.mxu0 %v8338_v29 }
 0xb63   :  { %3167 = vmatpush1.msra.mxu1 %v8339_v3  ;;  %3200 = vmatprep.mubr.f32.mxu1 %v8338_v29 }
 0xb64   :  { %3246 = vmatprep.subr.mxu0 %v7252_v10  ;;  %3317 = vmatprep.subr.mxu1 %v7258_v12 }
 0xc03   :  { %v2950_v15 = vpop.f32.mrf.mxu0  ;;  %v3021_v37 = vpop.f32.mrf.mxu1 }
 0xc04   :  { %v3026_v18 = vadd.f32 %v2950_v15, %v2102_v14  ;;  %v3028_v60 = vadd.f32 %v3021_v37, %v2215_v47  ;;  %v7318_v47 = vld [vmem:[%s7786_s5 + $0xe0] sm:$0xff] }
 0xc05   :  { %v2952_v51 = vpop.f32.mrf.mxu0  ;;  %v3023_v40 = vpop.f32.mrf.mxu1 }
 0xc06   :  { %v3928_v35 = vmul.f32 -1.442695, %v3026_v18  ;;  %v3027_v36 = vadd.f32 %v2952_v51, %v2104_v17  ;;  %v3029_v43 = vadd.f32 %v3023_v40, %v2217_v42  ;;  %v8360_v42 = vld [vmem:[#allocation57_spill] sm:$0xff] }
 0xc08   :  { %4180 = vpow2.f32 %v3928_v35  ;;  %v3929_v39 = vmul.f32 -1.442695, %v3027_v36  ;;  %v3930_v58 = vmul.f32 -1.442695, %v3029_v43  ;;  %v8361_v43 = vld [vmem:[#allocation15_spill] sm:$0xff] }
 0xc0a   :  { %4182 = vpow2.f32 %v3929_v39 }
 0xc0b   :  { %4184 = vtanh.f32 %v3028_v60  ;;  %v7324_v60 = vld [vmem:[%s7786_s5 + $0xf0] sm:$0xff] }
 0xc0c   :  { %4186 = vpow2.f32 %v3930_v58  ;;  %v7330_v58 = vld [vmem:[%s7786_s5 + $0xc8] sm:$0xff] }
 0xc15   :  { %v4181_v57 = vpop.eup %4180 }
 0xc16   :  { %v3033_v0 = vadd.f32 1.0, %v4181_v57  ;;  %v7336_v57 = vld [vmem:[%s7786_s5 + $0xd8] sm:$0xff] }
 0xc17   :  { %v4183_v54 = vpop.eup %4182 }
 0xc18   :  { %4188 = vrcp.f32 %v3033_v0  ;;  %v3039_v62 = vadd.f32 1.0, %v4183_v54  ;;  %v4185_v20 = vpop.eup %4184  ;;  %v7342_v0 = vld [vmem:[%s7786_s5 + $0xc0] sm:$0xff]  ;;  %v7348_v54 = vld [vmem:[%s7786_s5 + $0xd0] sm:$0xff] }
 0xc19   :  { %v4187_v61 = vpop.eup %4186 }
 0xc1a   :  { %4190 = vrcp.f32 %v3039_v62  ;;  %v3046_v13 = vadd.f32 1.0, %v4187_v61  ;;  %v7354_v62 = vld [vmem:[%s7786_s5 + $0xa8] sm:$0xff]  ;;  %v7366_v61 = vld [vmem:[%s7786_s5 + $0xa0] sm:$0xff] }
 0xc1b   :  { %8363 = vst [vmem:[#allocation35_spill] sm:$0xff] %v7366_v61 }
 0xc1c   :  { %4192 = vrcp.f32 %v3046_v13  ;;  %v7390_v13 = vld [vmem:[%s7786_s5 + $0x80] sm:$0xff] }
 0xc1d   :  { %8367 = vst [vmem:[#allocation5_spill] sm:$0xff] %v7390_v13 }
 0xc25   :  { %v4189_v38 = vpop.eup %4188 }
 0xc26   :  { %v3050_v11 = vmul.f32 %v4189_v38, %v4185_v20  ;;  %v7360_v20 = vld [vmem:[%s7786_s5 + $0xb8] sm:$0xff]  ;;  %v7372_v38 = vld [vmem:[%s7786_s5 + $0xb0] sm:$0xff] }
 0xc27   :  { %v4191_v3 = vpop.eup %4190  ;;  %8364 = vst [vmem:[#allocation37_spill] sm:$0xff] %v7372_v38 }
 0xc28   :  { %v3049_v14 = vmul.f32 %v4191_v3, %v7017_v50  ;;  %v7384_v3 = vld [vmem:[%s7786_s5 + $0x98] sm:$0xff] }
 0xc29   :  { %v4193_v35 = vpop.eup %4192  ;;  %8366 = vst [vmem:[#allocation36_spill] sm:$0xff] %v7384_v3 }
 0xc2a   :  { %v3051_v15 = vadd.f32 %v3050_v11, %v3049_v14  ;;  %v7378_v11 = vld [vmem:[%s7786_s5 + $0x88] sm:$0xff]  ;;  %v7396_v14 = vld [vmem:[%s7786_s5 + $0x90] sm:$0xff] }
 0xc2b   :  { %8365 = vst [vmem:[#allocation38_spill] sm:$0xff] %v7378_v11  ;;  %8368 = vst [vmem:[#allocation29_spill] sm:$0xff] %v7396_v14 }
 0xc2c   :  { %4194 = vtanh.f32 %v3051_v15  ;;  %v3055_v17 = vsub.f32 %v3051_v15, %v7017_v50  ;;  %v7402_v15 = vld [vmem:[%s7786_s5 + $0x68] sm:$0xff] }
 0xc2d   :  { %8369 = vst [vmem:[#allocation30_spill] sm:$0xff] %v7402_v15 }
 0xc2e   :  { %v3056_v18 = vmul.f32 %v3931_v16, %v3055_v17  ;;  %v7414_v17 = vld [vmem:[%s7786_s5 + $0x60] sm:$0xff] }
 0xc2f   :  { %8371 = vst [vmem:[#allocation41_spill] sm:$0xff] %v7414_v17 }
 0xc30   :  { %v7275_v51 = vadd.f32 %v3056_v18, %v7017_v50  ;;  %v8358_v50 = vld [vmem:[#allocation12_spill] sm:$0xff]  ;;  %v7420_v18 = vld [vmem:[%s7786_s5 + $0x70] sm:$0xff] }
 0xc31   :  { %8372 = vst [vmem:[#allocation42_spill] sm:$0xff] %v7420_v18 }
 0xc39   :  { %v4195_v36 = vpop.eup %4194 }
 0xc3a   :  { %v3053_v37 = vmul.f32 %v4195_v36, %v4193_v35  ;;  %v7426_v35 = vld [vmem:[%s7786_s5 + $0x48] sm:$0xff]  ;;  %v7432_v36 = vld [vmem:[%s7786_s5 + $0x58] sm:$0xff] }
 0xc3b   :  { %8373 = vst [vmem:[#allocation40_spill] sm:$0xff] %v7426_v35  ;;  %8374 = vst [vmem:[#allocation7_spill] sm:$0xff] %v7432_v36 }
 0xc3c   :  { %v3058_v39 = vsub.f32 %v3053_v37, %v7021_v7  ;;  %v7438_v37 = vld [vmem:[%s7786_s5 + $0x40] sm:$0xff] }
 0xc3d   :  { %8375 = vst [vmem:[#allocation8_spill] sm:$0xff] %v7438_v37 }
 0xc3e   :  { %v3059_v40 = vmul.f32 %v3931_v16, %v3058_v39  ;;  %v7408_v16 = vld [vmem:[%s7786_s5 + $0x78] sm:$0xff]  ;;  %v7444_v39 = vld [vmem:[%s7786_s5 + $0x50] sm:$0xff] }
 0xc3f   :  { %8370 = vst [vmem:[#allocation39_spill] sm:$0xff] %v7408_v16  ;;  %8376 = vst [vmem:[#allocation43_spill] sm:$0xff] %v7444_v39 }
 0xc40   :  { %v7279_v41 = vadd.f32 %v3059_v40, %v7021_v7  ;;  %v8359_v7 = vld [vmem:[#allocation14_spill] sm:$0xff]  ;;  %v7450_v40 = vld [vmem:[%s7786_s5 + $0x28] sm:$0xff] }
 0xc41   :  { %8377 = vst [vmem:[#allocation45_spill] sm:$0xff] %v7450_v40 }
 0xc42   :  { %3130 = vmatmul.mubr.f32.vlgmr.msra.gmra.mxu0 %v7279_v41  ;;  %3201 = vmatmul.mubr.f32.vlgmr.msra.gmra.mxu1 %v7279_v41 }
 0xc43   :  { %3247 = vmatpush1.msra.mxu0 %v7028_v45  ;;  %3318 = vmatpush1.msra.mxu1 %v7034_v19 }
 0xc44   :  { %3248 = vmatprep.subr.mxu0 %v7040_v49  ;;  %3319 = vmatprep.subr.mxu1 %v7046_v26 }
 0xc45   :  { %3249 = vmatpush1.msra.mxu0 %v7052_v5  ;;  %3320 = vmatpush1.msra.mxu1 %v7058_v27 }
 0xc46   :  { %3250 = vmatprep.subr.mxu0 %v7064_v23  ;;  %3321 = vmatprep.subr.mxu1 %v7070_v52 }
 0xc47   :  { %3251 = vmatpush1.msra.mxu0 %v7076_v21  ;;  %3322 = vmatpush1.msra.mxu1 %v7082_v34 }
 0xc48   :  { %3252 = vmatprep.subr.mxu0 %v7088_v22  ;;  %3323 = vmatprep.subr.mxu1 %v7094_v48 }
 0xc49   :  { %3253 = vmatpush1.msra.mxu0 %v7100_v1  ;;  %3324 = vmatpush1.msra.mxu1 %v7106_v4 }
 0xc4a   :  { %3254 = vmatprep.subr.mxu0 %v7112_v2  ;;  %3325 = vmatprep.subr.mxu1 %v7118_v30 }
 0xc4b   :  { %3255 = vmatpush1.msra.mxu0 %v7124_v31  ;;  %3326 = vmatpush1.msra.mxu1 %v7130_v32 }
 0xc4c   :  { %3256 = vmatprep.subr.mxu0 %v7136_v56  ;;  %3327 = vmatprep.subr.mxu1 %v7142_v8 }
 0xc4d   :  { %3257 = vmatpush1.msra.mxu0 %v7148_v9  ;;  %3328 = vmatpush1.msra.mxu1 %v7154_v55 }
 0xc4e   :  { %3258 = vmatprep.subr.mxu0 %v7160_v24  ;;  %3329 = vmatprep.subr.mxu1 %v8358_v50 }
 0xc4f   :  { %3259 = vmatpush1.msra.mxu0 %v8359_v7  ;;  %3330 = vmatpush1.msra.mxu1 %v8360_v42 }
 0xc50   :  { %3260 = vmatprep.subr.mxu0 %v8361_v43  ;;  %3331 = vmatprep.subr.mxu1 %v8362_v44 }
 0xc51   :  { %3261 = vmatpush1.msra.mxu0 %v7196_v46  ;;  %3332 = vmatpush1.msra.mxu1 %v7202_v59 }
 0xc52   :  { %3262 = vmatprep.subr.mxu0 %v7208_v33  ;;  %3333 = vmatprep.subr.mxu1 %v7214_v6 }
 0xc53   :  { %3263 = vmatpush1.msra.mxu0 %v7318_v47  ;;  %3334 = vmatpush1.msra.mxu1 %v7324_v60 }
 0xc54   :  { %3264 = vmatprep.subr.mxu0 %v7330_v58  ;;  %3335 = vmatprep.subr.mxu1 %v7336_v57 }
 0xc55   :  { %3265 = vmatpush1.msra.mxu0 %v7342_v0  ;;  %3336 = vmatpush1.msra.mxu1 %v7348_v54 }
 0xc56   :  { %3266 = vmatprep.subr.mxu0 %v7354_v62  ;;  %3337 = vmatprep.subr.mxu1 %v7360_v20 }
 0xc57   :  { %3267 = vmatpush1.msra.mxu0 %v7366_v61  ;;  %3338 = vmatpush1.msra.mxu1 %v7372_v38 }
 0xc58   :  { %3268 = vmatprep.subr.mxu0 %v7378_v11  ;;  %3339 = vmatprep.subr.mxu1 %v7384_v3  ;;  %v8388_v11 = vld [vmem:[#allocation25_spill] sm:$0xff] }
 0xc59   :  { %3269 = vmatpush1.msra.mxu0 %v7390_v13  ;;  %3340 = vmatpush1.msra.mxu1 %v7396_v14 }
 0xc5a   :  { %3270 = vmatprep.subr.mxu0 %v7402_v15  ;;  %3341 = vmatprep.subr.mxu1 %v7408_v16 }
 0xc5b   :  { %3271 = vmatpush1.msra.mxu0 %v7414_v17  ;;  %3342 = vmatpush1.msra.mxu1 %v7420_v18 }
 0xc5c   :  { %3272 = vmatprep.subr.mxu0 %v7426_v35  ;;  %3343 = vmatprep.subr.mxu1 %v7432_v36  ;;  %v7456_v36 = vld [vmem:[%s7786_s5 + $0x38] sm:$0xff] }
 0xc5d   :  { %3273 = vmatpush1.msra.mxu0 %v7438_v37  ;;  %3344 = vmatpush1.msra.mxu1 %v7444_v39  ;;  %8378 = vst [vmem:[#allocation46_spill] sm:$0xff] %v7456_v36  ;;  %v7462_v37 = vld [vmem:[%s7786_s5 + $0x20] sm:$0xff]  ;;  %v7468_v39 = vld [vmem:[%s7786_s5 + $0x30] sm:$0xff] }
 0xc5e   :  { %3274 = vmatprep.subr.mxu0 %v7450_v40  ;;  %3345 = vmatprep.subr.mxu1 %v7456_v36  ;;  %8379 = vst [vmem:[#allocation44_spill] sm:$0xff] %v7462_v37  ;;  %8380 = vst [vmem:[#allocation9_spill] sm:$0xff] %v7468_v39  ;;  %v7474_v40 = vld [vmem:[%s7786_s5 + $0x8] sm:$0xff]  ;;  %v7480_v36 = vld [vmem:[%s7786_s5 + $0x18] sm:$0xff] }
 0xc5f   :  { %3275 = vmatpush1.msra.mxu0 %v7462_v37  ;;  %3346 = vmatpush1.msra.mxu1 %v7468_v39  ;;  %8381 = vst [vmem:[#allocation10_spill] sm:$0xff] %v7474_v40  ;;  %8382 = vst [vmem:[#allocation11_spill] sm:$0xff] %v7480_v36  ;;  %v7486_v37 = vld [vmem:[%s7786_s5] sm:$0xff] }
 0xc60   :  { %3276 = vmatprep.subr.mxu0 %v7474_v40  ;;  %3347 = vmatprep.subr.mxu1 %v7480_v36  ;;  %8383 = vst [vmem:[#allocation31_spill] sm:$0xff] %v7486_v37  ;;  %v7493_v40 = vld [vmem:[%s7786_s5 + $0x10] sm:$0xff]  ;;  %v8385_v36 = vld [vmem:[#allocation24_spill] sm:$0xff] }
 0xc61   :  { %3277 = vmatpush1.msra.mxu0 %v7486_v37  ;;  %3310 = vmatprep.mubr.f32.mxu0 %v8338_v29  ;;  %8384 = vst [vmem:[#allocation33_spill] sm:$0xff] %v7493_v40  ;;  %v2108_v39 = vadd.f32 %v8385_v36, %v8342_v28  ;;  %v8386_v37 = vld [vmem:[#allocation26_spill] sm:$0xff]  ;;  %v2221_v36 = vadd.f32 %v8388_v11, %v6837_v53 }
 0xc62   :  { %3348 = vmatpush1.msra.mxu1 %v7493_v40  ;;  %3381 = vmatprep.mubr.f32.mxu1 %v8338_v29  ;;  %v2110_v18 = vadd.f32 %v8386_v37, %v6820_v25 }
 0xc63   :  { %3427 = vmatprep.subr.mxu0 %v7252_v10  ;;  %3498 = vmatprep.subr.mxu1 %v7258_v12  ;;  %v8387_v10 = vld [vmem:[#allocation47_spill] sm:$0xff] }
 0xc64   :  { %v2223_v3 = vadd.f32 %v8387_v10, %v8314_v63 }
 0xd02   :  { %v3131_v35 = vpop.f32.mrf.mxu0  ;;  %v3202_v13 = vpop.f32.mrf.mxu1 }
 0xd03   :  { %v3207_v17 = vadd.f32 %v3131_v35, %v2108_v39  ;;  %v3209_v28 = vadd.f32 %v3202_v13, %v2221_v36 }
 0xd04   :  { %v3133_v16 = vpop.f32.mrf.mxu0  ;;  %v3204_v29 = vpop.f32.mrf.mxu1 }
 0xd05   :  { %v3932_v15 = vmul.f32 -1.442695, %v3207_v17  ;;  %v3208_v14 = vadd.f32 %v3133_v16, %v2110_v18  ;;  %v3210_v12 = vadd.f32 %v3204_v29, %v2223_v3 }
 0xd07   :  { %4196 = vpow2.f32 %v3932_v15  ;;  %v3933_v40 = vmul.f32 -1.442695, %v3208_v14  ;;  %v3934_v38 = vmul.f32 -1.442695, %v3210_v12  ;;  %v3935_v12 = vld [vmem:[%s7784_s1 + $0x20] sm:$0xff] }
 0xd09   :  { %4198 = vpow2.f32 %v3933_v40 }
 0xd0a   :  { %4200 = vtanh.f32 %v3209_v28 }
 0xd0b   :  { %4202 = vpow2.f32 %v3934_v38 }
 0xd14   :  { %v4197_v61 = vpop.eup %4196 }
 0xd15   :  { %v3214_v37 = vadd.f32 1.0, %v4197_v61 }
 0xd16   :  { %v4199_v35 = vpop.eup %4198 }
 0xd17   :  { %4204 = vrcp.f32 %v3214_v37  ;;  %v3220_v15 = vadd.f32 1.0, %v4199_v35  ;;  %v4201_v14 = vpop.eup %4200 }
 0xd18   :  { %v4203_v16 = vpop.eup %4202 }
 0xd19   :  { %4206 = vrcp.f32 %v3220_v15  ;;  %v3227_v10 = vadd.f32 1.0, %v4203_v16  ;;  %v8391_v15 = vld [vmem:[#allocation38_spill] sm:$0xff]  ;;  %v8393_v16 = vld [vmem:[#allocation5_spill] sm:$0xff] }
 0xd1b   :  { %4208 = vrcp.f32 %v3227_v10  ;;  %v8397_v10 = vld [vmem:[#allocation41_spill] sm:$0xff] }
 0xd24   :  { %v4205_v17 = vpop.eup %4204 }
 0xd25   :  { %v3231_v18 = vmul.f32 %v4205_v17, %v4201_v14  ;;  %v8392_v14 = vld [vmem:[#allocation36_spill] sm:$0xff]  ;;  %v8394_v17 = vld [vmem:[#allocation29_spill] sm:$0xff] }
 0xd26   :  { %v4207_v39 = vpop.eup %4206 }
 0xd27   :  { %v3230_v29 = vmul.f32 %v4207_v39, %v7275_v51  ;;  %v8396_v39 = vld [vmem:[#allocation39_spill] sm:$0xff] }
 0xd28   :  { %v4209_v11 = vpop.eup %4208 }
 0xd29   :  { %v3232_v3 = vadd.f32 %v3231_v18, %v3230_v29  ;;  %v8395_v18 = vld [vmem:[#allocation30_spill] sm:$0xff] }
 0xd2a   :  { %v8398_v29 = vld [vmem:[#allocation42_spill] sm:$0xff] }
 0xd2b   :  { %4210 = vtanh.f32 %v3232_v3  ;;  %v3236_v28 = vsub.f32 %v3232_v3, %v7275_v51  ;;  %v8399_v3 = vld [vmem:[#allocation40_spill] sm:$0xff] }
 0xd2d   :  { %v3237_v61 = vmul.f32 %v3935_v12, %v3236_v28  ;;  %v8401_v28 = vld [vmem:[#allocation8_spill] sm:$0xff] }
 0xd2f   :  { %v7513_v38 = vadd.f32 %v3237_v61, %v7275_v51  ;;  %v8389_v51 = vld [vmem:[#allocation35_spill] sm:$0xff] }
 0xd30   :  { %v8402_v61 = vld [vmem:[#allocation43_spill] sm:$0xff] }
 0xd38   :  { %v4211_v13 = vpop.eup %4210 }
 0xd39   :  { %v3234_v40 = vmul.f32 %v4211_v13, %v4209_v11  ;;  %v8403_v11 = vld [vmem:[#allocation45_spill] sm:$0xff]  ;;  %v8404_v13 = vld [vmem:[#allocation46_spill] sm:$0xff] }
 0xd3b   :  { %v3239_v36 = vsub.f32 %v3234_v40, %v7279_v41  ;;  %v8405_v40 = vld [vmem:[#allocation44_spill] sm:$0xff] }
 0xd3d   :  { %v3240_v37 = vmul.f32 %v3935_v12, %v3239_v36  ;;  %v8400_v12 = vld [vmem:[#allocation7_spill] sm:$0xff]  ;;  %v8406_v36 = vld [vmem:[#allocation9_spill] sm:$0xff] }
 0xd3f   :  { %v7517_v35 = vadd.f32 %v3240_v37, %v7279_v41  ;;  %v8390_v41 = vld [vmem:[#allocation37_spill] sm:$0xff]  ;;  %v8407_v37 = vld [vmem:[#allocation10_spill] sm:$0xff] }
 0xd41   :  { %3311 = vmatmul.mubr.f32.vlgmr.msra.gmra.mxu0 %v7517_v35  ;;  %3382 = vmatmul.mubr.f32.vlgmr.msra.gmra.mxu1 %v7517_v35 }
 0xd42   :  { %3428 = vmatpush1.msra.mxu0 %v7028_v45  ;;  %3499 = vmatpush1.msra.mxu1 %v7034_v19 }
 0xd43   :  { %3429 = vmatprep.subr.mxu0 %v7040_v49  ;;  %3500 = vmatprep.subr.mxu1 %v7046_v26 }
 0xd44   :  { %3430 = vmatpush1.msra.mxu0 %v7052_v5  ;;  %3501 = vmatpush1.msra.mxu1 %v7058_v27 }
 0xd45   :  { %3431 = vmatprep.subr.mxu0 %v7064_v23  ;;  %3502 = vmatprep.subr.mxu1 %v7070_v52 }
 0xd46   :  { %3432 = vmatpush1.msra.mxu0 %v7076_v21  ;;  %3503 = vmatpush1.msra.mxu1 %v7082_v34 }
 0xd47   :  { %3433 = vmatprep.subr.mxu0 %v7088_v22  ;;  %3504 = vmatprep.subr.mxu1 %v7094_v48 }
 0xd48   :  { %3434 = vmatpush1.msra.mxu0 %v7100_v1  ;;  %3505 = vmatpush1.msra.mxu1 %v7106_v4 }
 0xd49   :  { %3435 = vmatprep.subr.mxu0 %v7112_v2  ;;  %3506 = vmatprep.subr.mxu1 %v7118_v30 }
 0xd4a   :  { %3436 = vmatpush1.msra.mxu0 %v7124_v31  ;;  %3507 = vmatpush1.msra.mxu1 %v7130_v32 }
 0xd4b   :  { %3437 = vmatprep.subr.mxu0 %v7136_v56  ;;  %3508 = vmatprep.subr.mxu1 %v7142_v8 }
 0xd4c   :  { %3438 = vmatpush1.msra.mxu0 %v7148_v9  ;;  %3509 = vmatpush1.msra.mxu1 %v7154_v55 }
 0xd4d   :  { %3439 = vmatprep.subr.mxu0 %v7160_v24  ;;  %3510 = vmatprep.subr.mxu1 %v8358_v50 }
 0xd4e   :  { %3440 = vmatpush1.msra.mxu0 %v8359_v7  ;;  %3511 = vmatpush1.msra.mxu1 %v8360_v42 }
 0xd4f   :  { %3441 = vmatprep.subr.mxu0 %v8361_v43  ;;  %3512 = vmatprep.subr.mxu1 %v8362_v44 }
 0xd50   :  { %3442 = vmatpush1.msra.mxu0 %v7196_v46  ;;  %3513 = vmatpush1.msra.mxu1 %v7202_v59 }
 0xd51   :  { %3443 = vmatprep.subr.mxu0 %v7208_v33  ;;  %3514 = vmatprep.subr.mxu1 %v7214_v6 }
 0xd52   :  { %3444 = vmatpush1.msra.mxu0 %v7318_v47  ;;  %3515 = vmatpush1.msra.mxu1 %v7324_v60 }
 0xd53   :  { %3445 = vmatprep.subr.mxu0 %v7330_v58  ;;  %3516 = vmatprep.subr.mxu1 %v7336_v57 }
 0xd54   :  { %3446 = vmatpush1.msra.mxu0 %v7342_v0  ;;  %3517 = vmatpush1.msra.mxu1 %v7348_v54 }
 0xd55   :  { %3447 = vmatprep.subr.mxu0 %v7354_v62  ;;  %3518 = vmatprep.subr.mxu1 %v7360_v20 }
 0xd56   :  { %3448 = vmatpush1.msra.mxu0 %v8389_v51  ;;  %3519 = vmatpush1.msra.mxu1 %v8390_v41 }
 0xd57   :  { %3449 = vmatprep.subr.mxu0 %v8391_v15  ;;  %3520 = vmatprep.subr.mxu1 %v8392_v14  ;;  %v8418_v15 = vld [vmem:[#allocation50_spill] sm:$0xff] }
 0xd58   :  { %3450 = vmatpush1.msra.mxu0 %v8393_v16  ;;  %3521 = vmatpush1.msra.mxu1 %v8394_v17 }
 0xd59   :  { %3451 = vmatprep.subr.mxu0 %v8395_v18  ;;  %3522 = vmatprep.subr.mxu1 %v8396_v39 }
 0xd5a   :  { %3452 = vmatpush1.msra.mxu0 %v8397_v10  ;;  %3523 = vmatpush1.msra.mxu1 %v8398_v29  ;;  %v8408_v10 = vld [vmem:[#allocation11_spill] sm:$0xff] }
 0xd5b   :  { %3453 = vmatprep.subr.mxu0 %v8399_v3  ;;  %3524 = vmatprep.subr.mxu1 %v8400_v12  ;;  %v8409_v29 = vld [vmem:[#allocation31_spill] sm:$0xff]  ;;  %v8410_v3 = vmov 0.0   ;;  %v8411_v12 = vld [vmem:[#allocation33_spill] sm:$0xff] }
 0xd5c   :  { %3454 = vmatpush1.msra.mxu0 %v8401_v28  ;;  %3525 = vmatpush1.msra.mxu1 %v8402_v61  ;;  %v8412_v61 = vld [vmem:[#allocation34_spill] sm:$0xff] }
 0xd5d   :  { %3455 = vmatprep.subr.mxu0 %v8403_v11  ;;  %3526 = vmatprep.subr.mxu1 %v8404_v13  ;;  %v8413_v11 = vld [vmem:[#allocation32_spill] sm:$0xff]  ;;  %v8414_v13 = vld [vmem:[#allocation51_spill] sm:$0xff] }
 0xd5e   :  { %3456 = vmatpush1.msra.mxu0 %v8405_v40  ;;  %3527 = vmatpush1.msra.mxu1 %v8406_v36  ;;  %v8415_v40 = vld [vmem:[#allocation49_spill] sm:$0xff] }
 0xd5f   :  { %3457 = vmatprep.subr.mxu0 %v8407_v37  ;;  %3528 = vmatprep.subr.mxu1 %v8408_v10  ;;  %v2114_v28 = vadd.f32 %v8415_v40, %v8414_v13  ;;  %v8416_v37 = vld [vmem:[#allocation48_spill] sm:$0xff]  ;;  %v2227_v40 = vadd.f32 %v8418_v15, %v6837_v53 }
 0xd60   :  { %3458 = vmatpush1.msra.mxu0 %v8409_v29  ;;  %3491 = vmatprep.mubr.f32.mxu0 %v8410_v3  ;;  %v2116_v39 = vadd.f32 %v8416_v37, %v6820_v25 }
 0xd61   :  { %3529 = vmatpush1.msra.mxu1 %v8411_v12  ;;  %3562 = vmatprep.mubr.f32.mxu1 %v8410_v3 }
 0xd62   :  { %3608 = vmatprep.subr.mxu0 %v8412_v61  ;;  %3679 = vmatprep.subr.mxu1 %v8413_v11  ;;  %v8417_v61 = vld [vmem:[#allocation55_spill] sm:$0xff] }
 0xd63   :  { %v2229_v14 = vadd.f32 %v8417_v61, %v8314_v63 }
 0xe01   :  { %v3312_v36 = vpop.f32.mrf.mxu0  ;;  %v3383_v16 = vpop.f32.mrf.mxu1 }
 0xe02   :  { %v3388_v10 = vadd.f32 %v3312_v36, %v2114_v28  ;;  %v3390_v13 = vadd.f32 %v3383_v16, %v2227_v40 }
 0xe03   :  { %v3314_v18 = vpop.f32.mrf.mxu0  ;;  %v3385_v3 = vpop.f32.mrf.mxu1 }
 0xe04   :  { %v3936_v29 = vmul.f32 -1.442695, %v3388_v10  ;;  %v3389_v17 = vadd.f32 %v3314_v18, %v2116_v39  ;;  %v3391_v11 = vadd.f32 %v3385_v3, %v2229_v14 }
 0xe06   :  { %4212 = vpow2.f32 %v3936_v29  ;;  %v3937_v12 = vmul.f32 -1.442695, %v3389_v17  ;;  %v3938_v41 = vmul.f32 -1.442695, %v3391_v11 }
 0xe08   :  { %4214 = vpow2.f32 %v3937_v12 }
 0xe09   :  { %4216 = vtanh.f32 %v3390_v13 }
 0xe0a   :  { %4218 = vpow2.f32 %v3938_v41 }
 0xe13   :  { %v4213_v51 = vpop.eup %4212 }
 0xe14   :  { %v3395_v37 = vadd.f32 1.0, %v4213_v51  ;;  %v3939_v51 = vld [vmem:[%s7784_s1 + $0x28] sm:$0xff] }
 0xe15   :  { %v4215_v28 = vpop.eup %4214 }
 0xe16   :  { %4220 = vrcp.f32 %v3395_v37  ;;  %v3401_v18 = vadd.f32 1.0, %v4215_v28  ;;  %v4217_v17 = vpop.eup %4216 }
 0xe17   :  { %v4219_v39 = vpop.eup %4218 }
 0xe18   :  { %4222 = vrcp.f32 %v3401_v18  ;;  %v3408_v36 = vadd.f32 1.0, %v4219_v39 }
 0xe1a   :  { %4224 = vrcp.f32 %v3408_v36 }
 0xe23   :  { %v4221_v10 = vpop.eup %4220 }
 0xe24   :  { %v3412_v29 = vmul.f32 %v4221_v10, %v4217_v17 }
 0xe25   :  { %v4223_v12 = vpop.eup %4222 }
 0xe26   :  { %v3411_v14 = vmul.f32 %v4223_v12, %v7513_v38 }
 0xe27   :  { %v4225_v13 = vpop.eup %4224 }
 0xe28   :  { %v3413_v3 = vadd.f32 %v3412_v29, %v3411_v14 }
 0xe2a   :  { %4226 = vtanh.f32 %v3413_v3  ;;  %v3417_v41 = vsub.f32 %v3413_v3, %v7513_v38 }
 0xe2c   :  { %v3418_v15 = vmul.f32 %v3939_v51, %v3417_v41 }
 0xe2e   :  { %v7601_v16 = vadd.f32 %v3418_v15, %v7513_v38 }
 0xe37   :  { %v4227_v61 = vpop.eup %4226 }
 0xe38   :  { %v3415_v11 = vmul.f32 %v4227_v61, %v4225_v13  ;;  %v3943_v61 = vld [vmem:[%s7784_s1 + $0x30] sm:$0xff] }
 0xe3a   :  { %v3420_v40 = vsub.f32 %v3415_v11, %v7517_v35 }
 0xe3c   :  { %v3421_v37 = vmul.f32 %v3939_v51, %v3420_v40 }
 0xe3e   :  { %v7605_v28 = vadd.f32 %v3421_v37, %v7517_v35 }
 0xe40   :  { %3492 = vmatmul.mubr.f32.vlgmr.msra.gmra.mxu0 %v7605_v28  ;;  %3563 = vmatmul.mubr.f32.vlgmr.msra.gmra.mxu1 %v7605_v28 }
 0xe41   :  { %3609 = vmatpush1.msra.mxu0 %v7028_v45  ;;  %3680 = vmatpush1.msra.mxu1 %v7034_v19  ;;  %v8419_v45 = vld [vmem:[#allocation35_spill] sm:$0xff]  ;;  %v8420_v19 = vld [vmem:[#allocation37_spill] sm:$0xff] }
 0xe42   :  { %3610 = vmatprep.subr.mxu0 %v7040_v49  ;;  %3681 = vmatprep.subr.mxu1 %v7046_v26  ;;  %v8421_v49 = vld [vmem:[#allocation38_spill] sm:$0xff]  ;;  %v8422_v26 = vld [vmem:[#allocation36_spill] sm:$0xff] }
 0xe43   :  { %3611 = vmatpush1.msra.mxu0 %v7052_v5  ;;  %3682 = vmatpush1.msra.mxu1 %v7058_v27  ;;  %v8423_v5 = vld [vmem:[#allocation5_spill] sm:$0xff] }
 0xe44   :  { %3612 = vmatprep.subr.mxu0 %v7064_v23  ;;  %3683 = vmatprep.subr.mxu1 %v7070_v52  ;;  %v8424_v27 = vld [vmem:[#allocation29_spill] sm:$0xff]  ;;  %v8425_v23 = vld [vmem:[#allocation30_spill] sm:$0xff]  ;;  %v8426_v52 = vld [vmem:[#allocation39_spill] sm:$0xff] }
 0xe45   :  { %3613 = vmatpush1.msra.mxu0 %v7076_v21  ;;  %3684 = vmatpush1.msra.mxu1 %v7082_v34  ;;  %v8427_v21 = vld [vmem:[#allocation41_spill] sm:$0xff]  ;;  %v8428_v34 = vld [vmem:[#allocation42_spill] sm:$0xff] }
 0xe46   :  { %3614 = vmatprep.subr.mxu0 %v7088_v22  ;;  %3685 = vmatprep.subr.mxu1 %v7094_v48  ;;  %v8429_v22 = vld [vmem:[#allocation40_spill] sm:$0xff]  ;;  %v8430_v48 = vld [vmem:[#allocation7_spill] sm:$0xff] }
 0xe47   :  { %3615 = vmatpush1.msra.mxu0 %v7100_v1  ;;  %3686 = vmatpush1.msra.mxu1 %v7106_v4  ;;  %v8431_v1 = vld [vmem:[#allocation8_spill] sm:$0xff]  ;;  %v8432_v4 = vld [vmem:[#allocation43_spill] sm:$0xff] }
 0xe48   :  { %3616 = vmatprep.subr.mxu0 %v7112_v2  ;;  %3687 = vmatprep.subr.mxu1 %v7118_v30  ;;  %v8433_v2 = vld [vmem:[#allocation45_spill] sm:$0xff]  ;;  %v8434_v30 = vld [vmem:[#allocation46_spill] sm:$0xff] }
 0xe49   :  { %3617 = vmatpush1.msra.mxu0 %v7124_v31  ;;  %3688 = vmatpush1.msra.mxu1 %v7130_v32  ;;  %v8435_v31 = vld [vmem:[#allocation44_spill] sm:$0xff]  ;;  %v8436_v32 = vld [vmem:[#allocation9_spill] sm:$0xff] }
 0xe4a   :  { %3618 = vmatprep.subr.mxu0 %v7136_v56  ;;  %3689 = vmatprep.subr.mxu1 %v7142_v8  ;;  %v8437_v56 = vld [vmem:[#allocation10_spill] sm:$0xff]  ;;  %v8438_v8 = vld [vmem:[#allocation11_spill] sm:$0xff] }
 0xe4b   :  { %3619 = vmatpush1.msra.mxu0 %v7148_v9  ;;  %3690 = vmatpush1.msra.mxu1 %v7154_v55  ;;  %v8439_v9 = vld [vmem:[#allocation31_spill] sm:$0xff]  ;;  %v8440_v55 = vmov 0.0  }
 0xe4c   :  { %3620 = vmatprep.subr.mxu0 %v7160_v24  ;;  %3691 = vmatprep.subr.mxu1 %v8358_v50  ;;  %v8441_v24 = vld [vmem:[#allocation33_spill] sm:$0xff]  ;;  %v8444_v50 = vld [vmem:[#allocation28_spill] sm:$0xff] }
 0xe4d   :  { %3621 = vmatpush1.msra.mxu0 %v8359_v7  ;;  %3692 = vmatpush1.msra.mxu1 %v8360_v42  ;;  %v2122_v7 = vadd.f32 %v8444_v50, %v6820_v25 }
 0xe4e   :  { %3622 = vmatprep.subr.mxu0 %v8361_v43  ;;  %3693 = vmatprep.subr.mxu1 %v8362_v44 }
 0xe4f   :  { %3623 = vmatpush1.msra.mxu0 %v7196_v46  ;;  %3694 = vmatpush1.msra.mxu1 %v7202_v59  ;;  %v8443_v46 = vld [vmem:[#allocation6_spill] sm:$0xff] }
 0xe50   :  { %3624 = vmatprep.subr.mxu0 %v7208_v33  ;;  %3695 = vmatprep.subr.mxu1 %v7214_v6  ;;  %v8442_v6 = vld [vmem:[#allocation51_spill] sm:$0xff] }
 0xe51   :  { %3625 = vmatpush1.msra.mxu0 %v7318_v47  ;;  %3696 = vmatpush1.msra.mxu1 %v7324_v60  ;;  %v2120_v59 = vadd.f32 %v8443_v46, %v8442_v6 }
 0xe52   :  { %3626 = vmatprep.subr.mxu0 %v7330_v58  ;;  %3697 = vmatprep.subr.mxu1 %v7336_v57 }
 0xe53   :  { %3627 = vmatpush1.msra.mxu0 %v7342_v0  ;;  %3698 = vmatpush1.msra.mxu1 %v7348_v54  ;;  %v8445_v0 = vld [vmem:[#allocation53_spill] sm:$0xff] }
 0xe54   :  { %3628 = vmatprep.subr.mxu0 %v7354_v62  ;;  %3699 = vmatprep.subr.mxu1 %v7360_v20  ;;  %v2235_v54 = vadd.f32 %v8445_v0, %v8314_v63  ;;  %v8446_v20 = vld [vmem:[#allocation4_spill] sm:$0xff] }
 0xe55   :  { %3629 = vmatpush1.msra.mxu0 %v8419_v45  ;;  %3700 = vmatpush1.msra.mxu1 %v8420_v19  ;;  %v2233_v38 = vadd.f32 %v8446_v20, %v6837_v53  ;;  %v8450_v0 = vld [vmem:[#allocation52_spill] sm:$0xff] }
 0xe56   :  { %3630 = vmatprep.subr.mxu0 %v8421_v49  ;;  %3701 = vmatprep.subr.mxu1 %v8422_v26 }
 0xe57   :  { %3631 = vmatpush1.msra.mxu0 %v8423_v5  ;;  %3702 = vmatpush1.msra.mxu1 %v8424_v27 }
 0xe58   :  { %3632 = vmatprep.subr.mxu0 %v8425_v23  ;;  %3703 = vmatprep.subr.mxu1 %v8426_v52  ;;  %v3797_v23 = vld [vmem:[%s7788_s8 + $0x78] sm:$0xff]  ;;  %v3794_v52 = vld [vmem:[%s7788_s8 + $0x60] sm:$0xff] }
 0xe59   :  { %3633 = vmatpush1.msra.mxu0 %v8427_v21  ;;  %3704 = vmatpush1.msra.mxu1 %v8428_v34  ;;  %v3793_v21 = vld [vmem:[%s7788_s8 + $0x58] sm:$0xff]  ;;  %v3792_v34 = vld [vmem:[%s7788_s8 + $0x50] sm:$0xff] }
 0xe5a   :  { %3634 = vmatprep.subr.mxu0 %v8429_v22  ;;  %3705 = vmatprep.subr.mxu1 %v8430_v48  ;;  %v3791_v22 = vld [vmem:[%s7788_s8 + $0x48] sm:$0xff]  ;;  %v3790_v48 = vld [vmem:[%s7788_s8 + $0x40] sm:$0xff] }
 0xe5b   :  { %3635 = vmatpush1.msra.mxu0 %v8431_v1  ;;  %3706 = vmatpush1.msra.mxu1 %v8432_v4  ;;  %v3789_v1 = vld [vmem:[%s7788_s8 + $0x38] sm:$0xff]  ;;  %v3788_v4 = vld [vmem:[%s7788_s8 + $0x30] sm:$0xff] }
 0xe5c   :  { %3636 = vmatprep.subr.mxu0 %v8433_v2  ;;  %3707 = vmatprep.subr.mxu1 %v8434_v30  ;;  %v3787_v2 = vld [vmem:[%s7788_s8 + $0x28] sm:$0xff]  ;;  %v3786_v30 = vld [vmem:[%s7788_s8 + $0x20] sm:$0xff] }
 0xe5d   :  { %3637 = vmatpush1.msra.mxu0 %v8435_v31  ;;  %3708 = vmatpush1.msra.mxu1 %v8436_v32  ;;  %v3785_v31 = vld [vmem:[%s7788_s8 + $0x18] sm:$0xff]  ;;  %v3784_v32 = vld [vmem:[%s7788_s8 + $0x10] sm:$0xff] }
 0xe5e   :  { %3638 = vmatprep.subr.mxu0 %v8437_v56  ;;  %3709 = vmatprep.subr.mxu1 %v8438_v8  ;;  %v3783_v56 = vld [vmem:[%s7788_s8 + $0x8] sm:$0xff]  ;;  %v3782_v8 = vld [vmem:[%s7788_s8] sm:$0xff] }
 0xe5f   :  { %3639 = vmatpush1.msra.mxu0 %v8439_v9  ;;  %3672 = vmatprep.mubr.f32.mxu0 %v8440_v55  ;;  %v8447_v9 = vld [vmem:[#allocation54_spill] sm:$0xff] }
 0xe60   :  { %3710 = vmatpush1.msra.mxu1 %v8441_v24  ;;  %3743 = vmatprep.mubr.f32.mxu1 %v8440_v55  ;;  %v2126_v24 = vadd.f32 %v8447_v9, %v8442_v6  ;;  %v2239_v6 = vadd.f32 %v8450_v0, %v6837_v53 }
 0xe61   :  { %3967 = vmatprep.subr.mxu0 %v8440_v55 }
 0xf00   :  { %v3493_v33 = vpop.f32.mrf.mxu0  ;;  %v3564_v60 = vpop.f32.mrf.mxu1 }
 0xf01   :  { %v3569_v42 = vadd.f32 %v3493_v33, %v2120_v59  ;;  %v3571_v35 = vadd.f32 %v3564_v60, %v2233_v38  ;;  %v8448_v59 = vld [vmem:[#allocation27_spill] sm:$0xff] }
 0xf02   :  { %v3495_v43 = vpop.f32.mrf.mxu0  ;;  %v3566_v57 = vpop.f32.mrf.mxu1  ;;  %v2128_v33 = vadd.f32 %v8448_v59, %v6820_v25 }
 0xf03   :  { %v3940_v44 = vmul.f32 -1.442695, %v3569_v42  ;;  %v3570_v47 = vadd.f32 %v3495_v43, %v2122_v7  ;;  %v3572_v62 = vadd.f32 %v3566_v57, %v2235_v54 }
 0xf05   :  { %4228 = vpow2.f32 %v3940_v44  ;;  %v3941_v58 = vmul.f32 -1.442695, %v3570_v47  ;;  %v3942_v18 = vmul.f32 -1.442695, %v3572_v62 }
 0xf07   :  { %4230 = vpow2.f32 %v3941_v58  ;;  %v8449_v58 = vld [vmem:[#allocation56_spill] sm:$0xff] }
 0xf08   :  { %4232 = vtanh.f32 %v3571_v35 }
 0xf09   :  { %4234 = vpow2.f32 %v3942_v18 }
 0xf12   :  { %v4229_v17 = vpop.eup %4228 }
 0xf13   :  { %v3576_v39 = vadd.f32 1.0, %v4229_v17 }
 0xf14   :  { %v4231_v10 = vpop.eup %4230 }
 0xf15   :  { %4236 = vrcp.f32 %v3576_v39  ;;  %v3582_v29 = vadd.f32 1.0, %v4231_v10  ;;  %v4233_v12 = vpop.eup %4232 }
 0xf16   :  { %v4235_v36 = vpop.eup %4234 }
 0xf17   :  { %4238 = vrcp.f32 %v3582_v29  ;;  %v3589_v41 = vadd.f32 1.0, %v4235_v36 }
 0xf19   :  { %4240 = vrcp.f32 %v3589_v41 }
 0xf22   :  { %v4237_v14 = vpop.eup %4236 }
 0xf23   :  { %v3593_v3 = vmul.f32 %v4237_v14, %v4233_v12 }
 0xf24   :  { %v4239_v51 = vpop.eup %4238 }
 0xf25   :  { %v3592_v15 = vmul.f32 %v4239_v51, %v7601_v16  ;;  %v3947_v51 = vld [vmem:[%s7784_s1 + $0x38] sm:$0xff] }
 0xf26   :  { %v4241_v45 = vpop.eup %4240 }
 0xf27   :  { %v3594_v13 = vadd.f32 %v3593_v3, %v3592_v15 }
 0xf29   :  { %4242 = vtanh.f32 %v3594_v13  ;;  %v3598_v11 = vsub.f32 %v3594_v13, %v7601_v16 }
 0xf2b   :  { %v3599_v40 = vmul.f32 %v3943_v61, %v3598_v11 }
 0xf2d   :  { %v7688_v37 = vadd.f32 %v3599_v40, %v7601_v16  ;;  %v3796_v16 = vld [vmem:[%s7788_s8 + $0x70] sm:$0xff] }
 0xf36   :  { %v4243_v19 = vpop.eup %4242 }
 0xf37   :  { %v3596_v49 = vmul.f32 %v4243_v19, %v4241_v45 }
 0xf39   :  { %v3601_v26 = vsub.f32 %v3596_v49, %v7605_v28 }
 0xf3b   :  { %v3602_v5 = vmul.f32 %v3943_v61, %v3601_v26  ;;  %v3948_v61 = vld [vmem:[%s7789_s9] ss:$0 sm:$0xff] }
 0xf3d   :  { %v7692_v27 = vadd.f32 %v3602_v5, %v7605_v28  ;;  %v3795_v28 = vld [vmem:[%s7788_s8 + $0x68] sm:$0xff] }
 0xf3f   :  { %3673 = vmatmul.mubr.f32.vlgmr.msra.gmra.mxu0 %v7692_v27  ;;  %3744 = vmatmul.mubr.f32.vlgmr.msra.gmra.mxu1 %v7692_v27 }
 0xf40   :  { %3968 = vmatpush3.msra.mxu0 %v3797_v23  ;;  %3999 = vmatprep.mubr.msk.f32.mxu0 %vm4393_vm0, %v8440_v55 }
 0xf41   :  { %3969 = vmatprep.subr.mxu0 %v8440_v55 }
 0xf42   :  { %3970 = vmatpush3.msra.mxu0 %v3796_v16 }
 0xf43   :  { %3971 = vmatprep.subr.mxu0 %v8440_v55 }
 0xf44   :  { %3972 = vmatpush3.msra.mxu0 %v3795_v28 }
 0xf45   :  { %3973 = vmatprep.subr.mxu0 %v8440_v55 }
 0xf46   :  { %3974 = vmatpush3.msra.mxu0 %v3794_v52 }
 0xf47   :  { %3975 = vmatprep.subr.mxu0 %v8440_v55 }
 0xf48   :  { %3976 = vmatpush3.msra.mxu0 %v3793_v21 }
 0xf49   :  { %3977 = vmatprep.subr.mxu0 %v8440_v55 }
 0xf4a   :  { %3978 = vmatpush3.msra.mxu0 %v3792_v34 }
 0xf4b   :  { %3979 = vmatprep.subr.mxu0 %v8440_v55 }
 0xf4c   :  { %3980 = vmatpush3.msra.mxu0 %v3791_v22 }
 0xf4d   :  { %3981 = vmatprep.subr.mxu0 %v8440_v55 }
 0xf4e   :  { %3982 = vmatpush3.msra.mxu0 %v3790_v48 }
 0xf4f   :  { %3983 = vmatprep.subr.mxu0 %v8440_v55 }
 0xf50   :  { %3984 = vmatpush3.msra.mxu0 %v3789_v1 }
 0xf51   :  { %3985 = vmatprep.subr.mxu0 %v8440_v55 }
 0xf52   :  { %3986 = vmatpush3.msra.mxu0 %v3788_v4 }
 0xf53   :  { %3987 = vmatprep.subr.mxu0 %v8440_v55 }
 0xf54   :  { %3988 = vmatpush3.msra.mxu0 %v3787_v2 }
 0xf55   :  { %3989 = vmatprep.subr.mxu0 %v8440_v55 }
 0xf56   :  { %3990 = vmatpush3.msra.mxu0 %v3786_v30 }
 0xf57   :  { %3991 = vmatprep.subr.mxu0 %v8440_v55 }
 0xf58   :  { %3992 = vmatpush3.msra.mxu0 %v3785_v31 }
 0xf59   :  { %3993 = vmatprep.subr.mxu0 %v8440_v55 }
 0xf5a   :  { %3994 = vmatpush3.msra.mxu0 %v3784_v32 }
 0xf5b   :  { %3995 = vmatprep.subr.mxu0 %v8440_v55 }
 0xf5c   :  { %3996 = vmatpush3.msra.mxu0 %v3783_v56 }
 0xf5d   :  { %3997 = vmatprep.subr.mxu0 %v8440_v55  ;;  %v2241_v55 = vadd.f32 %v8449_v58, %v8314_v63 }
 0xf5e   :  { %3998 = vmatpush3.msra.mxu0 %v3782_v8 }
 0xfff   :  { %v3674_v46 = vpop.f32.mrf.mxu0  ;;  %v3745_v44 = vpop.f32.mrf.mxu1 }
0x1000   :  { %v3750_v50 = vadd.f32 %v3674_v46, %v2126_v24  ;;  %v3752_v54 = vadd.f32 %v3745_v44, %v2239_v6 }
0x1001   :  { %v3676_v7 = vpop.f32.mrf.mxu0  ;;  %v3747_v60 = vpop.f32.mrf.mxu1 }
0x1002   :  { %v3944_v42 = vmul.f32 -1.442695, %v3750_v50  ;;  %v3751_v43 = vadd.f32 %v3676_v7, %v2128_v33  ;;  %v3753_v57 = vadd.f32 %v3747_v60, %v2241_v55 }
0x1004   :  { %4244 = vpow2.f32 %v3944_v42  ;;  %v3945_v47 = vmul.f32 -1.442695, %v3751_v43  ;;  %v3946_v62 = vmul.f32 -1.442695, %v3753_v57 }
0x1006   :  { %4246 = vpow2.f32 %v3945_v47 }
0x1007   :  { %4248 = vtanh.f32 %v3752_v54 }
0x1008   :  { %4250 = vpow2.f32 %v3946_v62 }
0x1011   :  { %v4245_v20 = vpop.eup %4244 }
0x1012   :  { %v3757_v25 = vadd.f32 1.0, %v4245_v20 }
0x1013   :  { %v4247_v38 = vpop.eup %4246 }
0x1014   :  { %4252 = vrcp.f32 %v3757_v25  ;;  %v3763_v35 = vadd.f32 1.0, %v4247_v38  ;;  %v4249_v18 = vpop.eup %4248 }
0x1015   :  { %v4251_v17 = vpop.eup %4250 }
0x1016   :  { %4254 = vrcp.f32 %v3763_v35  ;;  %v3770_v63 = vadd.f32 1.0, %v4251_v17 }
0x1018   :  { %4256 = vrcp.f32 %v3770_v63 }
0x1021   :  { %v4253_v39 = vpop.eup %4252 }
0x1022   :  { %v3774_v10 = vmul.f32 %v4253_v39, %v4249_v18 }
0x1023   :  { %v4255_v29 = vpop.eup %4254 }
0x1024   :  { %v3773_v12 = vmul.f32 %v4255_v29, %v7688_v37 }
0x1025   :  { %v4257_v53 = vpop.eup %4256 }
0x1026   :  { %v3775_v36 = vadd.f32 %v3774_v10, %v3773_v12 }
0x1028   :  { %4258 = vtanh.f32 %v3775_v36 }
0x1035   :  { %v4259_v14 = vpop.eup %4258 }
0x1036   :  { %v3777_v3 = vmul.f32 %v4259_v14, %v4257_v53 }
0x1038   :  { %v3779_v41 = vsub.f32 %v3777_v3, %v7692_v27 }
0x103a   :  { %v3780_v15 = vmul.f32 %v3947_v51, %v3779_v41 }
0x103c   :  { %v3781_v13 = vadd.f32 %v3780_v15, %v7692_v27 }
0x103e   :  { %4000 = vmatmul.mubr.f32.vlgmr.msra.gmra.mxu0 %v3781_v13 }
0x10fe   :  { %v3871_v11 = vpop.f32.mrf.mxu0 }
0x10ff   :  { %v3872_v40 = vadd.f32 %v3948_v61, %v3871_v11 }
0x1100   :  { %v4001_v37 = vpop.f32.mrf.mxu0 }
0x1101   :  { %v3949_v45 = vmul.f32 -1.442695, %v3872_v40 }
0x1103   :  { %4260 = vpow2.f32 %v3949_v45 }
0x1110   :  { %v4261_v19 = vpop.eup %4260 }
0x1111   :  { %v3878_v49 = vadd.f32 1.0, %v4261_v19 }
0x1113   :  { %4262 = vrcp.f32 %v3878_v49 }
0x1120   :  { %v4263_v26 = vpop.eup %4262 }
0x1121   :  { %3881 = vst [vmem:[%s7790_s10] sm:$0xff] %v4263_v26 }

</bundles_post_ra>
